<compile_context>
chip_gen: v7x
topology: tpu7x:2x2x1
jax: 0.10.0
libtpu: 0.0.40
codegen_flags: <defaults>
</compile_context>

<pallas_src>
import math

import jax
import jax.numpy as jnp
from jax import lax
from jax.experimental import pallas as pl
from jax.experimental.pallas import tpu as pltpu

# ---------------------------------------------------------------------------
# Network architecture (matches the PyTorch module)
# ---------------------------------------------------------------------------
ACTOR_SIZES = [32, 64, 128, 256, 128, 64, 32]                      # hidden widths
ACTOR_ACTS  = ["tanh", "tanh", "relu", "tanh", "relu", "relu", "tanh", "tanh"]
CRITIC_ACTS = ["tanh", "relu", "relu", "tanh", "relu", "relu", "tanh", "none"]

HIDDEN0 = 32            # width of the (fused) first layer of each network
N_ACTOR_TAIL = 7        # actor layers 1..7 (layer 0 is fused with critic's)
N_CRITIC_TAIL = 6       # critic layers 1..6 (layer 7 is the 32->1 head)
LOG_2PI = math.log(2.0 * math.pi)


def _apply_act(h, act):
    if act == "tanh":
        return jnp.tanh(h)
    if act == "relu":
        return jnp.maximum(h, 0.0)
    return h


def _mm(h, w):
    # MXU matmul in the weight dtype (bf16 on v6e/v7x), f32 accumulation.
    return jnp.dot(h.astype(w.dtype), w, preferred_element_type=jnp.float32)


def _forward_core(state, action, nhiv, w0, b0, actor_wb, critic_wb,
                  wc_head, bc_head):
    """Shared math for kernel and reference.

    Every argument is either a VMEM Ref (kernel) or a jnp array (reference);
    `x[...]` loads the former and is a no-op on the latter.
    Returns a lane-dense (2, B) array: row 0 = -0.5*quad, row 1 = value.
    """
    x = state[...].astype(jnp.float32)
    act_in = action[...].astype(jnp.float32)

    # Fused actor/critic layer 0 (shared input, both Tanh), then split.
    h0 = jnp.tanh(_mm(x, w0[...]) + b0[...])                   # (B, 64)
    h_a, h_c = h0[:, :HIDDEN0], h0[:, HIDDEN0:]

    for (w, b), a in zip(actor_wb, ACTOR_ACTS[1:]):
        h_a = _apply_act(_mm(h_a, w[...]) + b[...], a)         # -> (B, A)
    for (w, b), a in zip(critic_wb, CRITIC_ACTS[1:-1]):
        h_c = _apply_act(_mm(h_c, w[...]) + b[...], a)         # -> (B, 32)

    diff = act_in - h_a                                        # (B, A) f32

    # Lane-major reductions via K-contraction (A*B^T pattern): directly
    # produces (1, B) rows, fusing the reduction, the critic head and the
    # output "transpose" into two tiny matmuls. All f32.
    dn = (((1,), (1,)), ((), ()))
    lp_row = lax.dot_general(nhiv[...], diff * diff, dn,
                             preferred_element_type=jnp.float32)        # (1, B)
    val_row = lax.dot_general(wc_head[...], h_c, dn,
                              preferred_element_type=jnp.float32)
    val_row = val_row + bc_head[...]                                    # (1, B)
    return jnp.concatenate([lp_row, val_row], axis=0)                   # (2, B)


# ---------------------------------------------------------------------------
# Pallas kernel
# ---------------------------------------------------------------------------
def _actor_critic_kernel(state_ref, action_ref, nhiv_ref, w0_ref, b0_ref, *rest):
    na, nc = 2 * N_ACTOR_TAIL, 2 * N_CRITIC_TAIL
    actor_wb = [(rest[2 * i], rest[2 * i + 1]) for i in range(N_ACTOR_TAIL)]
    critic_wb = [(rest[na + 2 * i], rest[na + 2 * i + 1])
                 for i in range(N_CRITIC_TAIL)]
    wc_head_ref = rest[na + nc]
    bc_head_ref = rest[na + nc + 1]
    out_ref = rest[na + nc + 2]

    out_ref[...] = _forward_core(state_ref, action_ref, nhiv_ref, w0_ref, b0_ref,
                                 actor_wb, critic_wb, wc_head_ref, bc_head_ref)


# ---------------------------------------------------------------------------
# Parameter packing / init
# ---------------------------------------------------------------------------
def _pack_params(actor_params, critic_params, matmul_dtype):
    (w0a, b0a), (w0c, b0c) = actor_params[0], critic_params[0]
    w0 = jnp.concatenate([w0a, w0c], axis=1).astype(matmul_dtype)        # (S, 64)
    b0 = jnp.concatenate([b0a, b0c]).reshape(1, -1).astype(jnp.float32)  # (1, 64)
    actor_rest = [(w.astype(matmul_dtype), b.reshape(1, -1).astype(jnp.float32))
                  for w, b in actor_params[1:]]
    critic_rest = [(w.astype(matmul_dtype), b.reshape(1, -1).astype(jnp.float32))
                   for w, b in critic_params[1:-1]]
    wc_last, bc_last = critic_params[-1]
    wc_head = wc_last.reshape(1, -1).astype(jnp.float32)                 # (1, 32)
    bc_head = bc_last.reshape(1, 1).astype(jnp.float32)                  # (1, 1)
    return w0, b0, actor_rest, critic_rest, wc_head, bc_head


def _init_linear(key, fan_in, fan_out):
    kw, kb = jax.random.split(key)
    bound = 1.0 / math.sqrt(fan_in)
    w = jax.random.uniform(kw, (fan_in, fan_out), jnp.float32, -bound, bound)
    b = jax.random.uniform(kb, (fan_out,), jnp.float32, -bound, bound)
    return w, b


def init_actor_critic_params(key, state_dim, action_dim):
    actor_dims = [state_dim] + ACTOR_SIZES + [action_dim]
    critic_dims = [state_dim] + ACTOR_SIZES + [1]
    keys = jax.random.split(key, len(actor_dims) - 1 + len(critic_dims) - 1)
    actor, critic, k = [], [], 0
    for i in range(len(actor_dims) - 1):
        actor.append(_init_linear(keys[k], actor_dims[i], actor_dims[i + 1])); k += 1
    for i in range(len(critic_dims) - 1):
        critic.append(_init_linear(keys[k], critic_dims[i], critic_dims[i + 1])); k += 1
    return actor, critic


def _round_up(x, m):
    return ((x + m - 1) // m) * m


# ---------------------------------------------------------------------------
# Wrapper: ActorCritic.evaluate(state, action)
# ---------------------------------------------------------------------------
def actor_critic_evaluate(state, action, action_var, actor_params, critic_params,
                          *, block_b=512, matmul_dtype=jnp.bfloat16):
    """Returns (action_logprobs (B,), state_value (B,), dist_entropy (B,))."""
    B, S = state.shape
    A = action.shape[-1]
    state = state.astype(jnp.float32)
    action = action.astype(jnp.float32)
    action_var = action_var.astype(jnp.float32)

    w0, b0, actor_rest, critic_rest, wc_head, bc_head = _pack_params(
        actor_params, critic_params, matmul_dtype)
    nhiv = (-0.5 / action_var).reshape(1, A)                # -0.5 * inv(var)

    # ---- batch tiling -------------------------------------------------------
    if B > block_b:
        assert block_b % 128 == 0, "multi-tile block_b must be a multiple of 128"
        tb = block_b
    else:
        tb = _round_up(B, 8)
    B_pad = _round_up(B, tb)
    if B_pad != B:
        pad = B_pad - B
        state = jnp.pad(state, ((0, pad), (0, 0)))
        action = jnp.pad(action, ((0, pad), (0, 0)))
    n_steps = B_pad // tb

    def _batch_spec(ncols):
        return pl.BlockSpec((tb, ncols), lambda i: (i, 0))

    def _const_spec(x):                                     # VMEM-resident params
        return pl.BlockSpec(x.shape, lambda i: (0, 0))

    inputs = [state, action, nhiv, w0, b0]
    in_specs = [_batch_spec(S), _batch_spec(A), _const_spec(nhiv),
                _const_spec(w0), _const_spec(b0)]
    for w, b in actor_rest + critic_rest:
        inputs += [w, b]
        in_specs += [_const_spec(w), _const_spec(b)]
    inputs += [wc_head, bc_head]
    in_specs += [_const_spec(wc_head), _const_spec(bc_head)]

    out = pl.pallas_call(
        _actor_critic_kernel,
        out_shape=jax.ShapeDtypeStruct((2, B_pad), jnp.float32),
        grid_spec=pltpu.PrefetchScalarGridSpec(
            num_scalar_prefetch=0,
            grid=(n_steps,),
            in_specs=in_specs,
            out_specs=pl.BlockSpec((2, tb), lambda i: (0, i)),
        ),
        compiler_params=pltpu.CompilerParams(
            dimension_semantics=("parallel",),
            vmem_limit_bytes=32 * 1024 * 1024,
        ),
    )(*inputs)

    # ---- batch-invariant tail math (hoisted out of the kernel) --------------
    log_det = jnp.sum(jnp.log(action_var))
    logp = out[0, :B] - 0.5 * (log_det + A * LOG_2PI)
    value = out[1, :B]
    entropy = jnp.broadcast_to(0.5 * A * (1.0 + LOG_2PI) + 0.5 * log_det, (B,))
    return logp, value, entropy


# ---------------------------------------------------------------------------
# Pure-JAX reference (same precision policy -> tight tolerance check)
# ---------------------------------------------------------------------------
def _ref_evaluate(state, action, action_var, actor_params, critic_params,
                  matmul_dtype=jnp.bfloat16):
    w0, b0, actor_rest, critic_rest, wc_head, bc_head = _pack_params(
        actor_params, critic_params, matmul_dtype)
    nhiv = (-0.5 / action_var).reshape(1, -1)
    packed = _forward_core(state, action, nhiv, w0, b0,
                           actor_rest, critic_rest, wc_head, bc_head)
    B, A = state.shape[0], action.shape[-1]
    log_det = jnp.sum(jnp.log(action_var))
    logp = packed[0] - 0.5 * (log_det + A * LOG_2PI)
    value = packed[1]
    entropy = jnp.broadcast_to(0.5 * A * (1.0 + LOG_2PI) + 0.5 * log_det, (B,))
    return logp, value, entropy


# ---------------------------------------------------------------------------
if __name__ == "__main__":
    key = jax.random.PRNGKey(0)

    state_dim, action_dim, action_std = 8, 4, 0.5
    batch = 300   # exercises the multi-tile grid + tail padding (B_pad=384, 3 steps)

    k_params, k_state, k_action = jax.random.split(key, 3)
    actor_params, critic_params = init_actor_critic_params(k_params, state_dim, action_dim)

    state = jax.random.normal(k_state, (batch, state_dim), jnp.float32)
    action = jax.random.normal(k_action, (batch, action_dim), jnp.float32)
    action_var = jnp.full((action_dim,), action_std * action_std, jnp.float32)

    logp, value, ent = actor_critic_evaluate(
        state, action, action_var, actor_params, critic_params, block_b=128)
    jax.block_until_ready((logp, value, ent))

    logp_r, value_r, ent_r = _ref_evaluate(
        state, action, action_var, actor_params, critic_params)

    assert logp.shape == (batch,) and value.shape == (batch,) and ent.shape == (batch,)
    assert jnp.allclose(logp, logp_r, atol=5e-3, rtol=5e-3)
    assert jnp.allclose(value, value_r, atol=5e-3, rtol=5e-3)
    assert jnp.allclose(ent, ent_r, atol=1e-5, rtol=1e-5)

    # TODO(synk): `act()`'s MVN sampling (random draw) is left to jax.random
    # outside the kernel; only the deterministic evaluate() path is fused here.

    print("KERNEL_OK")
</pallas_src>

<mosaic_0001>
module attributes {stable_mosaic.version = 11 : i64} {
  func.func @_actor_critic_kernel(%arg0: i32, %arg1: memref<128x8xf32, #tpu.memory_space<vmem>>, %arg2: memref<128x4xf32, #tpu.memory_space<vmem>>, %arg3: memref<1x4xf32, #tpu.memory_space<vmem>>, %arg4: memref<8x64xbf16, #tpu.memory_space<vmem>>, %arg5: memref<1x64xf32, #tpu.memory_space<vmem>>, %arg6: memref<32x64xbf16, #tpu.memory_space<vmem>>, %arg7: memref<1x64xf32, #tpu.memory_space<vmem>>, %arg8: memref<64x128xbf16, #tpu.memory_space<vmem>>, %arg9: memref<1x128xf32, #tpu.memory_space<vmem>>, %arg10: memref<128x256xbf16, #tpu.memory_space<vmem>>, %arg11: memref<1x256xf32, #tpu.memory_space<vmem>>, %arg12: memref<256x128xbf16, #tpu.memory_space<vmem>>, %arg13: memref<1x128xf32, #tpu.memory_space<vmem>>, %arg14: memref<128x64xbf16, #tpu.memory_space<vmem>>, %arg15: memref<1x64xf32, #tpu.memory_space<vmem>>, %arg16: memref<64x32xbf16, #tpu.memory_space<vmem>>, %arg17: memref<1x32xf32, #tpu.memory_space<vmem>>, %arg18: memref<32x4xbf16, #tpu.memory_space<vmem>>, %arg19: memref<1x4xf32, #tpu.memory_space<vmem>>, %arg20: memref<32x64xbf16, #tpu.memory_space<vmem>>, %arg21: memref<1x64xf32, #tpu.memory_space<vmem>>, %arg22: memref<64x128xbf16, #tpu.memory_space<vmem>>, %arg23: memref<1x128xf32, #tpu.memory_space<vmem>>, %arg24: memref<128x256xbf16, #tpu.memory_space<vmem>>, %arg25: memref<1x256xf32, #tpu.memory_space<vmem>>, %arg26: memref<256x128xbf16, #tpu.memory_space<vmem>>, %arg27: memref<1x128xf32, #tpu.memory_space<vmem>>, %arg28: memref<128x64xbf16, #tpu.memory_space<vmem>>, %arg29: memref<1x64xf32, #tpu.memory_space<vmem>>, %arg30: memref<64x32xbf16, #tpu.memory_space<vmem>>, %arg31: memref<1x32xf32, #tpu.memory_space<vmem>>, %arg32: memref<1x32xf32, #tpu.memory_space<vmem>>, %arg33: memref<1x1xf32, #tpu.memory_space<vmem>>, %arg34: memref<2x128xf32, #tpu.memory_space<vmem>>) attributes {dimension_semantics = [#tpu.dimension_semantics<parallel>], iteration_bounds = array<i64: 3>, scalar_prefetch = 0 : i64, scratch_operands = 0 : i64, tpu.core_type = #tpu.core_type<tc>, window_params = [{transform_indices = @transform_0, window_bounds = array<i64: 128, 8>}, {transform_indices = @transform_1, window_bounds = array<i64: 128, 4>}, {pipeline_mode = #tpu.pipeline_mode<synchronous>, transform_indices = @transform_2, window_bounds = array<i64: 1, 4>}, {pipeline_mode = #tpu.pipeline_mode<synchronous>, transform_indices = @transform_3, window_bounds = array<i64: 8, 64>}, {pipeline_mode = #tpu.pipeline_mode<synchronous>, transform_indices = @transform_4, window_bounds = array<i64: 1, 64>}, {pipeline_mode = #tpu.pipeline_mode<synchronous>, transform_indices = @transform_5, window_bounds = array<i64: 32, 64>}, {pipeline_mode = #tpu.pipeline_mode<synchronous>, transform_indices = @transform_6, window_bounds = array<i64: 1, 64>}, {pipeline_mode = #tpu.pipeline_mode<synchronous>, transform_indices = @transform_7, window_bounds = array<i64: 64, 128>}, {pipeline_mode = #tpu.pipeline_mode<synchronous>, transform_indices = @transform_8, window_bounds = array<i64: 1, 128>}, {pipeline_mode = #tpu.pipeline_mode<synchronous>, transform_indices = @transform_9, window_bounds = array<i64: 128, 256>}, {pipeline_mode = #tpu.pipeline_mode<synchronous>, transform_indices = @transform_10, window_bounds = array<i64: 1, 256>}, {pipeline_mode = #tpu.pipeline_mode<synchronous>, transform_indices = @transform_11, window_bounds = array<i64: 256, 128>}, {pipeline_mode = #tpu.pipeline_mode<synchronous>, transform_indices = @transform_12, window_bounds = array<i64: 1, 128>}, {pipeline_mode = #tpu.pipeline_mode<synchronous>, transform_indices = @transform_13, window_bounds = array<i64: 128, 64>}, {pipeline_mode = #tpu.pipeline_mode<synchronous>, transform_indices = @transform_14, window_bounds = array<i64: 1, 64>}, {pipeline_mode = #tpu.pipeline_mode<synchronous>, transform_indices = @transform_15, window_bounds = array<i64: 64, 32>}, {pipeline_mode = #tpu.pipeline_mode<synchronous>, transform_indices = @transform_16, window_bounds = array<i64: 1, 32>}, {pipeline_mode = #tpu.pipeline_mode<synchronous>, transform_indices = @transform_17, window_bounds = array<i64: 32, 4>}, {pipeline_mode = #tpu.pipeline_mode<synchronous>, transform_indices = @transform_18, window_bounds = array<i64: 1, 4>}, {pipeline_mode = #tpu.pipeline_mode<synchronous>, transform_indices = @transform_19, window_bounds = array<i64: 32, 64>}, {pipeline_mode = #tpu.pipeline_mode<synchronous>, transform_indices = @transform_20, window_bounds = array<i64: 1, 64>}, {pipeline_mode = #tpu.pipeline_mode<synchronous>, transform_indices = @transform_21, window_bounds = array<i64: 64, 128>}, {pipeline_mode = #tpu.pipeline_mode<synchronous>, transform_indices = @transform_22, window_bounds = array<i64: 1, 128>}, {pipeline_mode = #tpu.pipeline_mode<synchronous>, transform_indices = @transform_23, window_bounds = array<i64: 128, 256>}, {pipeline_mode = #tpu.pipeline_mode<synchronous>, transform_indices = @transform_24, window_bounds = array<i64: 1, 256>}, {pipeline_mode = #tpu.pipeline_mode<synchronous>, transform_indices = @transform_25, window_bounds = array<i64: 256, 128>}, {pipeline_mode = #tpu.pipeline_mode<synchronous>, transform_indices = @transform_26, window_bounds = array<i64: 1, 128>}, {pipeline_mode = #tpu.pipeline_mode<synchronous>, transform_indices = @transform_27, window_bounds = array<i64: 128, 64>}, {pipeline_mode = #tpu.pipeline_mode<synchronous>, transform_indices = @transform_28, window_bounds = array<i64: 1, 64>}, {pipeline_mode = #tpu.pipeline_mode<synchronous>, transform_indices = @transform_29, window_bounds = array<i64: 64, 32>}, {pipeline_mode = #tpu.pipeline_mode<synchronous>, transform_indices = @transform_30, window_bounds = array<i64: 1, 32>}, {pipeline_mode = #tpu.pipeline_mode<synchronous>, transform_indices = @transform_31, window_bounds = array<i64: 1, 32>}, {pipeline_mode = #tpu.pipeline_mode<synchronous>, transform_indices = @transform_32, window_bounds = array<i64: 1, 1>}, {transform_indices = @transform_33, window_bounds = array<i64: 2, 128>}]} {
    %c0 = arith.constant 0 : index
    %c0_0 = arith.constant 0 : index
    %0 = vector.load %arg1[%c0, %c0_0] : memref<128x8xf32, #tpu.memory_space<vmem>>, vector<128x8xf32>
    %c0_1 = arith.constant 0 : index
    %c0_2 = arith.constant 0 : index
    %1 = vector.load %arg2[%c0_1, %c0_2] : memref<128x4xf32, #tpu.memory_space<vmem>>, vector<128x4xf32>
    %c0_3 = arith.constant 0 : index
    %c0_4 = arith.constant 0 : index
    %2 = vector.load %arg4[%c0_3, %c0_4] : memref<8x64xbf16, #tpu.memory_space<vmem>>, vector<8x64xbf16>
    %3 = arith.truncf %0 : vector<128x8xf32> to vector<128x8xbf16>
    %cst = arith.constant dense<0.000000e+00> : vector<128x64xf32>
    %4 = tpu.matmul %3, %2, %cst {dimension_numbers = #tpu.dot_dimension_numbers<[1], [0], [0], [1], [0, 0, 1, 1], [], []>} : vector<128x8xbf16>, vector<8x64xbf16>, vector<128x64xf32> -> vector<128x64xf32>
    %c0_5 = arith.constant 0 : index
    %c0_6 = arith.constant 0 : index
    %5 = vector.load %arg5[%c0_5, %c0_6] : memref<1x64xf32, #tpu.memory_space<vmem>>, vector<1x64xf32>
    %6 = vector.broadcast %5 : vector<1x64xf32> to vector<128x64xf32>
    %7 = arith.addf %4, %6 : vector<128x64xf32>
    %8 = math.tanh %7 : vector<128x64xf32>
    %9 = vector.extract_strided_slice %8 {offsets = [0, 0], sizes = [128, 32], strides = [1, 1]} : vector<128x64xf32> to vector<128x32xf32>
    %10 = vector.extract_strided_slice %8 {offsets = [0, 32], sizes = [128, 32], strides = [1, 1]} : vector<128x64xf32> to vector<128x32xf32>
    %c0_7 = arith.constant 0 : index
    %c0_8 = arith.constant 0 : index
    %11 = vector.load %arg6[%c0_7, %c0_8] : memref<32x64xbf16, #tpu.memory_space<vmem>>, vector<32x64xbf16>
    %12 = arith.truncf %9 : vector<128x32xf32> to vector<128x32xbf16>
    %cst_9 = arith.constant dense<0.000000e+00> : vector<128x64xf32>
    %13 = tpu.matmul %12, %11, %cst_9 {dimension_numbers = #tpu.dot_dimension_numbers<[1], [0], [0], [1], [0, 0, 1, 1], [], []>} : vector<128x32xbf16>, vector<32x64xbf16>, vector<128x64xf32> -> vector<128x64xf32>
    %c0_10 = arith.constant 0 : index
    %c0_11 = arith.constant 0 : index
    %14 = vector.load %arg7[%c0_10, %c0_11] : memref<1x64xf32, #tpu.memory_space<vmem>>, vector<1x64xf32>
    %15 = vector.broadcast %14 : vector<1x64xf32> to vector<128x64xf32>
    %16 = arith.addf %13, %15 : vector<128x64xf32>
    %17 = math.tanh %16 : vector<128x64xf32>
    %c0_12 = arith.constant 0 : index
    %c0_13 = arith.constant 0 : index
    %18 = vector.load %arg8[%c0_12, %c0_13] : memref<64x128xbf16, #tpu.memory_space<vmem>>, vector<64x128xbf16>
    %19 = arith.truncf %17 : vector<128x64xf32> to vector<128x64xbf16>
    %cst_14 = arith.constant dense<0.000000e+00> : vector<128x128xf32>
    %20 = tpu.matmul %19, %18, %cst_14 {dimension_numbers = #tpu.dot_dimension_numbers<[1], [0], [0], [1], [0, 0, 1, 1], [], []>} : vector<128x64xbf16>, vector<64x128xbf16>, vector<128x128xf32> -> vector<128x128xf32>
    %c0_15 = arith.constant 0 : index
    %c0_16 = arith.constant 0 : index
    %21 = vector.load %arg9[%c0_15, %c0_16] : memref<1x128xf32, #tpu.memory_space<vmem>>, vector<1x128xf32>
    %22 = vector.broadcast %21 : vector<1x128xf32> to vector<128x128xf32>
    %23 = arith.addf %20, %22 : vector<128x128xf32>
    %cst_17 = arith.constant 0.000000e+00 : f32
    %24 = vector.broadcast %cst_17 : f32 to vector<128x128xf32>
    %25 = arith.maximumf %23, %24 : vector<128x128xf32>
    %c0_18 = arith.constant 0 : index
    %c0_19 = arith.constant 0 : index
    %26 = vector.load %arg10[%c0_18, %c0_19] : memref<128x256xbf16, #tpu.memory_space<vmem>>, vector<128x256xbf16>
    %27 = arith.truncf %25 : vector<128x128xf32> to vector<128x128xbf16>
    %cst_20 = arith.constant dense<0.000000e+00> : vector<128x256xf32>
    %28 = tpu.matmul %27, %26, %cst_20 {dimension_numbers = #tpu.dot_dimension_numbers<[1], [0], [0], [1], [0, 0, 1, 1], [], []>} : vector<128x128xbf16>, vector<128x256xbf16>, vector<128x256xf32> -> vector<128x256xf32>
    %c0_21 = arith.constant 0 : index
    %c0_22 = arith.constant 0 : index
    %29 = vector.load %arg11[%c0_21, %c0_22] : memref<1x256xf32, #tpu.memory_space<vmem>>, vector<1x256xf32>
    %30 = vector.broadcast %29 : vector<1x256xf32> to vector<128x256xf32>
    %31 = arith.addf %28, %30 : vector<128x256xf32>
    %32 = math.tanh %31 : vector<128x256xf32>
    %c0_23 = arith.constant 0 : index
    %c0_24 = arith.constant 0 : index
    %33 = vector.load %arg12[%c0_23, %c0_24] : memref<256x128xbf16, #tpu.memory_space<vmem>>, vector<256x128xbf16>
    %34 = arith.truncf %32 : vector<128x256xf32> to vector<128x256xbf16>
    %cst_25 = arith.constant dense<0.000000e+00> : vector<128x128xf32>
    %35 = tpu.matmul %34, %33, %cst_25 {dimension_numbers = #tpu.dot_dimension_numbers<[1], [0], [0], [1], [0, 0, 1, 1], [], []>} : vector<128x256xbf16>, vector<256x128xbf16>, vector<128x128xf32> -> vector<128x128xf32>
    %c0_26 = arith.constant 0 : index
    %c0_27 = arith.constant 0 : index
    %36 = vector.load %arg13[%c0_26, %c0_27] : memref<1x128xf32, #tpu.memory_space<vmem>>, vector<1x128xf32>
    %37 = vector.broadcast %36 : vector<1x128xf32> to vector<128x128xf32>
    %38 = arith.addf %35, %37 : vector<128x128xf32>
    %cst_28 = arith.constant 0.000000e+00 : f32
    %39 = vector.broadcast %cst_28 : f32 to vector<128x128xf32>
    %40 = arith.maximumf %38, %39 : vector<128x128xf32>
    %c0_29 = arith.constant 0 : index
    %c0_30 = arith.constant 0 : index
    %41 = vector.load %arg14[%c0_29, %c0_30] : memref<128x64xbf16, #tpu.memory_space<vmem>>, vector<128x64xbf16>
    %42 = arith.truncf %40 : vector<128x128xf32> to vector<128x128xbf16>
    %cst_31 = arith.constant dense<0.000000e+00> : vector<128x64xf32>
    %43 = tpu.matmul %42, %41, %cst_31 {dimension_numbers = #tpu.dot_dimension_numbers<[1], [0], [0], [1], [0, 0, 1, 1], [], []>} : vector<128x128xbf16>, vector<128x64xbf16>, vector<128x64xf32> -> vector<128x64xf32>
    %c0_32 = arith.constant 0 : index
    %c0_33 = arith.constant 0 : index
    %44 = vector.load %arg15[%c0_32, %c0_33] : memref<1x64xf32, #tpu.memory_space<vmem>>, vector<1x64xf32>
    %45 = vector.broadcast %44 : vector<1x64xf32> to vector<128x64xf32>
    %46 = arith.addf %43, %45 : vector<128x64xf32>
    %cst_34 = arith.constant 0.000000e+00 : f32
    %47 = vector.broadcast %cst_34 : f32 to vector<128x64xf32>
    %48 = arith.maximumf %46, %47 : vector<128x64xf32>
    %c0_35 = arith.constant 0 : index
    %c0_36 = arith.constant 0 : index
    %49 = vector.load %arg16[%c0_35, %c0_36] : memref<64x32xbf16, #tpu.memory_space<vmem>>, vector<64x32xbf16>
    %50 = arith.truncf %48 : vector<128x64xf32> to vector<128x64xbf16>
    %cst_37 = arith.constant dense<0.000000e+00> : vector<128x32xf32>
    %51 = tpu.matmul %50, %49, %cst_37 {dimension_numbers = #tpu.dot_dimension_numbers<[1], [0], [0], [1], [0, 0, 1, 1], [], []>} : vector<128x64xbf16>, vector<64x32xbf16>, vector<128x32xf32> -> vector<128x32xf32>
    %c0_38 = arith.constant 0 : index
    %c0_39 = arith.constant 0 : index
    %52 = vector.load %arg17[%c0_38, %c0_39] : memref<1x32xf32, #tpu.memory_space<vmem>>, vector<1x32xf32>
    %53 = vector.broadcast %52 : vector<1x32xf32> to vector<128x32xf32>
    %54 = arith.addf %51, %53 : vector<128x32xf32>
    %55 = math.tanh %54 : vector<128x32xf32>
    %c0_40 = arith.constant 0 : index
    %c0_41 = arith.constant 0 : index
    %56 = vector.load %arg18[%c0_40, %c0_41] : memref<32x4xbf16, #tpu.memory_space<vmem>>, vector<32x4xbf16>
    %57 = arith.truncf %55 : vector<128x32xf32> to vector<128x32xbf16>
    %cst_42 = arith.constant dense<0.000000e+00> : vector<128x4xf32>
    %58 = tpu.matmul %57, %56, %cst_42 {dimension_numbers = #tpu.dot_dimension_numbers<[1], [0], [0], [1], [0, 0, 1, 1], [], []>} : vector<128x32xbf16>, vector<32x4xbf16>, vector<128x4xf32> -> vector<128x4xf32>
    %c0_43 = arith.constant 0 : index
    %c0_44 = arith.constant 0 : index
    %59 = vector.load %arg19[%c0_43, %c0_44] : memref<1x4xf32, #tpu.memory_space<vmem>>, vector<1x4xf32>
    %60 = vector.broadcast %59 : vector<1x4xf32> to vector<128x4xf32>
    %61 = arith.addf %58, %60 : vector<128x4xf32>
    %62 = math.tanh %61 : vector<128x4xf32>
    %c0_45 = arith.constant 0 : index
    %c0_46 = arith.constant 0 : index
    %63 = vector.load %arg20[%c0_45, %c0_46] : memref<32x64xbf16, #tpu.memory_space<vmem>>, vector<32x64xbf16>
    %64 = arith.truncf %10 : vector<128x32xf32> to vector<128x32xbf16>
    %cst_47 = arith.constant dense<0.000000e+00> : vector<128x64xf32>
    %65 = tpu.matmul %64, %63, %cst_47 {dimension_numbers = #tpu.dot_dimension_numbers<[1], [0], [0], [1], [0, 0, 1, 1], [], []>} : vector<128x32xbf16>, vector<32x64xbf16>, vector<128x64xf32> -> vector<128x64xf32>
    %c0_48 = arith.constant 0 : index
    %c0_49 = arith.constant 0 : index
    %66 = vector.load %arg21[%c0_48, %c0_49] : memref<1x64xf32, #tpu.memory_space<vmem>>, vector<1x64xf32>
    %67 = vector.broadcast %66 : vector<1x64xf32> to vector<128x64xf32>
    %68 = arith.addf %65, %67 : vector<128x64xf32>
    %cst_50 = arith.constant 0.000000e+00 : f32
    %69 = vector.broadcast %cst_50 : f32 to vector<128x64xf32>
    %70 = arith.maximumf %68, %69 : vector<128x64xf32>
    %c0_51 = arith.constant 0 : index
    %c0_52 = arith.constant 0 : index
    %71 = vector.load %arg22[%c0_51, %c0_52] : memref<64x128xbf16, #tpu.memory_space<vmem>>, vector<64x128xbf16>
    %72 = arith.truncf %70 : vector<128x64xf32> to vector<128x64xbf16>
    %cst_53 = arith.constant dense<0.000000e+00> : vector<128x128xf32>
    %73 = tpu.matmul %72, %71, %cst_53 {dimension_numbers = #tpu.dot_dimension_numbers<[1], [0], [0], [1], [0, 0, 1, 1], [], []>} : vector<128x64xbf16>, vector<64x128xbf16>, vector<128x128xf32> -> vector<128x128xf32>
    %c0_54 = arith.constant 0 : index
    %c0_55 = arith.constant 0 : index
    %74 = vector.load %arg23[%c0_54, %c0_55] : memref<1x128xf32, #tpu.memory_space<vmem>>, vector<1x128xf32>
    %75 = vector.broadcast %74 : vector<1x128xf32> to vector<128x128xf32>
    %76 = arith.addf %73, %75 : vector<128x128xf32>
    %cst_56 = arith.constant 0.000000e+00 : f32
    %77 = vector.broadcast %cst_56 : f32 to vector<128x128xf32>
    %78 = arith.maximumf %76, %77 : vector<128x128xf32>
    %c0_57 = arith.constant 0 : index
    %c0_58 = arith.constant 0 : index
    %79 = vector.load %arg24[%c0_57, %c0_58] : memref<128x256xbf16, #tpu.memory_space<vmem>>, vector<128x256xbf16>
    %80 = arith.truncf %78 : vector<128x128xf32> to vector<128x128xbf16>
    %cst_59 = arith.constant dense<0.000000e+00> : vector<128x256xf32>
    %81 = tpu.matmul %80, %79, %cst_59 {dimension_numbers = #tpu.dot_dimension_numbers<[1], [0], [0], [1], [0, 0, 1, 1], [], []>} : vector<128x128xbf16>, vector<128x256xbf16>, vector<128x256xf32> -> vector<128x256xf32>
    %c0_60 = arith.constant 0 : index
    %c0_61 = arith.constant 0 : index
    %82 = vector.load %arg25[%c0_60, %c0_61] : memref<1x256xf32, #tpu.memory_space<vmem>>, vector<1x256xf32>
    %83 = vector.broadcast %82 : vector<1x256xf32> to vector<128x256xf32>
    %84 = arith.addf %81, %83 : vector<128x256xf32>
    %85 = math.tanh %84 : vector<128x256xf32>
    %c0_62 = arith.constant 0 : index
    %c0_63 = arith.constant 0 : index
    %86 = vector.load %arg26[%c0_62, %c0_63] : memref<256x128xbf16, #tpu.memory_space<vmem>>, vector<256x128xbf16>
    %87 = arith.truncf %85 : vector<128x256xf32> to vector<128x256xbf16>
    %cst_64 = arith.constant dense<0.000000e+00> : vector<128x128xf32>
    %88 = tpu.matmul %87, %86, %cst_64 {dimension_numbers = #tpu.dot_dimension_numbers<[1], [0], [0], [1], [0, 0, 1, 1], [], []>} : vector<128x256xbf16>, vector<256x128xbf16>, vector<128x128xf32> -> vector<128x128xf32>
    %c0_65 = arith.constant 0 : index
    %c0_66 = arith.constant 0 : index
    %89 = vector.load %arg27[%c0_65, %c0_66] : memref<1x128xf32, #tpu.memory_space<vmem>>, vector<1x128xf32>
    %90 = vector.broadcast %89 : vector<1x128xf32> to vector<128x128xf32>
    %91 = arith.addf %88, %90 : vector<128x128xf32>
    %cst_67 = arith.constant 0.000000e+00 : f32
    %92 = vector.broadcast %cst_67 : f32 to vector<128x128xf32>
    %93 = arith.maximumf %91, %92 : vector<128x128xf32>
    %c0_68 = arith.constant 0 : index
    %c0_69 = arith.constant 0 : index
    %94 = vector.load %arg28[%c0_68, %c0_69] : memref<128x64xbf16, #tpu.memory_space<vmem>>, vector<128x64xbf16>
    %95 = arith.truncf %93 : vector<128x128xf32> to vector<128x128xbf16>
    %cst_70 = arith.constant dense<0.000000e+00> : vector<128x64xf32>
    %96 = tpu.matmul %95, %94, %cst_70 {dimension_numbers = #tpu.dot_dimension_numbers<[1], [0], [0], [1], [0, 0, 1, 1], [], []>} : vector<128x128xbf16>, vector<128x64xbf16>, vector<128x64xf32> -> vector<128x64xf32>
    %c0_71 = arith.constant 0 : index
    %c0_72 = arith.constant 0 : index
    %97 = vector.load %arg29[%c0_71, %c0_72] : memref<1x64xf32, #tpu.memory_space<vmem>>, vector<1x64xf32>
    %98 = vector.broadcast %97 : vector<1x64xf32> to vector<128x64xf32>
    %99 = arith.addf %96, %98 : vector<128x64xf32>
    %cst_73 = arith.constant 0.000000e+00 : f32
    %100 = vector.broadcast %cst_73 : f32 to vector<128x64xf32>
    %101 = arith.maximumf %99, %100 : vector<128x64xf32>
    %c0_74 = arith.constant 0 : index
    %c0_75 = arith.constant 0 : index
    %102 = vector.load %arg30[%c0_74, %c0_75] : memref<64x32xbf16, #tpu.memory_space<vmem>>, vector<64x32xbf16>
    %103 = arith.truncf %101 : vector<128x64xf32> to vector<128x64xbf16>
    %cst_76 = arith.constant dense<0.000000e+00> : vector<128x32xf32>
    %104 = tpu.matmul %103, %102, %cst_76 {dimension_numbers = #tpu.dot_dimension_numbers<[1], [0], [0], [1], [0, 0, 1, 1], [], []>} : vector<128x64xbf16>, vector<64x32xbf16>, vector<128x32xf32> -> vector<128x32xf32>
    %c0_77 = arith.constant 0 : index
    %c0_78 = arith.constant 0 : index
    %105 = vector.load %arg31[%c0_77, %c0_78] : memref<1x32xf32, #tpu.memory_space<vmem>>, vector<1x32xf32>
    %106 = vector.broadcast %105 : vector<1x32xf32> to vector<128x32xf32>
    %107 = arith.addf %104, %106 : vector<128x32xf32>
    %108 = math.tanh %107 : vector<128x32xf32>
    %109 = arith.subf %1, %62 : vector<128x4xf32>
    %c0_79 = arith.constant 0 : index
    %c0_80 = arith.constant 0 : index
    %110 = vector.load %arg3[%c0_79, %c0_80] : memref<1x4xf32, #tpu.memory_space<vmem>>, vector<1x4xf32>
    %111 = arith.mulf %109, %109 : vector<128x4xf32>
    %cst_81 = arith.constant dense<0.000000e+00> : vector<1x128xf32>
    %112 = tpu.matmul %110, %111, %cst_81 {dimension_numbers = #tpu.dot_dimension_numbers<[1], [1], [0], [0], [0, 0, 1, 0], [], []>} : vector<1x4xf32>, vector<128x4xf32>, vector<1x128xf32> -> vector<1x128xf32>
    %c0_82 = arith.constant 0 : index
    %c0_83 = arith.constant 0 : index
    %113 = vector.load %arg32[%c0_82, %c0_83] : memref<1x32xf32, #tpu.memory_space<vmem>>, vector<1x32xf32>
    %cst_84 = arith.constant dense<0.000000e+00> : vector<1x128xf32>
    %114 = tpu.matmul %113, %108, %cst_84 {dimension_numbers = #tpu.dot_dimension_numbers<[1], [1], [0], [0], [0, 0, 1, 0], [], []>} : vector<1x32xf32>, vector<128x32xf32>, vector<1x128xf32> -> vector<1x128xf32>
    %c0_85 = arith.constant 0 : index
    %c0_86 = arith.constant 0 : index
    %115 = vector.load %arg33[%c0_85, %c0_86] : memref<1x1xf32, #tpu.memory_space<vmem>>, vector<1x1xf32>
    %116 = vector.broadcast %115 : vector<1x1xf32> to vector<1x128xf32>
    %117 = arith.addf %114, %116 : vector<1x128xf32>
    %118 = tpu.concatenate %112, %117 in 0 : vector<1x128xf32>, vector<1x128xf32> -> vector<2x128xf32>
    %c0_87 = arith.constant 0 : index
    %c0_88 = arith.constant 0 : index
    %119 = vector.load %arg34[%c0_87, %c0_88] : memref<2x128xf32, #tpu.memory_space<vmem>>, vector<2x128xf32>
    tpu.vector_store %arg34[%c0_87, %c0_88], %118 {strides = array<i32>} : memref<2x128xf32, #tpu.memory_space<vmem>>, vector<2x128xf32>,
    return
  }
  func.func @transform_0(%arg0: i32) -> (i32, i32) {
    %c0_i32 = arith.constant 0 : i32
    %c0_i32_0 = arith.constant 0 : i32
    return %arg0, %c0_i32 : i32, i32
  }
  func.func @transform_1(%arg0: i32) -> (i32, i32) {
    %c0_i32 = arith.constant 0 : i32
    %c0_i32_0 = arith.constant 0 : i32
    return %arg0, %c0_i32 : i32, i32
  }
  func.func @transform_2(%arg0: i32) -> (i32, i32) {
    %c0_i32 = arith.constant 0 : i32
    %c0_i32_0 = arith.constant 0 : i32
    %c0_i32_1 = arith.constant 0 : i32
    return %c0_i32, %c0_i32_0 : i32, i32
  }
  func.func @transform_3(%arg0: i32) -> (i32, i32) {
    %c0_i32 = arith.constant 0 : i32
    %c0_i32_0 = arith.constant 0 : i32
    %c0_i32_1 = arith.constant 0 : i32
    return %c0_i32, %c0_i32_0 : i32, i32
  }
  func.func @transform_4(%arg0: i32) -> (i32, i32) {
    %c0_i32 = arith.constant 0 : i32
    %c0_i32_0 = arith.constant 0 : i32
    %c0_i32_1 = arith.constant 0 : i32
    return %c0_i32, %c0_i32_0 : i32, i32
  }
  func.func @transform_5(%arg0: i32) -> (i32, i32) {
    %c0_i32 = arith.constant 0 : i32
    %c0_i32_0 = arith.constant 0 : i32
    %c0_i32_1 = arith.constant 0 : i32
    return %c0_i32, %c0_i32_0 : i32, i32
  }
  func.func @transform_6(%arg0: i32) -> (i32, i32) {
    %c0_i32 = arith.constant 0 : i32
    %c0_i32_0 = arith.constant 0 : i32
    %c0_i32_1 = arith.constant 0 : i32
    return %c0_i32, %c0_i32_0 : i32, i32
  }
  func.func @transform_7(%arg0: i32) -> (i32, i32) {
    %c0_i32 = arith.constant 0 : i32
    %c0_i32_0 = arith.constant 0 : i32
    %c0_i32_1 = arith.constant 0 : i32
    return %c0_i32, %c0_i32_0 : i32, i32
  }
  func.func @transform_8(%arg0: i32) -> (i32, i32) {
    %c0_i32 = arith.constant 0 : i32
    %c0_i32_0 = arith.constant 0 : i32
    %c0_i32_1 = arith.constant 0 : i32
    return %c0_i32, %c0_i32_0 : i32, i32
  }
  func.func @transform_9(%arg0: i32) -> (i32, i32) {
    %c0_i32 = arith.constant 0 : i32
    %c0_i32_0 = arith.constant 0 : i32
    %c0_i32_1 = arith.constant 0 : i32
    return %c0_i32, %c0_i32_0 : i32, i32
  }
  func.func @transform_10(%arg0: i32) -> (i32, i32) {
    %c0_i32 = arith.constant 0 : i32
    %c0_i32_0 = arith.constant 0 : i32
    %c0_i32_1 = arith.constant 0 : i32
    return %c0_i32, %c0_i32_0 : i32, i32
  }
  func.func @transform_11(%arg0: i32) -> (i32, i32) {
    %c0_i32 = arith.constant 0 : i32
    %c0_i32_0 = arith.constant 0 : i32
    %c0_i32_1 = arith.constant 0 : i32
    return %c0_i32, %c0_i32_0 : i32, i32
  }
  func.func @transform_12(%arg0: i32) -> (i32, i32) {
    %c0_i32 = arith.constant 0 : i32
    %c0_i32_0 = arith.constant 0 : i32
    %c0_i32_1 = arith.constant 0 : i32
    return %c0_i32, %c0_i32_0 : i32, i32
  }
  func.func @transform_13(%arg0: i32) -> (i32, i32) {
    %c0_i32 = arith.constant 0 : i32
    %c0_i32_0 = arith.constant 0 : i32
    %c0_i32_1 = arith.constant 0 : i32
    return %c0_i32, %c0_i32_0 : i32, i32
  }
  func.func @transform_14(%arg0: i32) -> (i32, i32) {
    %c0_i32 = arith.constant 0 : i32
    %c0_i32_0 = arith.constant 0 : i32
    %c0_i32_1 = arith.constant 0 : i32
    return %c0_i32, %c0_i32_0 : i32, i32
  }
  func.func @transform_15(%arg0: i32) -> (i32, i32) {
    %c0_i32 = arith.constant 0 : i32
    %c0_i32_0 = arith.constant 0 : i32
    %c0_i32_1 = arith.constant 0 : i32
    return %c0_i32, %c0_i32_0 : i32, i32
  }
  func.func @transform_16(%arg0: i32) -> (i32, i32) {
    %c0_i32 = arith.constant 0 : i32
    %c0_i32_0 = arith.constant 0 : i32
    %c0_i32_1 = arith.constant 0 : i32
    return %c0_i32, %c0_i32_0 : i32, i32
  }
  func.func @transform_17(%arg0: i32) -> (i32, i32) {
    %c0_i32 = arith.constant 0 : i32
    %c0_i32_0 = arith.constant 0 : i32
    %c0_i32_1 = arith.constant 0 : i32
    return %c0_i32, %c0_i32_0 : i32, i32
  }
  func.func @transform_18(%arg0: i32) -> (i32, i32) {
    %c0_i32 = arith.constant 0 : i32
    %c0_i32_0 = arith.constant 0 : i32
    %c0_i32_1 = arith.constant 0 : i32
    return %c0_i32, %c0_i32_0 : i32, i32
  }
  func.func @transform_19(%arg0: i32) -> (i32, i32) {
    %c0_i32 = arith.constant 0 : i32
    %c0_i32_0 = arith.constant 0 : i32
    %c0_i32_1 = arith.constant 0 : i32
    return %c0_i32, %c0_i32_0 : i32, i32
  }
  func.func @transform_20(%arg0: i32) -> (i32, i32) {
    %c0_i32 = arith.constant 0 : i32
    %c0_i32_0 = arith.constant 0 : i32
    %c0_i32_1 = arith.constant 0 : i32
    return %c0_i32, %c0_i32_0 : i32, i32
  }
  func.func @transform_21(%arg0: i32) -> (i32, i32) {
    %c0_i32 = arith.constant 0 : i32
    %c0_i32_0 = arith.constant 0 : i32
    %c0_i32_1 = arith.constant 0 : i32
    return %c0_i32, %c0_i32_0 : i32, i32
  }
  func.func @transform_22(%arg0: i32) -> (i32, i32) {
    %c0_i32 = arith.constant 0 : i32
    %c0_i32_0 = arith.constant 0 : i32
    %c0_i32_1 = arith.constant 0 : i32
    return %c0_i32, %c0_i32_0 : i32, i32
  }
  func.func @transform_23(%arg0: i32) -> (i32, i32) {
    %c0_i32 = arith.constant 0 : i32
    %c0_i32_0 = arith.constant 0 : i32
    %c0_i32_1 = arith.constant 0 : i32
    return %c0_i32, %c0_i32_0 : i32, i32
  }
  func.func @transform_24(%arg0: i32) -> (i32, i32) {
    %c0_i32 = arith.constant 0 : i32
    %c0_i32_0 = arith.constant 0 : i32
    %c0_i32_1 = arith.constant 0 : i32
    return %c0_i32, %c0_i32_0 : i32, i32
  }
  func.func @transform_25(%arg0: i32) -> (i32, i32) {
    %c0_i32 = arith.constant 0 : i32
    %c0_i32_0 = arith.constant 0 : i32
    %c0_i32_1 = arith.constant 0 : i32
    return %c0_i32, %c0_i32_0 : i32, i32
  }
  func.func @transform_26(%arg0: i32) -> (i32, i32) {
    %c0_i32 = arith.constant 0 : i32
    %c0_i32_0 = arith.constant 0 : i32
    %c0_i32_1 = arith.constant 0 : i32
    return %c0_i32, %c0_i32_0 : i32, i32
  }
  func.func @transform_27(%arg0: i32) -> (i32, i32) {
    %c0_i32 = arith.constant 0 : i32
    %c0_i32_0 = arith.constant 0 : i32
    %c0_i32_1 = arith.constant 0 : i32
    return %c0_i32, %c0_i32_0 : i32, i32
  }
  func.func @transform_28(%arg0: i32) -> (i32, i32) {
    %c0_i32 = arith.constant 0 : i32
    %c0_i32_0 = arith.constant 0 : i32
    %c0_i32_1 = arith.constant 0 : i32
    return %c0_i32, %c0_i32_0 : i32, i32
  }
  func.func @transform_29(%arg0: i32) -> (i32, i32) {
    %c0_i32 = arith.constant 0 : i32
    %c0_i32_0 = arith.constant 0 : i32
    %c0_i32_1 = arith.constant 0 : i32
    return %c0_i32, %c0_i32_0 : i32, i32
  }
  func.func @transform_30(%arg0: i32) -> (i32, i32) {
    %c0_i32 = arith.constant 0 : i32
    %c0_i32_0 = arith.constant 0 : i32
    %c0_i32_1 = arith.constant 0 : i32
    return %c0_i32, %c0_i32_0 : i32, i32
  }
  func.func @transform_31(%arg0: i32) -> (i32, i32) {
    %c0_i32 = arith.constant 0 : i32
    %c0_i32_0 = arith.constant 0 : i32
    %c0_i32_1 = arith.constant 0 : i32
    return %c0_i32, %c0_i32_0 : i32, i32
  }
  func.func @transform_32(%arg0: i32) -> (i32, i32) {
    %c0_i32 = arith.constant 0 : i32
    %c0_i32_0 = arith.constant 0 : i32
    %c0_i32_1 = arith.constant 0 : i32
    return %c0_i32, %c0_i32_0 : i32, i32
  }
  func.func @transform_33(%arg0: i32) -> (i32, i32) {
    %c0_i32 = arith.constant 0 : i32
    %c0_i32_0 = arith.constant 0 : i32
    return %c0_i32, %arg0 : i32, i32
  }
}

</mosaic_0001>

<bundles_post_ra>
// kernel: tpu_custom_call.1
= control target key start
LH: loop header
LB: loop body
LE: loop exit
PB: predicated region body
PF: predicated region fallthrough
CT: control target
= control target key end

     0   :  { %s5760_s6 = smov 1   ;;  %s5761_s10 = smov 2   ;;  %s6660_s0 = inlined_call_operand.smem [shape: u32[34], index: -1, kind: input, shape index: {}] }
   0x1   :  { %s5807_s5 = sld [smem:[%s6660_s0]]   ;;  %s5762_s14 = smov 3  }
   0x2   :  { %s5812_s9 = sld [smem:[%s6660_s0 + %s5760_s6]]   ;;  %s5763_s18 = smov 4  }
   0x3   :  { %s5817_s13 = sld [smem:[%s6660_s0 + %s5761_s10]]   ;;  %s5764_s22 = smov 5  }
   0x4   :  { %s5822_s17 = sld [smem:[%s6660_s0 + %s5762_s14]]   ;;  %s5765_s26 = smov 6  }
   0x5   :  { %s5827_s21 = sld [smem:[%s6660_s0 + %s5763_s18]]   ;;  %s5766_s30 = smov 7  }
   0x6   :  { %s5832_s25 = sld [smem:[%s6660_s0 + %s5764_s22]]   ;;  %s5767_s4 = smov 8  }
   0x7   :  { %6674 = sst [smem:[#allocation6_spill]] %s5807_s5  ;;  %s5768_s10 = smov 9  }
   0x8   :  { %6675 = sst [smem:[#allocation7_spill]] %s5812_s9  ;;  %s5769_s15 = smov 10  }
   0x9   :  { %6676 = sst [smem:[#allocation8_spill]] %s5817_s13  ;;  %s5770_s20 = smov 11  }
   0xa   :  { %s5837_s29 = sld [smem:[%s6660_s0 + %s5765_s26]]   ;;  %s5771_s26 = smov 12  }
   0xb   :  { %s5842_s3 = sld [smem:[%s6660_s0 + %s5766_s30]]   ;;  %s5772_s1 = smov 13  }
   0xc   :  { %s5847_s8 = sld [smem:[%s6660_s0 + %s5767_s4]]   ;;  %s5773_s7 = smov 14  }
   0xd   :  { %s5852_s14 = sld [smem:[%s6660_s0 + %s5768_s10]]   ;;  %s5775_s22 = smov 16  }
   0xe   :  { %s5857_s19 = sld [smem:[%s6660_s0 + %s5769_s15]]   ;;  %s5774_s15 = smov 15  }
   0xf   :  { %s5862_s24 = sld [smem:[%s6660_s0 + %s5770_s20]]   ;;  %s5776_s28 = smov 17  }
  0x10   :  { %s5867_s30 = sld [smem:[%s6660_s0 + %s5771_s26]]  }
  0x11   :  { %6677 = sst [smem:[#allocation9_spill]] %s5842_s3 }
  0x12   :  { %6678 = sst [smem:[#allocation10_spill]] %s5847_s8 }
  0x13   :  { %s5872_s6 = sld [smem:[%s6660_s0 + %s5772_s1]]   ;;  %s5792_s1 = smov 33  }
  0x14   :  { %s5877_s12 = sld [smem:[%s6660_s0 + %s5773_s7]]   ;;  %s5777_s7 = smov 18  }
  0x15   :  { %s5882_s20 = sld [smem:[%s6660_s0 + %s5774_s15]]   ;;  %s5778_s15 = smov 19  }
  0x16   :  { %s5887_s27 = sld [smem:[%s6660_s0 + %s5775_s22]]   ;;  %s5779_s22 = smov 20  }
  0x17   :  { %s5892_s4 = sld [smem:[%s6660_s0 + %s5776_s28]]   ;;  %s5780_s28 = smov 21  }
  0x18   :  { %s5897_s13 = sld [smem:[%s6660_s0 + %s5777_s7]]   ;;  %s5781_s7 = smov 22  }
  0x19   :  { %6679 = sst [smem:[#allocation11_spill]] %s5872_s6 }
  0x1a   :  { %6680 = sst [smem:[#allocation12_spill]] %s5877_s12 }
  0x1b   :  { %s5902_s9 = sld [smem:[%s6660_s0 + %s5778_s15]]   ;;  %s5782_s15 = smov 23  }
  0x1c   :  { %6681 = sst [smem:[#allocation13_spill]] %s5887_s27 }
  0x1d   :  { %6682 = sst [smem:[#allocation14_spill]] %s5892_s4 }
  0x1e   :  { %6683 = sst [smem:[#allocation15_spill]] %s5897_s13 }
  0x1f   :  { %s5907_s27 = sld [smem:[%s6660_s0 + %s5779_s22]]   ;;  %s5783_s22 = smov 24  }
  0x20   :  { %s5912_s4 = sld [smem:[%s6660_s0 + %s5780_s28]]   ;;  %s5784_s28 = smov 25  }
  0x21   :  { %6684 = sst [smem:[#allocation16_spill]] %s5902_s9 }
  0x22   :  { %s5917_s13 = sld [smem:[%s6660_s0 + %s5781_s7]]   ;;  %s5785_s7 = smov 26  }
  0x23   :  { %s5922_s12 = sld [smem:[%s6660_s0 + %s5782_s15]]   ;;  %s5786_s15 = smov 27  }
  0x25   :  { %6685 = sst [smem:[#allocation17_spill]] %s5907_s27 }
  0x26   :  { %6686 = sst [smem:[#allocation18_spill]] %s5912_s4 }
  0x27   :  { %s5927_s27 = sld [smem:[%s6660_s0 + %s5783_s22]]   ;;  %s5787_s22 = smov 28  }
  0x28   :  { %6687 = sst [smem:[#allocation19_spill]] %s5917_s13 }
  0x29   :  { %6688 = sst [smem:[#allocation20_spill]] %s5922_s12 }
  0x2a   :  { %s5932_s4 = sld [smem:[%s6660_s0 + %s5784_s28]]   ;;  %s5788_s28 = smov 29  }
  0x2b   :  { %s5937_s13 = sld [smem:[%s6660_s0 + %s5785_s7]]   ;;  %s5789_s7 = smov 30  }
  0x2c   :  { %s5942_s12 = sld [smem:[%s6660_s0 + %s5786_s15]]   ;;  %s5790_s15 = smov 31  }
  0x2d   :  { %6689 = sst [smem:[#allocation21_spill]] %s5927_s27 }
  0x2e   :  { %s5947_s27 = sld [smem:[%s6660_s0 + %s5787_s22]]   ;;  %s5791_s22 = smov 32  }
  0x30   :  { %6690 = sst [smem:[#allocation22_spill]] %s5932_s4 }
  0x31   :  { %6691 = sst [smem:[#allocation23_spill]] %s5937_s13 }
  0x32   :  { %6692 = sst [smem:[#allocation24_spill]] %s5942_s12 }
  0x33   :  { %s5952_s4 = sld [smem:[%s6660_s0 + %s5788_s28]]  }
  0x34   :  { %6693 = sst [smem:[#allocation25_spill]] %s5947_s27 }
  0x35   :  { %s5957_s13 = sld [smem:[%s6660_s0 + %s5789_s7]]  }
  0x36   :  { %s5962_s12 = sld [smem:[%s6660_s0 + %s5790_s15]]  }
  0x37   :  { %s4330_s27 = sld [smem:[%s6660_s0 + %s5791_s22]]  }
  0x39   :  { %6694 = sst [smem:[#allocation26_spill]] %s5952_s4 }
  0x3a   :  { %s5970_s4 = sld [smem:[%s6660_s0 + %s5792_s1]]  }
  0x3b   :  { %6695 = sst [smem:[#allocation27_spill]] %s5957_s13 }
  0x3c   :  { %6696 = sst [smem:[#allocation28_spill]] %s5962_s12 }
  0x3d   :  { %v72_v0 = vstv %s4330_s27 }
  0x3e   :  { %73 = vst [vmem:[#allocation2] sm:$0x1] %v72_v0 }
  0x3f   :  { %74 = vsyncpa [#allocation4], 0 }
  0x40   :  { %76 = vsyncpa [#allocation4 + $0x1], 0  ;;  %s5972_s7 = smov 0   ;;  %s5974_s10 = smov 0  }
  0x41   :  { %s5976_s11 = smov 0   ;;  %s5978_s15 = smov 0  }
  0x42 LB: > { %s6697_s9 = sld [smem:[#allocation16_spill]]  ;;  %s6698_s6 = sld [smem:[#allocation11_spill]]  ;;  %s5754_s11 = sphi %s5976_s11, %s6729_s11   ;;  %s5750_s10 = sphi %s5974_s10, %s6728_s10   ;;  %s5746_s7 = sphi %s5972_s7, %s6727_s7   ;;  %s5758_s15 = sphi %s5978_s15, %s6730_s15  }
  0x43   : > { %s6699_s3 = sld [smem:[#allocation9_spill]]  ;;  %s5993_s0 = sadd.s32 4294967295, %s5758_s15  }
  0x44   : > { %s4333_s27 = sadd.s32 4294967294, %s5758_s15   ;;  %s5997_s16 = sadd.s32 1, %s5758_s15  }
  0x45   : > { %s792_s18 = sadd.s32 1, %s5754_s11  ;;  %s789_s22 = ssub.s32 %s5758_s15, %s5997_s16 }
  0x46   : > { %p802_p0 = scmp.ne.s32.totalorder %s5754_s11, %s5750_s10  ;;  %p790_p1 = scmp.eq.s32.totalorder %s789_s22, 0 }
  0x47   : > { %p803_p2 = scmp.eq.s32.totalorder %s5993_s0, 2  ;;  %p808_p3 = scmp.ne.s32.totalorder %s5750_s10, %s5746_s7 }
  0x48   : > { %p809_p4 = scmp.eq.s32.totalorder %s4333_s27, 2  ;;  %p4336_p7 = scmp.ge.s32.totalorder %s5758_s15, 1 }
  0x49   : > { %s6008_s23 = scalar_select %p790_p1, %s5754_s11, %s792_s18  }
  0x4a   : > { %p6010_p5 = por %p803_p2, %p802_p0  ;;  %p6014_p6 = por %p809_p4, %p808_p3 }
  0x4b   : > { %p938_p8 = scmp.lt.s32.totalorder %s5758_s15, 4 }
  0x4d   : > { %p939_p9 = pnand %p4336_p7, %p938_p8 }
  0x4e   : > { %s6702_s5 = sld [smem:[#allocation6_spill]] (!%p939_p9)  ;;  %v1072_v1 = vld [vmem:[%s5822_s17] sm:$0xf] (!%p939_p9)  ;;  %vm1113_vm0 = vcmask (!%p939_p9), 1043456   ;;  %s4338_s28 = sshll.u32 (!%p939_p9), %s5993_s0, 4  ;;  %vm1088_vm1 = vcmask (!%p939_p9), 64512  }
  0x4f   : > { %942 = sbr.rel (%p939_p9) target bundleno = 3176 (0xc68), region = 152  ;;  %5211 = vmatprep.subr.msk.bf16.mxu0 (!%p939_p9), %vm1113_vm0, %v1072_v1  ;;  %v1115_v2 = vsel (!%p939_p9), %vm1113_vm0, %v1072_v1, 0  ;;  %p1028_p10 = scmp.lt.s32.totalorder (!%p939_p9), %s4338_s28, 47  ;;  %v5290_v27 = vld [vmem:[%s5832_s25] sm:$0xff] (!%p939_p9)   ;;  %v5291_v28 = vld [vmem:[%s5832_s25 + $0x8] sm:$0xff] (!%p939_p9)   ;;  %vm1261_vm2 = vcmask (!%p939_p9), 261120  }
  0x50   : > { %4840 = vmatpush3.bf16.msra.mxu0 (!%p939_p9), %v1115_v2  ;;  %4857 = vmatprep.subr.bf16.mxu1 (!%p939_p9), %v5290_v27  ;;  %v6039_v29 = vld [vmem:[%s5827_s21] ss:$0 sm:$0xff] (!%p939_p9)  ;;  %s5793_s18 = smov (!%p939_p9), 96   ;;  %vm1446_vm3 = vcmask (!%p939_p9), 523264   ;;  %s6703_s8 = sld [smem:[#allocation10_spill]] (!%p939_p9)  ;;  %vm3955_vm4 = vcmask (!%p939_p9), 31744   ;;  %vm6577_vm7 = vmpackc.low (!%p939_p9), %vm1261_vm2, %vm1261_vm2 }
  0x51   : > { %4858 = vmatpush3.bf16.msra.mxu1 (!%p939_p9), %v5290_v27  ;;  %v5298_v27 = vld [vmem:[%s5852_s14 + $0x4] ss:$8 sps:$4 sm:$0xff] (!%p939_p9)   ;;  %s6704_s22 = sld [smem:[#allocation12_spill]] (!%p939_p9)  ;;  %vm6494_vm5 = vmpackc.low (!%p939_p9), %vm3955_vm4, %vm3955_vm4  ;;  %s6723_s13 = sld [smem:[#allocation27_spill]] (!%p939_p9)  ;;  %vm5796_vm6 = vmmov (!%p939_p9), 0   ;;  %vm4212_vm8 = vcmask (!%p939_p9), 1040384  }
  0x52   : > { %4859 = vmatprep.subr.bf16.mxu1 (!%p939_p9), %v5291_v28  ;;  %s6726_s12 = sld [smem:[#allocation28_spill]] (!%p939_p9) }
  0x55   : > { %4860 = vmatpush3.bf16.msra.mxu1 (!%p939_p9), %v5291_v28  ;;  %v5301_v28 = vld [vmem:[%s5852_s14 + $0x14] ss:$8 sps:$4 sm:$0xff] (!%p939_p9)  }
  0x56   : > { %s6732_s28 = smov (!%p1028_p10, %s4338_s28), 47  ;;  %1700 = vmatprep.subr.bf16.mxu1 %v5298_v27 }
  0x57   : > { %s6667_s2 = sshll.u32 %s6732_s28, 3 }
  0x58   : > { %s1031_s27 = scalar_lea.vmem %s6702_s5, %s6667_s2  ;;  %s6710_s2 = sld [smem:[#allocation22_spill]] }
  0x59   : > { %v1040_v3 = vld [vmem:[%s1031_s27] sm:$0xff]  ;;  %v1041_v4 = vld [vmem:[%s1031_s27 + $0x8] sm:$0xff]  ;;  %v1042_v5 = vld [vmem:[%s1031_s27 + $0x10] sm:$0xff]  ;;  %s6712_s5 = sld [smem:[#allocation7_spill]] }
  0x5a   : > { %v1073_v6 = vpack.c.bf16 %v1041_v4, %v1040_v3  ;;  %v1043_v7 = vld [vmem:[%s1031_s27 + $0x18] sm:$0xff]  ;;  %v1044_v8 = vld [vmem:[%s1031_s27 + $0x20] sm:$0xff]  ;;  %v1045_v9 = vld [vmem:[%s1031_s27 + $0x28] sm:$0xff] }
  0x5b   : > { %v1074_v10 = vpack.c.bf16 %v1043_v7, %v1042_v5  ;;  %v1075_v11 = vpack.c.bf16 %v1045_v9, %v1044_v8  ;;  %v1046_v12 = vld [vmem:[%s1031_s27 + $0x30] sm:$0xff]  ;;  %v1047_v13 = vld [vmem:[%s1031_s27 + $0x38] sm:$0xff]  ;;  %v1048_v14 = vld [vmem:[%s1031_s27 + $0x40] sm:$0xff] }
  0x5c   : > { %4841 = vmatprep.mubr.msk.bf16.mxu0 %vm1088_vm1, %v1073_v6  ;;  %v1049_v15 = vld [vmem:[%s1031_s27 + $0x48] sm:$0xff]  ;;  %v1076_v16 = vpack.c.bf16 %v1047_v13, %v1046_v12  ;;  %v1050_v18 = vld [vmem:[%s1031_s27 + $0x50] sm:$0xff]  ;;  %v1051_v19 = vld [vmem:[%s1031_s27 + $0x58] sm:$0xff] }
  0x5d   : > { %4842 = vmatmul.mubr.msk.bf16.vlgmr.msra.gmra.mrb[0].mxu0 %vm1088_vm1, %v1074_v10  ;;  %v1077_v17 = vpack.c.bf16 %v1049_v15, %v1048_v14  ;;  %v1052_v20 = vld [vmem:[%s1031_s27 + $0x60] sm:$0xff]  ;;  %v1053_v21 = vld [vmem:[%s1031_s27 + $0x68] sm:$0xff]  ;;  %v1078_v22 = vpack.c.bf16 %v1051_v19, %v1050_v18  ;;  %v1054_v24 = vld [vmem:[%s1031_s27 + $0x70] sm:$0xff] }
  0x5e   : > { %4845 = vmatprep.mubr.msk.bf16.mxu0 %vm1088_vm1, %v1075_v11  ;;  %v1079_v23 = vpack.c.bf16 %v1053_v21, %v1052_v20  ;;  %v1055_v25 = vld [vmem:[%s1031_s27 + $0x78] sm:$0xff]  ;;  %v5292_v11 = vld [vmem:[%s6699_s3] sm:$0xff]   ;;  %v5293_v12 = vld [vmem:[%s6699_s3 + $0x8] sm:$0xff]   ;;  %s6705_s27 = sld [smem:[#allocation14_spill]] }
  0x5f   : > { %v1080_v26 = vpack.c.bf16 %v1055_v25, %v1054_v24  ;;  %4877 = vmatprep.subr.bf16.mxu0 %v5292_v11  ;;  %v5294_v24 = vld [vmem:[%s6699_s3 + $0x10] sm:$0xff]   ;;  %v5295_v25 = vld [vmem:[%s6699_s3 + $0x18] sm:$0xff]   ;;  %s6711_s3 = sld [smem:[#allocation15_spill]] }
  0x60   : > { %4878 = vmatpush3.bf16.msra.mxu0 %v5292_v11 }
  0x61   : > { %4879 = vmatprep.subr.bf16.mxu0 %v5293_v12 }
  0x64   : > { %4880 = vmatpush3.bf16.msra.mxu0 %v5293_v12 }
  0x65   : > { %4846 = vmatmul.mubr.msk.bf16.gmra.mrb[4].mxu0 %vm1088_vm1, %v1076_v16  ;;  %4881 = vmatprep.subr.bf16.mxu0 %v5294_v24 }
  0x66   : > { %4849 = vmatprep.mubr.msk.bf16.mxu0 %vm1088_vm1, %v1077_v17 }
  0x68   : > { %4882 = vmatpush3.bf16.msra.mxu0 %v5294_v24 }
  0x69   : > { %4883 = vmatprep.subr.bf16.mxu0 %v5295_v25 }
  0x6c   : > { %4884 = vmatpush3.bf16.msra.mxu0 %v5295_v25 }
  0x6d   : > { %4850 = vmatmul.mubr.msk.bf16.gmra.mrb[8].mxu0 %vm1088_vm1, %v1078_v22 }
  0x6e   : > { %4853 = vmatprep.mubr.msk.bf16.mxu0 %vm1088_vm1, %v1079_v23 }
  0x75   : > { %4854 = vmatmul.mubr.msk.bf16.gmra.mrb[12].mxu0 %vm1088_vm1, %v1080_v26  ;;  %v5296_v26 = vld [vmem:[%s5852_s14] ss:$8 sps:$4 sm:$0xff]  }
 0x130   : > { %v4843_v30 = vpop.f32.mrb[0].mxu0 }
 0x131   : > { %v1160_v31 = vadd.f32 %v4843_v30, %v6039_v29  ;;  %v1151_v32 = vpop.f32.mrb[1].mxu0  ;;  %v5304_v30 = vld [vmem:[%s5852_s14 + $0x24] ss:$8 sps:$4 sm:$0xff]  }
 0x132   : > { %v1152_v33 = vadd.f32 %v6039_v29, %v1151_v32  ;;  %v4844_v34 = vpop.f32.mrb[2].mxu0  ;;  %v5307_v32 = vld [vmem:[%s5852_s14 + $0x34] ss:$8 sps:$4 sm:$0xff]  }
 0x133   : > { %5408 = vtanh.f32 %v1160_v31  ;;  %v1163_v35 = vadd.f32 %v4844_v34, %v6039_v29  ;;  %v1154_v36 = vpop.f32.mrb[3].mxu0  ;;  %v5302_v31 = vld [vmem:[%s5852_s14 + $0x20] ss:$8 sps:$4 sm:$0xff]   ;;  %v5310_v34 = vld [vmem:[%s5852_s14 + $0x44] ss:$8 sps:$4 sm:$0xff]  }
 0x134   : > { %5410 = vtanh.f32 %v1152_v33  ;;  %v1155_v37 = vadd.f32 %v6039_v29, %v1154_v36  ;;  %v5305_v33 = vld [vmem:[%s5852_s14 + $0x30] ss:$8 sps:$4 sm:$0xff]   ;;  %v5313_v36 = vld [vmem:[%s5852_s14 + $0x54] ss:$8 sps:$4 sm:$0xff]  }
 0x135   : > { %5412 = vtanh.f32 %v1163_v35  ;;  %v5308_v35 = vld [vmem:[%s5852_s14 + $0x40] ss:$8 sps:$4 sm:$0xff]  }
 0x136   : > { %5414 = vtanh.f32 %v1155_v37  ;;  %v5311_v37 = vld [vmem:[%s5852_s14 + $0x50] ss:$8 sps:$4 sm:$0xff]  }
 0x138   : > { %v4847_v38 = vpop.f32.mrb[4].mxu0 }
 0x139   : > { %v1176_v39 = vadd.f32 %v4847_v38, %v6039_v29  ;;  %v1167_v40 = vpop.f32.mrb[5].mxu0  ;;  %v6090_v38 = vld [vmem:[%s5837_s29] ss:$0 sm:$0xff] }
 0x13a   : > { %v1168_v41 = vadd.f32 %v6039_v29, %v1167_v40  ;;  %v4848_v42 = vpop.f32.mrb[6].mxu0 }
 0x13b   : > { %5416 = vtanh.f32 %v1176_v39  ;;  %v1179_v43 = vadd.f32 %v4848_v42, %v6039_v29  ;;  %v1170_v44 = vpop.f32.mrb[7].mxu0 }
 0x13c   : > { %5418 = vtanh.f32 %v1168_v41  ;;  %v1171_v45 = vadd.f32 %v6039_v29, %v1170_v44 }
 0x13d   : > { %v5409_v46 = vpop.eup %5408  ;;  %5420 = vtanh.f32 %v1179_v43 }
 0x13e   : > { %v5411_v47 = vpop.eup %5410  ;;  %5422 = vtanh.f32 %v1171_v45 }
 0x13f   : > { %v5413_v48 = vpop.eup %5412 }
 0x140   : > { %v5415_v49 = vpop.eup %5414  ;;  %v1235_v50 = vpack.c.bf16 %v5413_v48, %v5409_v46  ;;  %v4851_v51 = vpop.f32.mrb[8].mxu0 }
 0x141   : > { %v1234_v52 = vpack.c.bf16 %v5415_v49, %v5411_v47  ;;  %v1192_v53 = vadd.f32 %v4851_v51, %v6039_v29  ;;  %v1183_v54 = vpop.f32.mrb[9].mxu0 }
 0x142   : > { %v1184_v55 = vadd.f32 %v6039_v29, %v1183_v54  ;;  %v4852_v56 = vpop.f32.mrb[10].mxu0 }
 0x143   : > { %2672 = vrot.lane.b32.xlu0 %v1234_v52, %s5793_s18  ;;  %4861 = vmatprep.mubr.msk.bf16.mxu1 %vm1261_vm2, %v1234_v52  ;;  %5424 = vtanh.f32 %v1192_v53  ;;  %v1195_v57 = vadd.f32 %v4852_v56, %v6039_v29  ;;  %v1186_v58 = vpop.f32.mrb[11].mxu0 }
 0x144   : > { %4862 = vmatmul.mubr.msk.bf16.vlgmr.msra.gmra.mrb[0].mxu1 %vm1261_vm2, %v1235_v50  ;;  %5426 = vtanh.f32 %v1184_v55  ;;  %v1187_v59 = vadd.f32 %v6039_v29, %v1186_v58 }
 0x145   : > { %v5417_v60 = vpop.eup %5416  ;;  %5428 = vtanh.f32 %v1195_v57  ;;  %1701 = vmatpush1.bf16.msra.mxu1 %v5296_v26 }
 0x146   : > { %v5419_v61 = vpop.eup %5418  ;;  %5430 = vtanh.f32 %v1187_v59  ;;  %1702 = vmatprep.subr.bf16.mxu1 %v5301_v28 }
 0x147   : > { %v5421_v62 = vpop.eup %5420  ;;  %2674 = vrot.lane.b32.xlu0 %v1235_v50, %s5793_s18 }
 0x148   : > { %v5423_v63 = vpop.eup %5422  ;;  %v1237_v0 = vpack.c.bf16 %v5421_v62, %v5417_v60  ;;  %v4855_v1 = vpop.f32.mrb[12].mxu0 }
 0x149   : > { %v1236_v2 = vpack.c.bf16 %v5423_v63, %v5419_v61  ;;  %v1208_v3 = vadd.f32 %v4855_v1, %v6039_v29  ;;  %v1199_v4 = vpop.f32.mrb[13].mxu0 }
 0x14a   : > { %v1200_v5 = vadd.f32 %v6039_v29, %v1199_v4  ;;  %v4856_v6 = vpop.f32.mrb[14].mxu0 }
 0x14b   : > { %4865 = vmatprep.mubr.msk.bf16.mxu1 %vm1261_vm2, %v1236_v2  ;;  %2676 = vrot.lane.b32.xlu1 %v1236_v2, %s5793_s18  ;;  %5432 = vtanh.f32 %v1208_v3  ;;  %v1211_v7 = vadd.f32 %v4856_v6, %v6039_v29  ;;  %v1202_v8 = vpop.f32.mrb[15].mxu0 }
 0x14c   : > { %4866 = vmatmul.mubr.msk.bf16.gmra.mrb[4].mxu1 %vm1261_vm2, %v1237_v0  ;;  %5434 = vtanh.f32 %v1200_v5  ;;  %v1203_v9 = vadd.f32 %v6039_v29, %v1202_v8  ;;  %v5299_v29 = vld [vmem:[%s5852_s14 + $0x10] ss:$8 sps:$4 sm:$0xff]  }
 0x14d   : > { %v5425_v10 = vpop.eup %5424  ;;  %5436 = vtanh.f32 %v1211_v7  ;;  %1703 = vmatpush1.bf16.msra.mxu1 %v5299_v29 }
 0x14e   : > { %v5427_v13 = vpop.eup %5426  ;;  %5438 = vtanh.f32 %v1203_v9  ;;  %1704 = vmatprep.subr.bf16.mxu1 %v5304_v30 }
 0x14f   : > { %v5429_v14 = vpop.eup %5428  ;;  %2678 = vrot.lane.b32.xlu1 %v1237_v0, %s5793_s18 }
 0x150   : > { %v5431_v15 = vpop.eup %5430  ;;  %v1239_v16 = vpack.c.bf16 %v5429_v14, %v5425_v10 }
 0x151   : > { %v1238_v17 = vpack.c.bf16 %v5431_v15, %v5427_v13  ;;  %1705 = vmatpush1.bf16.msra.mxu1 %v5302_v31  ;;  %v5316_v31 = vld [vmem:[%s5852_s14 + $0x64] ss:$8 sps:$4 sm:$0xff]  }
 0x152   : > { %1706 = vmatprep.subr.bf16.mxu1 %v5307_v32  ;;  %v5314_v32 = vld [vmem:[%s5852_s14 + $0x60] ss:$8 sps:$4 sm:$0xff]  }
 0x153   : > { %4869 = vmatprep.mubr.msk.bf16.mxu1 %vm1261_vm2, %v1238_v17  ;;  %2682 = vrot.lane.b32.xlu1 %v1239_v16, %s5793_s18 }
 0x154   : > { %4870 = vmatmul.mubr.msk.bf16.gmra.mrb[8].mxu1 %vm1261_vm2, %v1239_v16  ;;  %2680 = vrot.lane.b32.xlu0 %v1238_v17, %s5793_s18 }
 0x155   : > { %v5433_v18 = vpop.eup %5432  ;;  %1707 = vmatpush1.bf16.msra.mxu1 %v5305_v33  ;;  %v5319_v33 = vld [vmem:[%s5852_s14 + $0x74] ss:$8 sps:$4 sm:$0xff]  }
 0x156   : > { %v5435_v19 = vpop.eup %5434  ;;  %1708 = vmatprep.subr.bf16.mxu1 %v5310_v34  ;;  %v5317_v34 = vld [vmem:[%s5852_s14 + $0x70] ss:$8 sps:$4 sm:$0xff]  }
 0x157   : > { %v5437_v20 = vpop.eup %5436 }
 0x158   : > { %v5439_v21 = vpop.eup %5438  ;;  %v1241_v22 = vpack.c.bf16 %v5437_v20, %v5433_v18 }
 0x159   : > { %v1240_v23 = vpack.c.bf16 %v5439_v21, %v5435_v19  ;;  %1709 = vmatpush1.bf16.msra.mxu1 %v5308_v35  ;;  %v5794_v35 = vmov 0  }
 0x15a   : > { %2686 = vrot.lane.b32.xlu1 %v1241_v22, %s5793_s18  ;;  %1710 = vmatprep.subr.bf16.mxu1 %v5313_v36  ;;  %v5320_v36 = vld [vmem:[%s5862_s24 + $0x40] sm:$0xff]  }
 0x15b   : > { %4873 = vmatprep.mubr.msk.bf16.mxu1 %vm1261_vm2, %v1240_v23  ;;  %2684 = vrot.lane.b32.xlu0 %v1240_v23, %s5793_s18  ;;  %s6706_s18 = sld [smem:[#allocation18_spill]] }
 0x15c   : > { %4874 = vmatmul.mubr.msk.bf16.gmra.mrb[12].mxu1 %vm1261_vm2, %v1241_v22  ;;  %5289 = vset.pattern.permute.xlu0 %v5794_v35 }
 0x15d   : > { %1711 = vmatpush1.bf16.msra.mxu1 %v5311_v37  ;;  %1732 = vmatprep.mubr.bf16.mxu1 %v5794_v35  ;;  %v5321_v37 = vld [vmem:[%s5862_s24] sm:$0xff]  }
 0x15e   : > { %1712 = vmatprep.subr.bf16.mxu1 %v5316_v31  ;;  %4589 = vmatprep.subr.bf16.mxu0 %v5320_v36 }
 0x161   : > { %1713 = vmatpush1.bf16.msra.mxu1 %v5314_v32 }
 0x162   : > { %1714 = vmatprep.subr.bf16.mxu1 %v5319_v33 }
 0x165   : > { %1715 = vmatpush1.bf16.msra.mxu1 %v5317_v34 }
 0x217   : > { %v4863_v39 = vpop.f32.mrb[0].mxu1 }
 0x218   : > { %v1329_v40 = vadd.f32 %v4863_v39, %v6090_v38  ;;  %v1320_v41 = vpop.f32.mrb[1].mxu1  ;;  %v5323_v39 = vld [vmem:[%s5862_s24 + $0x8] sm:$0xff]  }
 0x219   : > { %v1321_v42 = vadd.f32 %v6090_v38, %v1320_v41  ;;  %v4864_v43 = vpop.f32.mrb[2].mxu1  ;;  %v5325_v41 = vld [vmem:[%s5862_s24 + $0x10] sm:$0xff]  }
 0x21a   : > { %5440 = vtanh.f32 %v1329_v40  ;;  %v1332_v44 = vadd.f32 %v4864_v43, %v6090_v38  ;;  %v1323_v45 = vpop.f32.mrb[3].mxu1  ;;  %v5324_v40 = vld [vmem:[%s5862_s24 + $0x50] sm:$0xff]   ;;  %v4362_v43 = vld [vmem:[%s6703_s8] ss:$0 sm:$0xff] }
 0x21b   : > { %5442 = vtanh.f32 %v1321_v42  ;;  %v1324_v46 = vadd.f32 %v6090_v38, %v1323_v45  ;;  %v5326_v42 = vld [vmem:[%s5862_s24 + $0x58] sm:$0xff]  }
 0x21c   : > { %5444 = vtanh.f32 %v1332_v44 }
 0x21d   : > { %5446 = vtanh.f32 %v1324_v46 }
 0x21f   : > { %v4867_v47 = vpop.f32.mrb[4].mxu1 }
 0x220   : > { %v1345_v48 = vadd.f32 %v4867_v47, %v6090_v38  ;;  %v1336_v49 = vpop.f32.mrb[5].mxu1 }
 0x221   : > { %v1337_v50 = vadd.f32 %v6090_v38, %v1336_v49  ;;  %v4868_v51 = vpop.f32.mrb[6].mxu1 }
 0x222   : > { %5448 = vtanh.f32 %v1345_v48  ;;  %v1348_v52 = vadd.f32 %v4868_v51, %v6090_v38  ;;  %v1339_v53 = vpop.f32.mrb[7].mxu1 }
 0x223   : > { %5450 = vtanh.f32 %v1337_v50  ;;  %v1340_v54 = vadd.f32 %v6090_v38, %v1339_v53 }
 0x224   : > { %v5441_v55 = vpop.eup %5440  ;;  %5452 = vtanh.f32 %v1348_v52 }
 0x225   : > { %v5443_v56 = vpop.eup %5442  ;;  %5454 = vtanh.f32 %v1340_v54 }
 0x226   : > { %v5445_v57 = vpop.eup %5444 }
 0x227   : > { %v5447_v58 = vpop.eup %5446  ;;  %v1408_v59 = vpack.c.bf16 %v5445_v57, %v5441_v55  ;;  %v4871_v60 = vpop.f32.mrb[8].mxu1 }
 0x228   : > { %v1407_v61 = vpack.c.bf16 %v5447_v58, %v5443_v56  ;;  %v1361_v62 = vadd.f32 %v4871_v60, %v6090_v38  ;;  %v1352_v63 = vpop.f32.mrb[9].mxu1 }
 0x229   : > { %v1353_v0 = vadd.f32 %v6090_v38, %v1352_v63  ;;  %v4872_v1 = vpop.f32.mrb[10].mxu1 }
 0x22a   : > { %4885 = vmatprep.mubr.msk.bf16.mxu0 %vm1446_vm3, %v1407_v61  ;;  %5456 = vtanh.f32 %v1361_v62  ;;  %v1364_v2 = vadd.f32 %v4872_v1, %v6090_v38  ;;  %v1355_v3 = vpop.f32.mrb[11].mxu1 }
 0x22b   : > { %4886 = vmatmul.mubr.msk.bf16.vlgmr.msra.gmra.mrb[16].mxu0 %vm1446_vm3, %v1408_v59  ;;  %5458 = vtanh.f32 %v1353_v0  ;;  %v1356_v4 = vadd.f32 %v6090_v38, %v1355_v3 }
 0x22c   : > { %v5449_v5 = vpop.eup %5448  ;;  %5460 = vtanh.f32 %v1364_v2  ;;  %4590 = vmatpush3.bf16.msra.mxu0 %v5321_v37  ;;  %v5327_v37 = vld [vmem:[%s5862_s24 + $0x18] sm:$0xff]  }
 0x22d   : > { %v5451_v6 = vpop.eup %5450  ;;  %5462 = vtanh.f32 %v1356_v4 }
 0x22e   : > { %v5453_v7 = vpop.eup %5452 }
 0x22f   : > { %v5455_v8 = vpop.eup %5454  ;;  %v1410_v9 = vpack.c.bf16 %v5453_v7, %v5449_v5  ;;  %v4875_v10 = vpop.f32.mrb[12].mxu1 }
 0x230   : > { %v1409_v11 = vpack.c.bf16 %v5455_v8, %v5451_v6  ;;  %v1377_v12 = vadd.f32 %v4875_v10, %v6090_v38  ;;  %v1368_v13 = vpop.f32.mrb[13].mxu1 }
 0x231   : > { %v1369_v14 = vadd.f32 %v6090_v38, %v1368_v13  ;;  %v4876_v15 = vpop.f32.mrb[14].mxu1 }
 0x232   : > { %4889 = vmatprep.mubr.msk.bf16.mxu0 %vm1446_vm3, %v1409_v11  ;;  %5464 = vtanh.f32 %v1377_v12  ;;  %v1380_v16 = vadd.f32 %v4876_v15, %v6090_v38  ;;  %v1371_v17 = vpop.f32.mrb[15].mxu1 }
 0x233   : > { %4890 = vmatmul.mubr.msk.bf16.gmra.mrb[20].mxu0 %vm1446_vm3, %v1410_v9  ;;  %5466 = vtanh.f32 %v1369_v14  ;;  %v1372_v18 = vadd.f32 %v6090_v38, %v1371_v17  ;;  %v5322_v38 = vld [vmem:[%s5862_s24 + $0x48] sm:$0xff]  }
 0x234   : > { %v5457_v19 = vpop.eup %5456  ;;  %5468 = vtanh.f32 %v1380_v16  ;;  %4591 = vmatprep.subr.bf16.mxu0 %v5322_v38  ;;  %v5328_v38 = vld [vmem:[%s5862_s24 + $0x60] sm:$0xff]  }
 0x235   : > { %v5459_v20 = vpop.eup %5458  ;;  %5470 = vtanh.f32 %v1372_v18  ;;  %4592 = vmatpush3.bf16.msra.mxu0 %v5323_v39  ;;  %v5329_v39 = vld [vmem:[%s5862_s24 + $0x20] sm:$0xff]  }
 0x236   : > { %v5461_v21 = vpop.eup %5460  ;;  %4593 = vmatprep.subr.bf16.mxu0 %v5324_v40  ;;  %v5330_v40 = vld [vmem:[%s5862_s24 + $0x68] sm:$0xff]  }
 0x237   : > { %v5463_v22 = vpop.eup %5462  ;;  %v1412_v23 = vpack.c.bf16 %v5461_v21, %v5457_v19 }
 0x238   : > { %v1411_v24 = vpack.c.bf16 %v5463_v22, %v5459_v20 }
 0x239   : > { %4594 = vmatpush3.bf16.msra.mxu0 %v5325_v41  ;;  %v5331_v41 = vld [vmem:[%s5862_s24 + $0x28] sm:$0xff]  }
 0x23a   : > { %4893 = vmatprep.mubr.msk.bf16.mxu0 %vm1446_vm3, %v1411_v24  ;;  %4595 = vmatprep.subr.bf16.mxu0 %v5326_v42  ;;  %v5332_v42 = vld [vmem:[%s5862_s24 + $0x70] sm:$0xff]  }
 0x23b   : > { %4894 = vmatmul.mubr.msk.bf16.gmra.mrb[24].mxu0 %vm1446_vm3, %v1412_v23 }
 0x23c   : > { %v5465_v25 = vpop.eup %5464 }
 0x23d   : > { %v5467_v26 = vpop.eup %5466  ;;  %4596 = vmatpush3.bf16.msra.mxu0 %v5327_v37 }
 0x23e   : > { %v5469_v27 = vpop.eup %5468  ;;  %4597 = vmatprep.subr.bf16.mxu0 %v5328_v38 }
 0x23f   : > { %v5471_v28 = vpop.eup %5470  ;;  %v1414_v29 = vpack.c.bf16 %v5469_v27, %v5465_v25 }
 0x240   : > { %v1413_v30 = vpack.c.bf16 %v5471_v28, %v5467_v26 }
 0x241   : > { %4598 = vmatpush3.bf16.msra.mxu0 %v5329_v39 }
 0x242   : > { %4897 = vmatprep.mubr.msk.bf16.mxu0 %vm1446_vm3, %v1413_v30  ;;  %4599 = vmatprep.subr.bf16.mxu0 %v5330_v40 }
 0x243   : > { %4898 = vmatmul.mubr.msk.bf16.gmra.mrb[28].mxu0 %vm1446_vm3, %v1414_v29 }
 0x245   : > { %4600 = vmatpush3.bf16.msra.mxu0 %v5331_v41 }
 0x246   : > { %4601 = vmatprep.subr.bf16.mxu0 %v5332_v42 }
 0x2fe   : > { %v4887_v44 = vpop.f32.mrb[16].mxu0 }
 0x2ff   : > { %v1514_v45 = vadd.f32 %v4887_v44, %v4362_v43  ;;  %v1505_v46 = vpop.f32.mrb[17].mxu0  ;;  %v5334_v44 = vld [vmem:[%s5862_s24 + $0x78] sm:$0xff]  }
 0x300   : > { %v1506_v47 = vadd.f32 %v4362_v43, %v1505_v46  ;;  %v4888_v48 = vpop.f32.mrb[18].mxu0  ;;  %v5336_v46 = vld [vmem:[%s6698_s6] sm:$0xff]  }
 0x301   : > { %v1517_v49 = vadd.f32 %v4888_v48, %v4362_v43  ;;  %v1508_v50 = vpop.f32.mrb[19].mxu0  ;;  %v1570_v52 = vmax.f32 %v1514_v45, 0.0  ;;  %v5335_v45 = vld [vmem:[%s5862_s24 + $0x38] sm:$0xff]   ;;  %4901 = vmatprep.subr.bf16.mxu1 %v5336_v46  ;;  %v5338_v48 = vld [vmem:[%s6698_s6 + $0x10] sm:$0xff]  }
 0x302   : > { %v1509_v51 = vadd.f32 %v4362_v43, %v1508_v50  ;;  %v1568_v54 = vmax.f32 %v1506_v47, 0.0  ;;  %v5337_v47 = vld [vmem:[%s6698_s6 + $0x8] sm:$0xff]  }
 0x303   : > { %v1571_v53 = vmax.f32 %v1517_v49, 0.0  ;;  %v1610_v49 = vlaneseq }
 0x304   : > { %v1569_v55 = vmax.f32 %v1509_v51, 0.0 }
 0x305   : > { %v1601_v56 = vpack.c.bf16 %v1571_v53, %v1570_v52  ;;  %v6149_v50 = vshrl.u32 %v1610_v49, 7  ;;  %v1608_v52 = vld [vmem:[%s5857_s19] sm:$0x3] }
 0x306   : > { %v1600_v57 = vpack.c.bf16 %v1569_v55, %v1568_v54  ;;  %v4891_v58 = vpop.f32.mrb[20].mxu0 }
 0x307   : > { %v1530_v59 = vadd.f32 %v4891_v58, %v4362_v43  ;;  %v1521_v60 = vpop.f32.mrb[21].mxu0  ;;  %v6152_v51 = vsub.s32 0, %v6149_v50  ;;  %v1616_v53 = vsub.s32 1, %v6149_v50 }
 0x308   : > { %v1522_v61 = vadd.f32 %v4362_v43, %v1521_v60  ;;  %v4892_v62 = vpop.f32.mrb[22].mxu0  ;;  %1733 = vmatmul.mubr.bf16.vlgmr.msra.gmra.mrb[16].mxu1 %v1600_v57 }
 0x309   : > { %v1533_v63 = vadd.f32 %v4892_v62, %v4362_v43  ;;  %v1524_v0 = vpop.f32.mrb[23].mxu0  ;;  %1742 = vmatprep.mubr.bf16.mxu1 %v5794_v35  ;;  %v1574_v2 = vmax.f32 %v1530_v59, 0.0  ;;  %4902 = vmatpush3.bf16.msra.mxu1 %v5336_v46  ;;  %v6157_v54 = vrot.slane %v1608_v52, %v6152_v51  ;;  %v6161_v55 = vrot.slane %v1608_v52, %v1616_v53 }
 0x30a   : > { %v1525_v1 = vadd.f32 %v4362_v43, %v1524_v0  ;;  %v1572_v4 = vmax.f32 %v1522_v61, 0.0  ;;  %4903 = vmatprep.subr.bf16.mxu1 %v5337_v47 }
 0x30b   : > { %v1575_v3 = vmax.f32 %v1533_v63, 0.0 }
 0x30c   : > { %v1573_v5 = vmax.f32 %v1525_v1, 0.0 }
 0x30d   : > { %v1603_v6 = vpack.c.bf16 %v1575_v3, %v1574_v2  ;;  %4904 = vmatpush3.bf16.msra.mxu1 %v5337_v47 }
 0x30e   : > { %v1602_v7 = vpack.c.bf16 %v1573_v5, %v1572_v4  ;;  %v4895_v8 = vpop.f32.mrb[24].mxu0  ;;  %4905 = vmatprep.subr.bf16.mxu1 %v5338_v48 }
 0x30f   : > { %v1546_v9 = vadd.f32 %v4895_v8, %v4362_v43  ;;  %v1537_v10 = vpop.f32.mrb[25].mxu0 }
 0x310   : > { %1743 = vmatmul.mubr.bf16.gmra.mrb[20].mxu1 %v1601_v56  ;;  %v1538_v11 = vadd.f32 %v4362_v43, %v1537_v10  ;;  %v4896_v12 = vpop.f32.mrb[26].mxu0 }
 0x311   : > { %v1578_v13 = vmax.f32 %v1546_v9, 0.0  ;;  %v1549_v14 = vadd.f32 %v4896_v12, %v4362_v43  ;;  %v1540_v15 = vpop.f32.mrb[27].mxu0  ;;  %1752 = vmatprep.mubr.bf16.mxu1 %v5794_v35  ;;  %4906 = vmatpush3.bf16.msra.mxu1 %v5338_v48 }
 0x312   : > { %v1576_v16 = vmax.f32 %v1538_v11, 0.0  ;;  %v1541_v17 = vadd.f32 %v4362_v43, %v1540_v15 }
 0x313   : > { %v1579_v18 = vmax.f32 %v1549_v14, 0.0 }
 0x314   : > { %v1577_v19 = vmax.f32 %v1541_v17, 0.0 }
 0x315   : > { %v1605_v20 = vpack.c.bf16 %v1579_v18, %v1578_v13 }
 0x316   : > { %v1604_v21 = vpack.c.bf16 %v1577_v19, %v1576_v16  ;;  %v4899_v22 = vpop.f32.mrb[28].mxu0 }
 0x317   : > { %v1562_v23 = vadd.f32 %v4899_v22, %v4362_v43  ;;  %v1553_v24 = vpop.f32.mrb[29].mxu0 }
 0x318   : > { %1753 = vmatmul.mubr.bf16.gmra.mrb[24].mxu1 %v1602_v7  ;;  %v1554_v25 = vadd.f32 %v4362_v43, %v1553_v24  ;;  %v4900_v26 = vpop.f32.mrb[30].mxu0 }
 0x319   : > { %1762 = vmatprep.mubr.bf16.mxu1 %v5794_v35  ;;  %v1582_v27 = vmax.f32 %v1562_v23, 0.0  ;;  %v1565_v28 = vadd.f32 %v4900_v26, %v4362_v43  ;;  %v1556_v29 = vpop.f32.mrb[31].mxu0 }
 0x31a   : > { %v1580_v30 = vmax.f32 %v1554_v25, 0.0  ;;  %v1557_v31 = vadd.f32 %v4362_v43, %v1556_v29  ;;  %v5333_v43 = vld [vmem:[%s5862_s24 + $0x30] sm:$0xff]  }
 0x31b   : > { %v1583_v32 = vmax.f32 %v1565_v28, 0.0  ;;  %4602 = vmatpush3.bf16.msra.mxu0 %v5333_v43 }
 0x31c   : > { %v1581_v33 = vmax.f32 %v1557_v31, 0.0  ;;  %4603 = vmatprep.subr.bf16.mxu0 %v5334_v44 }
 0x31d   : > { %v1607_v34 = vpack.c.bf16 %v1583_v32, %v1582_v27 }
 0x31e   : > { %v1606_v36 = vpack.c.bf16 %v1581_v33, %v1580_v30 }
 0x31f   : > { %4604 = vmatpush3.bf16.msra.mxu0 %v5335_v45 }
 0x320   : > { %1763 = vmatmul.mubr.bf16.gmra.mrb[28].mxu1 %v1603_v6 }
 0x321   : > { %1772 = vmatprep.mubr.bf16.mxu1 %v5794_v35 }
 0x328   : > { %1773 = vmatmul.mubr.bf16.gmra.mrb[32].mxu1 %v1604_v21 }
 0x329   : > { %1782 = vmatprep.mubr.bf16.mxu1 %v5794_v35 }
 0x330   : > { %1783 = vmatmul.mubr.bf16.gmra.mrb[36].mxu1 %v1605_v20 }
 0x331   : > { %1792 = vmatprep.mubr.bf16.mxu1 %v5794_v35 }
 0x338   : > { %1793 = vmatmul.mubr.bf16.gmra.mrb[40].mxu1 %v1606_v36 }
 0x339   : > { %1802 = vmatprep.mubr.bf16.mxu1 %v5794_v35 }
 0x340   : > { %1803 = vmatmul.mubr.bf16.gmra.mrb[44].mxu1 %v1607_v34 }
 0x3db   : > { %v1734_v56 = vpop.f32.mrb[16].mxu1 }
 0x3dc   : > { %v1735_v57 = vadd.f32 %v1734_v56, %v6157_v54  ;;  %v1736_v58 = vpop.f32.mrb[17].mxu1 }
 0x3dd   : > { %v1737_v59 = vadd.f32 %v1736_v58, %v6161_v55  ;;  %v1738_v60 = vpop.f32.mrb[18].mxu1 }
 0x3de   : > { %5472 = vtanh.f32 %v1735_v57  ;;  %v1739_v61 = vadd.f32 %v1738_v60, %v6157_v54  ;;  %v1740_v62 = vpop.f32.mrb[19].mxu1 }
 0x3df   : > { %5474 = vtanh.f32 %v1737_v59  ;;  %v1741_v63 = vadd.f32 %v1740_v62, %v6161_v55 }
 0x3e0   : > { %5476 = vtanh.f32 %v1739_v61 }
 0x3e1   : > { %5478 = vtanh.f32 %v1741_v63 }
 0x3e3   : > { %v1744_v0 = vpop.f32.mrb[20].mxu1 }
 0x3e4   : > { %v1745_v1 = vadd.f32 %v1744_v0, %v6157_v54  ;;  %v1746_v2 = vpop.f32.mrb[21].mxu1 }
 0x3e5   : > { %v1747_v3 = vadd.f32 %v1746_v2, %v6161_v55  ;;  %v1748_v4 = vpop.f32.mrb[22].mxu1 }
 0x3e6   : > { %5480 = vtanh.f32 %v1745_v1  ;;  %v1749_v5 = vadd.f32 %v1748_v4, %v6157_v54  ;;  %v1750_v6 = vpop.f32.mrb[23].mxu1 }
 0x3e7   : > { %5482 = vtanh.f32 %v1747_v3  ;;  %v1751_v7 = vadd.f32 %v1750_v6, %v6161_v55 }
 0x3e8   : > { %v5473_v8 = vpop.eup %5472  ;;  %5484 = vtanh.f32 %v1749_v5 }
 0x3e9   : > { %v5475_v9 = vpop.eup %5474  ;;  %5486 = vtanh.f32 %v1751_v7 }
 0x3ea   : > { %v5477_v10 = vpop.eup %5476 }
 0x3eb   : > { %v5479_v11 = vpop.eup %5478  ;;  %v1754_v12 = vpop.f32.mrb[24].mxu1  ;;  %v1877_v13 = vpack.c.bf16 %v5477_v10, %v5473_v8 }
 0x3ec   : > { %v1755_v14 = vadd.f32 %v1754_v12, %v6157_v54  ;;  %v1756_v15 = vpop.f32.mrb[25].mxu1  ;;  %v1878_v16 = vpack.c.bf16 %v5479_v11, %v5475_v9 }
 0x3ed   : > { %v1757_v17 = vadd.f32 %v1756_v15, %v6161_v55  ;;  %v1758_v18 = vpop.f32.mrb[26].mxu1 }
 0x3ee   : > { %5488 = vtanh.f32 %v1755_v14  ;;  %v1759_v19 = vadd.f32 %v1758_v18, %v6157_v54  ;;  %v1760_v20 = vpop.f32.mrb[27].mxu1  ;;  %2028 = vmatprep.mubr.bf16.mxu0 %v1878_v16 }
 0x3ef   : > { %5490 = vtanh.f32 %v1757_v17  ;;  %v1761_v21 = vadd.f32 %v1760_v20, %v6161_v55  ;;  %2029 = vmatmul.mubr.bf16.vlgmr.msra.gmra.mrb[32].mxu0 %v1877_v13 }
 0x3f0   : > { %v5481_v22 = vpop.eup %5480  ;;  %5492 = vtanh.f32 %v1759_v19 }
 0x3f1   : > { %v5483_v23 = vpop.eup %5482  ;;  %5494 = vtanh.f32 %v1761_v21 }
 0x3f2   : > { %v5485_v24 = vpop.eup %5484 }
 0x3f3   : > { %v5487_v25 = vpop.eup %5486  ;;  %v1764_v26 = vpop.f32.mrb[28].mxu1  ;;  %v1879_v27 = vpack.c.bf16 %v5485_v24, %v5481_v22 }
 0x3f4   : > { %v1765_v28 = vadd.f32 %v1764_v26, %v6157_v54  ;;  %v1766_v29 = vpop.f32.mrb[29].mxu1  ;;  %v1880_v30 = vpack.c.bf16 %v5487_v25, %v5483_v23 }
 0x3f5   : > { %v1767_v31 = vadd.f32 %v1766_v29, %v6161_v55  ;;  %v1768_v32 = vpop.f32.mrb[30].mxu1 }
 0x3f6   : > { %5496 = vtanh.f32 %v1765_v28  ;;  %v1769_v33 = vadd.f32 %v1768_v32, %v6157_v54  ;;  %v1770_v34 = vpop.f32.mrb[31].mxu1  ;;  %2036 = vmatprep.mubr.bf16.mxu0 %v1880_v30 }
 0x3f7   : > { %5498 = vtanh.f32 %v1767_v31  ;;  %v1771_v36 = vadd.f32 %v1770_v34, %v6161_v55  ;;  %2037 = vmatmul.mubr.bf16.gmra.mrb[36].mxu0 %v1879_v27 }
 0x3f8   : > { %v5489_v37 = vpop.eup %5488  ;;  %5500 = vtanh.f32 %v1769_v33 }
 0x3f9   : > { %v5491_v38 = vpop.eup %5490  ;;  %5502 = vtanh.f32 %v1771_v36 }
 0x3fa   : > { %v5493_v39 = vpop.eup %5492 }
 0x3fb   : > { %v5495_v40 = vpop.eup %5494  ;;  %v1774_v41 = vpop.f32.mrb[32].mxu1  ;;  %v1881_v42 = vpack.c.bf16 %v5493_v39, %v5489_v37 }
 0x3fc   : > { %v1775_v43 = vadd.f32 %v1774_v41, %v6157_v54  ;;  %v1776_v44 = vpop.f32.mrb[33].mxu1  ;;  %v1882_v45 = vpack.c.bf16 %v5495_v40, %v5491_v38 }
 0x3fd   : > { %v1777_v46 = vadd.f32 %v1776_v44, %v6161_v55  ;;  %v1778_v47 = vpop.f32.mrb[34].mxu1 }
 0x3fe   : > { %5504 = vtanh.f32 %v1775_v43  ;;  %v1779_v48 = vadd.f32 %v1778_v47, %v6157_v54  ;;  %v1780_v49 = vpop.f32.mrb[35].mxu1  ;;  %2044 = vmatprep.mubr.bf16.mxu0 %v1882_v45  ;;  %v5339_v45 = vld [vmem:[%s6698_s6 + $0x18] sm:$0xff]   ;;  %v5341_v47 = vld [vmem:[%s6698_s6 + $0x28] sm:$0xff]  }
 0x3ff   : > { %5506 = vtanh.f32 %v1777_v46  ;;  %v1781_v52 = vadd.f32 %v1780_v49, %v6161_v55  ;;  %2045 = vmatmul.mubr.bf16.gmra.mrb[40].mxu0 %v1881_v42  ;;  %4907 = vmatprep.subr.bf16.mxu1 %v5339_v45  ;;  %v5340_v46 = vld [vmem:[%s6698_s6 + $0x20] sm:$0xff]   ;;  %v5343_v49 = vld [vmem:[%s6698_s6 + $0x38] sm:$0xff]  }
 0x400   : > { %v5497_v56 = vpop.eup %5496  ;;  %5508 = vtanh.f32 %v1779_v48  ;;  %4908 = vmatpush3.bf16.msra.mxu1 %v5339_v45  ;;  %v5342_v48 = vld [vmem:[%s6698_s6 + $0x30] sm:$0xff]  }
 0x401   : > { %v5499_v57 = vpop.eup %5498  ;;  %5510 = vtanh.f32 %v1781_v52  ;;  %4909 = vmatprep.subr.bf16.mxu1 %v5340_v46  ;;  %v5344_v52 = vld [vmem:[%s5882_s20] sm:$0xff]  }
 0x402   : > { %v5501_v58 = vpop.eup %5500  ;;  %4933 = vmatprep.subr.bf16.mxu0 %v5344_v52 }
 0x403   : > { %v5503_v59 = vpop.eup %5502  ;;  %v1784_v60 = vpop.f32.mrb[36].mxu1  ;;  %v1883_v61 = vpack.c.bf16 %v5501_v58, %v5497_v56  ;;  %v5345_v56 = vld [vmem:[%s5882_s20 + $0x8] sm:$0xff]   ;;  %4934 = vmatpush3.bf16.msra.mxu0 %v5344_v52  ;;  %v6203_v58 = vld [vmem:[%s5867_s30] ss:$0 sm:$0xff] }
 0x404   : > { %v1785_v62 = vadd.f32 %v1784_v60, %v6157_v54  ;;  %v1786_v63 = vpop.f32.mrb[37].mxu1  ;;  %v1884_v0 = vpack.c.bf16 %v5503_v59, %v5499_v57  ;;  %4910 = vmatpush3.bf16.msra.mxu1 %v5340_v46  ;;  %4935 = vmatprep.subr.bf16.mxu0 %v5345_v56 }
 0x405   : > { %v1787_v1 = vadd.f32 %v1786_v63, %v6161_v55  ;;  %v1788_v2 = vpop.f32.mrb[38].mxu1  ;;  %4911 = vmatprep.subr.bf16.mxu1 %v5341_v47 }
 0x406   : > { %5512 = vtanh.f32 %v1785_v62  ;;  %v1789_v3 = vadd.f32 %v1788_v2, %v6157_v54  ;;  %v1790_v4 = vpop.f32.mrb[39].mxu1  ;;  %2052 = vmatprep.mubr.bf16.mxu0 %v1884_v0 }
 0x407   : > { %5514 = vtanh.f32 %v1787_v1  ;;  %v1791_v5 = vadd.f32 %v1790_v4, %v6161_v55  ;;  %2053 = vmatmul.mubr.bf16.gmra.mrb[44].mxu0 %v1883_v61 }
 0x408   : > { %v5505_v6 = vpop.eup %5504  ;;  %5516 = vtanh.f32 %v1789_v3  ;;  %4912 = vmatpush3.bf16.msra.mxu1 %v5341_v47  ;;  %4936 = vmatpush3.bf16.msra.mxu0 %v5345_v56 }
 0x409   : > { %v5507_v7 = vpop.eup %5506  ;;  %5518 = vtanh.f32 %v1791_v5  ;;  %4913 = vmatprep.subr.bf16.mxu1 %v5342_v48 }
 0x40a   : > { %v5509_v8 = vpop.eup %5508 }
 0x40b   : > { %v5511_v9 = vpop.eup %5510  ;;  %v1794_v10 = vpop.f32.mrb[40].mxu1  ;;  %v1885_v11 = vpack.c.bf16 %v5509_v8, %v5505_v6 }
 0x40c   : > { %v1795_v12 = vadd.f32 %v1794_v10, %v6157_v54  ;;  %v1796_v13 = vpop.f32.mrb[41].mxu1  ;;  %v1886_v14 = vpack.c.bf16 %v5511_v9, %v5507_v7  ;;  %4914 = vmatpush3.bf16.msra.mxu1 %v5342_v48 }
 0x40d   : > { %v1797_v15 = vadd.f32 %v1796_v13, %v6161_v55  ;;  %v1798_v16 = vpop.f32.mrb[42].mxu1  ;;  %4915 = vmatprep.subr.bf16.mxu1 %v5343_v49 }
 0x40e   : > { %5520 = vtanh.f32 %v1795_v12  ;;  %v1799_v17 = vadd.f32 %v1798_v16, %v6157_v54  ;;  %v1800_v18 = vpop.f32.mrb[43].mxu1  ;;  %2060 = vmatprep.mubr.bf16.mxu0 %v1886_v14 }
 0x40f   : > { %5522 = vtanh.f32 %v1797_v15  ;;  %v1801_v19 = vadd.f32 %v1800_v18, %v6161_v55  ;;  %2061 = vmatmul.mubr.bf16.gmra.mrb[48].mxu0 %v1885_v11 }
 0x410   : > { %v5513_v20 = vpop.eup %5512  ;;  %5524 = vtanh.f32 %v1799_v17  ;;  %4916 = vmatpush3.bf16.msra.mxu1 %v5343_v49 }
 0x411   : > { %v5515_v21 = vpop.eup %5514  ;;  %5526 = vtanh.f32 %v1801_v19 }
 0x412   : > { %v5517_v22 = vpop.eup %5516 }
 0x413   : > { %v5519_v23 = vpop.eup %5518  ;;  %v1804_v24 = vpop.f32.mrb[44].mxu1  ;;  %v1887_v25 = vpack.c.bf16 %v5517_v22, %v5513_v20 }
 0x414   : > { %v1805_v26 = vadd.f32 %v1804_v24, %v6157_v54  ;;  %v1806_v27 = vpop.f32.mrb[45].mxu1  ;;  %v1888_v28 = vpack.c.bf16 %v5519_v23, %v5515_v21 }
 0x415   : > { %v1807_v29 = vadd.f32 %v1806_v27, %v6161_v55  ;;  %v1808_v30 = vpop.f32.mrb[46].mxu1 }
 0x416   : > { %5528 = vtanh.f32 %v1805_v26  ;;  %v1809_v31 = vadd.f32 %v1808_v30, %v6157_v54  ;;  %v1810_v32 = vpop.f32.mrb[47].mxu1  ;;  %2068 = vmatprep.mubr.bf16.mxu0 %v1888_v28 }
 0x417   : > { %5530 = vtanh.f32 %v1807_v29  ;;  %v1811_v33 = vadd.f32 %v1810_v32, %v6161_v55  ;;  %2069 = vmatmul.mubr.bf16.gmra.mrb[52].mxu0 %v1887_v25 }
 0x418   : > { %v5521_v34 = vpop.eup %5520  ;;  %5532 = vtanh.f32 %v1809_v31 }
 0x419   : > { %v5523_v36 = vpop.eup %5522  ;;  %5534 = vtanh.f32 %v1811_v33 }
 0x41a   : > { %v5525_v37 = vpop.eup %5524 }
 0x41b   : > { %v5527_v38 = vpop.eup %5526  ;;  %v1889_v39 = vpack.c.bf16 %v5525_v37, %v5521_v34 }
 0x41c   : > { %v1890_v40 = vpack.c.bf16 %v5527_v38, %v5523_v36 }
 0x41e   : > { %2076 = vmatprep.mubr.bf16.mxu0 %v1890_v40 }
 0x41f   : > { %2077 = vmatmul.mubr.bf16.gmra.mrb[56].mxu0 %v1889_v39 }
 0x420   : > { %v5529_v54 = vpop.eup %5528 }
 0x421   : > { %v5531_v41 = vpop.eup %5530 }
 0x422   : > { %v5533_v42 = vpop.eup %5532 }
 0x423   : > { %v5535_v43 = vpop.eup %5534  ;;  %v1891_v55 = vpack.c.bf16 %v5533_v42, %v5529_v54 }
 0x424   : > { %v1892_v44 = vpack.c.bf16 %v5535_v43, %v5531_v41 }
 0x426   : > { %2084 = vmatprep.mubr.bf16.mxu0 %v1892_v44 }
 0x427   : > { %2085 = vmatmul.mubr.bf16.gmra.mrb[60].mxu0 %v1891_v55 }
 0x4c2   : > { %v4605_v57 = vpop.f32.mrb[32].mxu0 }
 0x4c3   : > { %v4606_v59 = vpop.f32.mrb[33].mxu0 }
 0x4c4   : > { %v4607_v60 = vadd.f32 %v4606_v59, %v4605_v57  ;;  %v4608_v61 = vpop.f32.mrb[34].mxu0 }
 0x4c5   : > { %v4609_v62 = vpop.f32.mrb[35].mxu0 }
 0x4c6   : > { %v2031_v63 = vadd.f32 %v4607_v60, %v6203_v58  ;;  %v4610_v0 = vadd.f32 %v4609_v62, %v4608_v61 }
 0x4c8   : > { %v2034_v1 = vadd.f32 %v4610_v0, %v6203_v58  ;;  %v2093_v2 = vmax.f32 %v2031_v63, 0.0 }
 0x4ca   : > { %v2094_v3 = vmax.f32 %v2034_v1, 0.0  ;;  %v4611_v4 = vpop.f32.mrb[36].mxu0 }
 0x4cb   : > { %v4612_v5 = vpop.f32.mrb[37].mxu0 }
 0x4cc   : > { %v4613_v6 = vadd.f32 %v4612_v5, %v4611_v4  ;;  %v4614_v7 = vpop.f32.mrb[38].mxu0  ;;  %v2125_v8 = vpack.c.bf16 %v2094_v3, %v2093_v2 }
 0x4cd   : > { %v4615_v9 = vpop.f32.mrb[39].mxu0 }
 0x4ce   : > { %v2039_v10 = vadd.f32 %v4613_v6, %v6203_v58  ;;  %v4616_v11 = vadd.f32 %v4615_v9, %v4614_v7  ;;  %4917 = vmatprep.mubr.bf16.mxu1 %v2125_v8 }
 0x4d0   : > { %v2042_v12 = vadd.f32 %v4616_v11, %v6203_v58  ;;  %v2095_v13 = vmax.f32 %v2039_v10, 0.0 }
 0x4d2   : > { %v2096_v14 = vmax.f32 %v2042_v12, 0.0  ;;  %v4617_v15 = vpop.f32.mrb[40].mxu0 }
 0x4d3   : > { %v4618_v16 = vpop.f32.mrb[41].mxu0 }
 0x4d4   : > { %v2126_v17 = vpack.c.bf16 %v2096_v14, %v2095_v13  ;;  %v4619_v18 = vadd.f32 %v4618_v16, %v4617_v15  ;;  %v4620_v19 = vpop.f32.mrb[42].mxu0 }
 0x4d5   : > { %v4621_v20 = vpop.f32.mrb[43].mxu0 }
 0x4d6   : > { %v2047_v21 = vadd.f32 %v4619_v18, %v6203_v58  ;;  %v4622_v22 = vadd.f32 %v4621_v20, %v4620_v19  ;;  %4918 = vmatmul.mubr.bf16.vlgmr.msra.gmra.mrb[48].mxu1 %v2126_v17 }
 0x4d8   : > { %v2050_v23 = vadd.f32 %v4622_v22, %v6203_v58  ;;  %v2097_v24 = vmax.f32 %v2047_v21, 0.0 }
 0x4da   : > { %v2098_v25 = vmax.f32 %v2050_v23, 0.0  ;;  %v4623_v26 = vpop.f32.mrb[44].mxu0  ;;  %v5346_v23 = vld [vmem:[%s5882_s20 + $0x10] sm:$0xff]  }
 0x4db   : > { %v4624_v27 = vpop.f32.mrb[45].mxu0  ;;  %4937 = vmatprep.subr.bf16.mxu0 %v5346_v23 }
 0x4dc   : > { %v4625_v28 = vadd.f32 %v4624_v27, %v4623_v26  ;;  %v4626_v29 = vpop.f32.mrb[46].mxu0  ;;  %v2127_v30 = vpack.c.bf16 %v2098_v25, %v2097_v24  ;;  %4938 = vmatpush3.bf16.msra.mxu0 %v5346_v23  ;;  %v5347_v24 = vld [vmem:[%s5882_s20 + $0x18] sm:$0xff]   ;;  %v5348_v25 = vld [vmem:[%s6697_s9] sm:$0xff]  }
 0x4dd   : > { %v4627_v31 = vpop.f32.mrb[47].mxu0  ;;  %4939 = vmatprep.subr.bf16.mxu0 %v5347_v24  ;;  %v4408_v26 = vld [vmem:[%s6704_s22] ss:$0 sm:$0xff]  ;;  %s6707_s22 = sld [smem:[#allocation13_spill]] }
 0x4de   : > { %v2055_v32 = vadd.f32 %v4625_v28, %v6203_v58  ;;  %v4628_v33 = vadd.f32 %v4627_v31, %v4626_v29  ;;  %4921 = vmatprep.mubr.bf16.mxu1 %v2127_v30 }
 0x4e0   : > { %v2058_v34 = vadd.f32 %v4628_v33, %v6203_v58  ;;  %v2099_v36 = vmax.f32 %v2055_v32, 0.0  ;;  %4940 = vmatpush3.bf16.msra.mxu0 %v5347_v24  ;;  %v2673_v24 = vpop.permute.xlu0 %2672 }
 0x4e1   : > { %4977 = vmatprep.subr.bf16.mxu0 %v5348_v25 }
 0x4e2   : > { %v2100_v37 = vmax.f32 %v2058_v34, 0.0  ;;  %v4629_v38 = vpop.f32.mrb[48].mxu0 }
 0x4e3   : > { %v4630_v39 = vpop.f32.mrb[49].mxu0 }
 0x4e4   : > { %v4631_v40 = vadd.f32 %v4630_v39, %v4629_v38  ;;  %v4632_v54 = vpop.f32.mrb[50].mxu0  ;;  %v2128_v41 = vpack.c.bf16 %v2100_v37, %v2099_v36 }
 0x4e5   : > { %v4633_v42 = vpop.f32.mrb[51].mxu0 }
 0x4e6   : > { %v2063_v43 = vadd.f32 %v4631_v40, %v6203_v58  ;;  %v4634_v55 = vadd.f32 %v4633_v42, %v4632_v54  ;;  %4922 = vmatmul.mubr.bf16.gmra.mrb[52].mxu1 %v2128_v41  ;;  %v5349_v54 = vld [vmem:[%s6697_s9 + $0x8] sm:$0xff]  }
 0x4e8   : > { %v2066_v44 = vadd.f32 %v4634_v55, %v6203_v58  ;;  %v2101_v45 = vmax.f32 %v2063_v43, 0.0 }
 0x4ea   : > { %v2102_v46 = vmax.f32 %v2066_v44, 0.0  ;;  %v4635_v47 = vpop.f32.mrb[52].mxu0 }
 0x4eb   : > { %v4636_v48 = vpop.f32.mrb[53].mxu0 }
 0x4ec   : > { %v4637_v49 = vadd.f32 %v4636_v48, %v4635_v47  ;;  %v4638_v52 = vpop.f32.mrb[54].mxu0  ;;  %v2129_v56 = vpack.c.bf16 %v2102_v46, %v2101_v45 }
 0x4ed   : > { %v4639_v57 = vpop.f32.mrb[55].mxu0 }
 0x4ee   : > { %v2071_v59 = vadd.f32 %v4637_v49, %v6203_v58  ;;  %v4640_v60 = vadd.f32 %v4639_v57, %v4638_v52  ;;  %4925 = vmatprep.mubr.bf16.mxu1 %v2129_v56 }
 0x4f0   : > { %v2074_v61 = vadd.f32 %v4640_v60, %v6203_v58  ;;  %v2103_v62 = vmax.f32 %v2071_v59, 0.0 }
 0x4f2   : > { %v2104_v63 = vmax.f32 %v2074_v61, 0.0  ;;  %v4641_v0 = vpop.f32.mrb[56].mxu0 }
 0x4f3   : > { %v4642_v1 = vpop.f32.mrb[57].mxu0 }
 0x4f4   : > { %v4643_v2 = vadd.f32 %v4642_v1, %v4641_v0  ;;  %v4644_v3 = vpop.f32.mrb[58].mxu0  ;;  %v2130_v4 = vpack.c.bf16 %v2104_v63, %v2103_v62 }
 0x4f5   : > { %v4645_v5 = vpop.f32.mrb[59].mxu0 }
 0x4f6   : > { %v2079_v6 = vadd.f32 %v4643_v2, %v6203_v58  ;;  %v4646_v7 = vadd.f32 %v4645_v5, %v4644_v3  ;;  %4926 = vmatmul.mubr.bf16.gmra.mrb[56].mxu1 %v2130_v4 }
 0x4f8   : > { %v2082_v8 = vadd.f32 %v4646_v7, %v6203_v58  ;;  %v2105_v9 = vmax.f32 %v2079_v6, 0.0 }
 0x4fa   : > { %v2106_v10 = vmax.f32 %v2082_v8, 0.0  ;;  %v4647_v11 = vpop.f32.mrb[60].mxu0 }
 0x4fb   : > { %v4648_v12 = vpop.f32.mrb[61].mxu0 }
 0x4fc   : > { %v4649_v13 = vadd.f32 %v4648_v12, %v4647_v11  ;;  %v4650_v14 = vpop.f32.mrb[62].mxu0  ;;  %v2131_v15 = vpack.c.bf16 %v2106_v10, %v2105_v9 }
 0x4fd   : > { %v4651_v16 = vpop.f32.mrb[63].mxu0 }
 0x4fe   : > { %v2087_v17 = vadd.f32 %v4649_v13, %v6203_v58  ;;  %v4652_v18 = vadd.f32 %v4651_v16, %v4650_v14  ;;  %4929 = vmatprep.mubr.bf16.mxu1 %v2131_v15 }
 0x500   : > { %v2090_v19 = vadd.f32 %v4652_v18, %v6203_v58  ;;  %v2107_v20 = vmax.f32 %v2087_v17, 0.0 }
 0x502   : > { %v2108_v21 = vmax.f32 %v2090_v19, 0.0 }
 0x504   : > { %v2132_v22 = vpack.c.bf16 %v2108_v21, %v2107_v20 }
 0x506   : > { %4930 = vmatmul.mubr.bf16.gmra.mrb[60].mxu1 %v2132_v22 }
 0x5a9   : > { %v4919_v27 = vpop.f32.mrb[48].mxu1 }
 0x5aa   : > { %v2231_v28 = vadd.f32 %v4919_v27, %v4408_v26  ;;  %v2222_v29 = vpop.f32.mrb[49].mxu1  ;;  %v2677_v27 = vpop.permute.xlu1 %2676 }
 0x5ab   : > { %v2223_v30 = vadd.f32 %v4408_v26, %v2222_v29  ;;  %v4920_v31 = vpop.f32.mrb[50].mxu1 }
 0x5ac   : > { %v2234_v58 = vadd.f32 %v4920_v31, %v4408_v26  ;;  %v2225_v32 = vpop.f32.mrb[51].mxu1  ;;  %v2287_v34 = vmax.f32 %v2231_v28, 0.0 }
 0x5ad   : > { %v2226_v33 = vadd.f32 %v4408_v26, %v2225_v32  ;;  %v2285_v37 = vmax.f32 %v2223_v30, 0.0  ;;  %v5351_v32 = vld [vmem:[%s6705_s27 + $0x8] sm:$0xff]  }
 0x5ae   : > { %v2288_v36 = vmax.f32 %v2234_v58, 0.0  ;;  %v5350_v58 = vld [vmem:[%s6705_s27] sm:$0xff]  }
 0x5af   : > { %v2286_v38 = vmax.f32 %v2226_v33, 0.0  ;;  %4957 = vmatprep.subr.bf16.mxu1 %v5350_v58  ;;  %v5352_v33 = vld [vmem:[%s6706_s18] sm:$0xff]  }
 0x5b0   : > { %v2310_v39 = vpack.c.bf16 %v2288_v36, %v2287_v34  ;;  %4958 = vmatpush3.bf16.msra.mxu1 %v5350_v58  ;;  %v6247_v34 = vld [vmem:[%s6707_s22] ss:$0 sm:$0xff]  ;;  %s6708_s22 = sld [smem:[#allocation17_spill]] }
 0x5b1   : > { %v2309_v40 = vpack.c.bf16 %v2286_v38, %v2285_v37  ;;  %4959 = vmatprep.subr.bf16.mxu1 %v5351_v32 }
 0x5b3   : > { %4941 = vmatprep.mubr.msk.bf16.mxu0 %vm1446_vm3, %v2309_v40 }
 0x5b4   : > { %4942 = vmatmul.mubr.msk.bf16.vlgmr.msra.gmra.mrb[64].mxu0 %vm1446_vm3, %v2310_v39  ;;  %4960 = vmatpush3.bf16.msra.mxu1 %v5351_v32 }
 0x5b5   : > { %4978 = vmatpush3.bf16.msra.mxu0 %v5348_v25  ;;  %v2675_v25 = vpop.permute.xlu0 %2674  ;;  %4997 = vmatprep.subr.bf16.mxu1 %v5352_v33 }
 0x5b6   : > { %4979 = vmatprep.subr.bf16.mxu0 %v5349_v54 }
 0x5b9   : > { %v4923_v41 = vpop.f32.mrb[52].mxu1  ;;  %4980 = vmatpush3.bf16.msra.mxu0 %v5349_v54  ;;  %v2681_v28 = vpop.permute.xlu0 %2680 }
 0x5ba   : > { %v2247_v42 = vadd.f32 %v4923_v41, %v4408_v26  ;;  %v2238_v43 = vpop.f32.mrb[53].mxu1 }
 0x5bb   : > { %v2239_v55 = vadd.f32 %v4408_v26, %v2238_v43  ;;  %v4924_v44 = vpop.f32.mrb[54].mxu1 }
 0x5bc   : > { %v2250_v45 = vadd.f32 %v4924_v44, %v4408_v26  ;;  %v2241_v46 = vpop.f32.mrb[55].mxu1  ;;  %v2291_v48 = vmax.f32 %v2247_v42, 0.0 }
 0x5bd   : > { %v2242_v47 = vadd.f32 %v4408_v26, %v2241_v46  ;;  %v2289_v52 = vmax.f32 %v2239_v55, 0.0  ;;  %v2685_v30 = vpop.permute.xlu0 %2684 }
 0x5be   : > { %v2292_v49 = vmax.f32 %v2250_v45, 0.0 }
 0x5bf   : > { %v2290_v56 = vmax.f32 %v2242_v47, 0.0 }
 0x5c0   : > { %v2312_v57 = vpack.c.bf16 %v2292_v49, %v2291_v48 }
 0x5c1   : > { %v2311_v59 = vpack.c.bf16 %v2290_v56, %v2289_v52 }
 0x5c3   : > { %4945 = vmatprep.mubr.msk.bf16.mxu0 %vm1446_vm3, %v2311_v59  ;;  %v5353_v59 = vld [vmem:[%s6706_s18 + $0x8] sm:$0xff]  }
 0x5c4   : > { %4946 = vmatmul.mubr.msk.bf16.gmra.mrb[68].mxu0 %vm1446_vm3, %v2312_v57 }
 0x5c9   : > { %v4927_v60 = vpop.f32.mrb[56].mxu1 }
 0x5ca   : > { %v2263_v61 = vadd.f32 %v4927_v60, %v4408_v26  ;;  %v2254_v62 = vpop.f32.mrb[57].mxu1 }
 0x5cb   : > { %v2255_v63 = vadd.f32 %v4408_v26, %v2254_v62  ;;  %v4928_v0 = vpop.f32.mrb[58].mxu1 }
 0x5cc   : > { %v2266_v1 = vadd.f32 %v4928_v0, %v4408_v26  ;;  %v2257_v2 = vpop.f32.mrb[59].mxu1  ;;  %v2295_v4 = vmax.f32 %v2263_v61, 0.0  ;;  %v5355_v0 = vld [vmem:[%s6706_s18 + $0x18] sm:$0xff]  }
 0x5cd   : > { %v2258_v3 = vadd.f32 %v4408_v26, %v2257_v2  ;;  %v2293_v6 = vmax.f32 %v2255_v63, 0.0  ;;  %v5354_v63 = vld [vmem:[%s6706_s18 + $0x10] sm:$0xff]  }
 0x5ce   : > { %v2296_v5 = vmax.f32 %v2266_v1, 0.0 }
 0x5cf   : > { %v2294_v7 = vmax.f32 %v2258_v3, 0.0 }
 0x5d0   : > { %v2314_v8 = vpack.c.bf16 %v2296_v5, %v2295_v4 }
 0x5d1   : > { %v2313_v9 = vpack.c.bf16 %v2294_v7, %v2293_v6 }
 0x5d3   : > { %4949 = vmatprep.mubr.msk.bf16.mxu0 %vm1446_vm3, %v2313_v9 }
 0x5d4   : > { %4950 = vmatmul.mubr.msk.bf16.gmra.mrb[72].mxu0 %vm1446_vm3, %v2314_v8 }
 0x5d9   : > { %v4931_v10 = vpop.f32.mrb[60].mxu1 }
 0x5da   : > { %v2279_v11 = vadd.f32 %v4931_v10, %v4408_v26  ;;  %v2270_v12 = vpop.f32.mrb[61].mxu1 }
 0x5db   : > { %v2271_v13 = vadd.f32 %v4408_v26, %v2270_v12  ;;  %v4932_v14 = vpop.f32.mrb[62].mxu1 }
 0x5dc   : > { %v2282_v15 = vadd.f32 %v4932_v14, %v4408_v26  ;;  %v2273_v16 = vpop.f32.mrb[63].mxu1  ;;  %v2299_v18 = vmax.f32 %v2279_v11, 0.0 }
 0x5dd   : > { %v2274_v17 = vadd.f32 %v4408_v26, %v2273_v16  ;;  %v2297_v20 = vmax.f32 %v2271_v13, 0.0  ;;  %v2679_v26 = vpop.permute.xlu1 %2678 }
 0x5de   : > { %v2300_v19 = vmax.f32 %v2282_v15, 0.0 }
 0x5df   : > { %v2298_v21 = vmax.f32 %v2274_v17, 0.0 }
 0x5e0   : > { %v2316_v22 = vpack.c.bf16 %v2300_v19, %v2299_v18 }
 0x5e1   : > { %v2315_v23 = vpack.c.bf16 %v2298_v21, %v2297_v20  ;;  %v2683_v29 = vpop.permute.xlu1 %2682 }
 0x5e3   : > { %4953 = vmatprep.mubr.msk.bf16.mxu0 %vm1446_vm3, %v2315_v23 }
 0x5e4   : > { %4954 = vmatmul.mubr.msk.bf16.gmra.mrb[76].mxu0 %vm1446_vm3, %v2316_v22 }
 0x5e5   : > { %4981 = vmatprep.mubr.msk.bf16.mxu0 %vm1261_vm2, %v2673_v24  ;;  %v2687_v31 = vpop.permute.xlu1 %2686 }
 0x5ec   : > { %4982 = vmatmul.mubr.msk.bf16.vlgmr.msra.gmra.mrb[80].mxu0 %vm1261_vm2, %v2675_v25 }
 0x5ed   : > { %4985 = vmatprep.mubr.msk.bf16.mxu0 %vm1261_vm2, %v2677_v27 }
 0x5f4   : > { %4986 = vmatmul.mubr.msk.bf16.gmra.mrb[84].mxu0 %vm1261_vm2, %v2679_v26 }
 0x5f5   : > { %4989 = vmatprep.mubr.msk.bf16.mxu0 %vm1261_vm2, %v2681_v28 }
 0x5fc   : > { %4990 = vmatmul.mubr.msk.bf16.gmra.mrb[88].mxu0 %vm1261_vm2, %v2683_v29  ;;  %v4441_v29 = vld [vmem:[%s6708_s22] ss:$0 sm:$0xff]  ;;  %s6709_s22 = sld [smem:[#allocation20_spill]] }
 0x5fd   : > { %4993 = vmatprep.mubr.msk.bf16.mxu0 %vm1261_vm2, %v2685_v30 }
 0x604   : > { %4994 = vmatmul.mubr.msk.bf16.gmra.mrb[92].mxu0 %vm1261_vm2, %v2687_v31 }
 0x605   : > { %3169 = vmatprep.mubr.bf16.mxu0 %v5794_v35 }
 0x687   : > { %v4943_v36 = vpop.f32.mrb[64].mxu0 }
 0x688   : > { %v2415_v37 = vadd.f32 %v4943_v36, %v6247_v34  ;;  %v2406_v38 = vpop.f32.mrb[65].mxu0 }
 0x689   : > { %v2407_v39 = vadd.f32 %v6247_v34, %v2406_v38  ;;  %v4944_v40 = vpop.f32.mrb[66].mxu0 }
 0x68a   : > { %5536 = vtanh.f32 %v2415_v37  ;;  %v2418_v54 = vadd.f32 %v4944_v40, %v6247_v34  ;;  %v2409_v41 = vpop.f32.mrb[67].mxu0 }
 0x68b   : > { %5538 = vtanh.f32 %v2407_v39  ;;  %v2410_v42 = vadd.f32 %v6247_v34, %v2409_v41 }
 0x68c   : > { %5540 = vtanh.f32 %v2418_v54 }
 0x68d   : > { %5542 = vtanh.f32 %v2410_v42 }
 0x694   : > { %v5537_v43 = vpop.eup %5536 }
 0x695   : > { %v5539_v55 = vpop.eup %5538 }
 0x696   : > { %v5541_v44 = vpop.eup %5540 }
 0x697   : > { %v5543_v45 = vpop.eup %5542  ;;  %v2490_v46 = vpack.c.bf16 %v5541_v44, %v5537_v43  ;;  %v4947_v47 = vpop.f32.mrb[68].mxu0 }
 0x698   : > { %v2431_v48 = vadd.f32 %v4947_v47, %v6247_v34  ;;  %v2422_v49 = vpop.f32.mrb[69].mxu0  ;;  %v2489_v52 = vpack.c.bf16 %v5543_v45, %v5539_v55 }
 0x699   : > { %v2423_v56 = vadd.f32 %v6247_v34, %v2422_v49  ;;  %v4948_v57 = vpop.f32.mrb[70].mxu0 }
 0x69a   : > { %5544 = vtanh.f32 %v2431_v48  ;;  %v2434_v60 = vadd.f32 %v4948_v57, %v6247_v34  ;;  %v2425_v61 = vpop.f32.mrb[71].mxu0  ;;  %4961 = vmatprep.mubr.msk.bf16.mxu1 %vm1261_vm2, %v2489_v52 }
 0x69b   : > { %5546 = vtanh.f32 %v2423_v56  ;;  %v2426_v62 = vadd.f32 %v6247_v34, %v2425_v61  ;;  %4962 = vmatmul.mubr.msk.bf16.vlgmr.msra.gmra.mrb[64].mxu1 %vm1261_vm2, %v2490_v46 }
 0x69c   : > { %5548 = vtanh.f32 %v2434_v60  ;;  %4998 = vmatpush3.bf16.msra.mxu1 %v5352_v33 }
 0x69d   : > { %5550 = vtanh.f32 %v2426_v62  ;;  %4999 = vmatprep.subr.bf16.mxu1 %v5353_v59 }
 0x6a0   : > { %5000 = vmatpush3.bf16.msra.mxu1 %v5353_v59 }
 0x6a1   : > { %5001 = vmatprep.subr.bf16.mxu1 %v5354_v63 }
 0x6a4   : > { %v5545_v1 = vpop.eup %5544  ;;  %5002 = vmatpush3.bf16.msra.mxu1 %v5354_v63 }
 0x6a5   : > { %v5547_v2 = vpop.eup %5546  ;;  %5003 = vmatprep.subr.bf16.mxu1 %v5355_v0 }
 0x6a6   : > { %v5549_v3 = vpop.eup %5548 }
 0x6a7   : > { %v5551_v4 = vpop.eup %5550  ;;  %v4951_v5 = vpop.f32.mrb[72].mxu0  ;;  %v2492_v6 = vpack.c.bf16 %v5549_v3, %v5545_v1 }
 0x6a8   : > { %v2447_v7 = vadd.f32 %v4951_v5, %v6247_v34  ;;  %v2438_v8 = vpop.f32.mrb[73].mxu0  ;;  %v2491_v9 = vpack.c.bf16 %v5551_v4, %v5547_v2  ;;  %5004 = vmatpush3.bf16.msra.mxu1 %v5355_v0 }
 0x6a9   : > { %v2439_v10 = vadd.f32 %v6247_v34, %v2438_v8  ;;  %v4952_v11 = vpop.f32.mrb[74].mxu0 }
 0x6aa   : > { %5552 = vtanh.f32 %v2447_v7  ;;  %v2450_v12 = vadd.f32 %v4952_v11, %v6247_v34  ;;  %v2441_v13 = vpop.f32.mrb[75].mxu0  ;;  %4965 = vmatprep.mubr.msk.bf16.mxu1 %vm1261_vm2, %v2491_v9 }
 0x6ab   : > { %5554 = vtanh.f32 %v2439_v10  ;;  %v2442_v14 = vadd.f32 %v6247_v34, %v2441_v13  ;;  %4966 = vmatmul.mubr.msk.bf16.gmra.mrb[68].mxu1 %vm1261_vm2, %v2492_v6 }
 0x6ac   : > { %5556 = vtanh.f32 %v2450_v12 }
 0x6ad   : > { %5558 = vtanh.f32 %v2442_v14 }
 0x6b4   : > { %v5553_v15 = vpop.eup %5552 }
 0x6b5   : > { %v5555_v16 = vpop.eup %5554 }
 0x6b6   : > { %v5557_v17 = vpop.eup %5556 }
 0x6b7   : > { %v5559_v18 = vpop.eup %5558  ;;  %v4955_v19 = vpop.f32.mrb[76].mxu0  ;;  %v2494_v20 = vpack.c.bf16 %v5557_v17, %v5553_v15 }
 0x6b8   : > { %v2463_v21 = vadd.f32 %v4955_v19, %v6247_v34  ;;  %v2454_v22 = vpop.f32.mrb[77].mxu0  ;;  %v2493_v23 = vpack.c.bf16 %v5559_v18, %v5555_v16 }
 0x6b9   : > { %v2455_v24 = vadd.f32 %v6247_v34, %v2454_v22  ;;  %v4956_v25 = vpop.f32.mrb[78].mxu0 }
 0x6ba   : > { %5560 = vtanh.f32 %v2463_v21  ;;  %v2466_v27 = vadd.f32 %v4956_v25, %v6247_v34  ;;  %v2457_v26 = vpop.f32.mrb[79].mxu0  ;;  %4969 = vmatprep.mubr.msk.bf16.mxu1 %vm1261_vm2, %v2493_v23 }
 0x6bb   : > { %5562 = vtanh.f32 %v2455_v24  ;;  %v2458_v28 = vadd.f32 %v6247_v34, %v2457_v26  ;;  %4970 = vmatmul.mubr.msk.bf16.gmra.mrb[72].mxu1 %vm1261_vm2, %v2494_v20 }
 0x6bc   : > { %5564 = vtanh.f32 %v2466_v27 }
 0x6bd   : > { %5566 = vtanh.f32 %v2458_v28 }
 0x6bf   : > { %v4983_v30 = vpop.f32.mrb[80].mxu0 }
 0x6c0   : > { %v2767_v31 = vadd.f32 %v4983_v30, %v4441_v29  ;;  %v2758_v58 = vpop.f32.mrb[81].mxu0 }
 0x6c1   : > { %v2759_v32 = vadd.f32 %v4441_v29, %v2758_v58  ;;  %v4984_v33 = vpop.f32.mrb[82].mxu0 }
 0x6c2   : > { %v2770_v36 = vadd.f32 %v4984_v33, %v4441_v29  ;;  %v2761_v37 = vpop.f32.mrb[83].mxu0  ;;  %v2823_v40 = vmax.f32 %v2767_v31, 0.0  ;;  %v5361_v33 = vld [vmem:[%s6709_s22 + $0x14] ss:$8 sps:$4 sm:$0xff]  }
 0x6c3   : > { %v2762_v38 = vadd.f32 %v4441_v29, %v2761_v37  ;;  %v2821_v42 = vmax.f32 %v2759_v32, 0.0  ;;  %v5356_v32 = vld [vmem:[%s6709_s22] ss:$8 sps:$4 sm:$0xff]   ;;  %v5364_v37 = vld [vmem:[%s6709_s22 + $0x24] ss:$8 sps:$4 sm:$0xff]  }
 0x6c4   : > { %v5561_v39 = vpop.eup %5560  ;;  %v2824_v54 = vmax.f32 %v2770_v36, 0.0  ;;  %v5359_v36 = vld [vmem:[%s6709_s22 + $0x10] ss:$8 sps:$4 sm:$0xff]  }
 0x6c5   : > { %v5563_v41 = vpop.eup %5562  ;;  %v2822_v43 = vmax.f32 %v2762_v38, 0.0  ;;  %v5362_v38 = vld [vmem:[%s6709_s22 + $0x20] ss:$8 sps:$4 sm:$0xff]  }
 0x6c6   : > { %v5565_v34 = vpop.eup %5564  ;;  %v2846_v55 = vpack.c.bf16 %v2824_v54, %v2823_v40  ;;  %v5365_v40 = vld [vmem:[%s6709_s22 + $0x30] ss:$8 sps:$4 sm:$0xff]   ;;  %v5370_v54 = vld [vmem:[%s6709_s22 + $0x44] ss:$8 sps:$4 sm:$0xff]  }
 0x6c7   : > { %v5567_v44 = vpop.eup %5566  ;;  %v2845_v45 = vpack.c.bf16 %v2822_v43, %v2821_v42  ;;  %v4987_v46 = vpop.f32.mrb[84].mxu0  ;;  %v2496_v47 = vpack.c.bf16 %v5565_v34, %v5561_v39  ;;  %v5367_v39 = vld [vmem:[%s6709_s22 + $0x34] ss:$8 sps:$4 sm:$0xff]   ;;  %v5371_v43 = vld [vmem:[%s6709_s22 + $0x50] ss:$8 sps:$4 sm:$0xff]  }
 0x6c8   : > { %v2783_v48 = vadd.f32 %v4987_v46, %v4441_v29  ;;  %v2774_v49 = vpop.f32.mrb[85].mxu0  ;;  %v2495_v52 = vpack.c.bf16 %v5567_v44, %v5563_v41  ;;  %v5368_v41 = vld [vmem:[%s6709_s22 + $0x40] ss:$8 sps:$4 sm:$0xff]   ;;  %v5373_v42 = vld [vmem:[%s6709_s22 + $0x54] ss:$8 sps:$4 sm:$0xff]  }
 0x6c9   : > { %v2775_v56 = vadd.f32 %v4441_v29, %v2774_v49  ;;  %v4988_v57 = vpop.f32.mrb[86].mxu0  ;;  %v5376_v34 = vld [vmem:[%s6709_s22 + $0x64] ss:$8 sps:$4 sm:$0xff]   ;;  %v5379_v44 = vld [vmem:[%s6709_s22 + $0x74] ss:$8 sps:$4 sm:$0xff]  }
 0x6ca   : > { %v2786_v59 = vadd.f32 %v4988_v57, %v4441_v29  ;;  %4973 = vmatprep.mubr.msk.bf16.mxu1 %vm1261_vm2, %v2495_v52  ;;  %v2777_v60 = vpop.f32.mrb[87].mxu0  ;;  %v2827_v62 = vmax.f32 %v2783_v48, 0.0  ;;  %v5380_v46 = vld [vmem:[%s6710_s2 + $0x40] sm:$0xff]   ;;  %v5382_v48 = vld [vmem:[%s6710_s2 + $0x48] sm:$0xff]  }
 0x6cb   : > { %v2778_v61 = vadd.f32 %v4441_v29, %v2777_v60  ;;  %4974 = vmatmul.mubr.msk.bf16.gmra.mrb[76].mxu1 %vm1261_vm2, %v2496_v47  ;;  %v2825_v0 = vmax.f32 %v2775_v56, 0.0  ;;  %v5381_v47 = vld [vmem:[%s6710_s2] sm:$0xff]   ;;  %4713 = vmatprep.subr.bf16.mxu1 %v5380_v46  ;;  %v5383_v49 = vld [vmem:[%s6710_s2 + $0x8] sm:$0xff]   ;;  %v5384_v56 = vld [vmem:[%s6710_s2 + $0x50] sm:$0xff]  }
 0x6cc   : > { %v2828_v63 = vmax.f32 %v2786_v59, 0.0  ;;  %5005 = vmatprep.mubr.msk.bf16.mxu1 %vm1446_vm3, %v2845_v45  ;;  %v5377_v45 = vld [vmem:[%s6709_s22 + $0x70] ss:$8 sps:$4 sm:$0xff]   ;;  %v6306_v52 = vld [vmem:[%s6711_s3] ss:$0 sm:$0xff]  ;;  %s6713_s3 = sshll.u32 %s6732_s28, 3 }
 0x6cd   : > { %v2826_v1 = vmax.f32 %v2778_v61, 0.0  ;;  %v5385_v61 = vld [vmem:[%s6710_s2 + $0x10] sm:$0xff]   ;;  %s6318_s6 = scalar_lea.vmem %s6712_s5, %s6713_s3  ;;  %s6714_s5 = sld [smem:[#allocation19_spill]] }
 0x6ce   : > { %v2848_v2 = vpack.c.bf16 %v2828_v63, %v2827_v62  ;;  %s6716_s28 = sld [smem:[#allocation21_spill]]  ;;  %s6717_s3 = sld [smem:[#allocation26_spill]] }
 0x6cf   : > { %v2847_v3 = vpack.c.bf16 %v2826_v1, %v2825_v0  ;;  %v4991_v4 = vpop.f32.mrb[88].mxu0  ;;  %v5386_v0 = vld [vmem:[%s6710_s2 + $0x58] sm:$0xff]  }
 0x6d0   : > { %v2799_v5 = vadd.f32 %v4991_v4, %v4441_v29  ;;  %v2790_v6 = vpop.f32.mrb[89].mxu0  ;;  %v1058_v4 = vld [vmem:[%s6318_s6 + $0x10] sm:$0xff] }
 0x6d1   : > { %v2791_v7 = vadd.f32 %v4441_v29, %v2790_v6  ;;  %v4992_v8 = vpop.f32.mrb[90].mxu0 }
 0x6d2   : > { %v2802_v9 = vadd.f32 %v4992_v8, %v4441_v29  ;;  %v2793_v10 = vpop.f32.mrb[91].mxu0  ;;  %v2831_v12 = vmax.f32 %v2799_v5, 0.0  ;;  %v1056_v5 = vld [vmem:[%s6318_s6] sm:$0xff] }
 0x6d3   : > { %v2794_v11 = vadd.f32 %v4441_v29, %v2793_v10  ;;  %5006 = vmatmul.mubr.msk.bf16.vlgmr.msra.gmra.mrb[80].mxu1 %vm1446_vm3, %v2846_v55  ;;  %v2829_v14 = vmax.f32 %v2791_v7, 0.0  ;;  %v5374_v55 = vld [vmem:[%s6709_s22 + $0x60] ss:$8 sps:$4 sm:$0xff]   ;;  %v1059_v7 = vld [vmem:[%s6318_s6 + $0x18] sm:$0xff] }
 0x6d4   : > { %v2832_v13 = vmax.f32 %v2802_v9, 0.0  ;;  %5009 = vmatprep.mubr.msk.bf16.mxu1 %vm1446_vm3, %v2847_v3  ;;  %4714 = vmatpush3.bf16.msra.mxu1 %v5381_v47  ;;  %v1057_v10 = vld [vmem:[%s6318_s6 + $0x8] sm:$0xff] }
 0x6d5   : > { %v2830_v15 = vmax.f32 %v2794_v11, 0.0  ;;  %4715 = vmatprep.subr.bf16.mxu1 %v5382_v48 }
 0x6d6   : > { %v2850_v16 = vpack.c.bf16 %v2832_v13, %v2831_v12 }
 0x6d7   : > { %v2849_v17 = vpack.c.bf16 %v2830_v15, %v2829_v14  ;;  %v4995_v18 = vpop.f32.mrb[92].mxu0 }
 0x6d8   : > { %v2815_v19 = vadd.f32 %v4995_v18, %v4441_v29  ;;  %v2806_v20 = vpop.f32.mrb[93].mxu0  ;;  %4716 = vmatpush3.bf16.msra.mxu1 %v5383_v49 }
 0x6d9   : > { %v2807_v21 = vadd.f32 %v4441_v29, %v2806_v20  ;;  %v4996_v22 = vpop.f32.mrb[94].mxu0  ;;  %4717 = vmatprep.subr.bf16.mxu1 %v5384_v56 }
 0x6da   : > { %v2818_v23 = vadd.f32 %v4996_v22, %v4441_v29  ;;  %v2809_v24 = vpop.f32.mrb[95].mxu0  ;;  %v2835_v27 = vmax.f32 %v2815_v19, 0.0 }
 0x6db   : > { %v2810_v25 = vadd.f32 %v4441_v29, %v2809_v24  ;;  %5010 = vmatmul.mubr.msk.bf16.gmra.mrb[84].mxu1 %vm1446_vm3, %v2848_v2  ;;  %v2833_v28 = vmax.f32 %v2807_v21, 0.0  ;;  %v5358_v29 = vld [vmem:[%s6709_s22 + $0x4] ss:$8 sps:$4 sm:$0xff]  }
 0x6dc   : > { %v2836_v26 = vmax.f32 %v2818_v23, 0.0  ;;  %5013 = vmatprep.mubr.msk.bf16.mxu1 %vm1446_vm3, %v2849_v17  ;;  %3137 = vmatprep.subr.bf16.mxu0 %v5358_v29 }
 0x6dd   : > { %v2834_v30 = vmax.f32 %v2810_v25, 0.0  ;;  %3138 = vmatpush1.bf16.msra.mxu0 %v5356_v32  ;;  %4718 = vmatpush3.bf16.msra.mxu1 %v5385_v61  ;;  %v1063_v32 = vld [vmem:[%s6318_s6 + $0x38] sm:$0xff]  ;;  %v1066_v61 = vld [vmem:[%s6318_s6 + $0x50] sm:$0xff] }
 0x6de   : > { %v2852_v31 = vpack.c.bf16 %v2836_v26, %v2835_v27  ;;  %3139 = vmatprep.subr.bf16.mxu0 %v5361_v33  ;;  %4719 = vmatprep.subr.bf16.mxu1 %v5386_v0  ;;  %v1067_v0 = vld [vmem:[%s6318_s6 + $0x58] sm:$0xff] }
 0x6df   : > { %v2851_v58 = vpack.c.bf16 %v2834_v30, %v2833_v28 }
 0x6e1   : > { %3140 = vmatpush1.bf16.msra.mxu0 %v5359_v36 }
 0x6e2   : > { %3141 = vmatprep.subr.bf16.mxu0 %v5364_v37  ;;  %v1061_v37 = vld [vmem:[%s6318_s6 + $0x28] sm:$0xff] }
 0x6e3   : > { %5014 = vmatmul.mubr.msk.bf16.gmra.mrb[88].mxu1 %vm1446_vm3, %v2850_v16 }
 0x6e4   : > { %5017 = vmatprep.mubr.msk.bf16.mxu1 %vm1446_vm3, %v2851_v58  ;;  %v1060_v58 = vld [vmem:[%s6318_s6 + $0x20] sm:$0xff] }
 0x6e5   : > { %3142 = vmatpush1.bf16.msra.mxu0 %v5362_v38 }
 0x6e6   : > { %3143 = vmatprep.subr.bf16.mxu0 %v5367_v39 }
 0x6e9   : > { %3144 = vmatpush1.bf16.msra.mxu0 %v5365_v40 }
 0x6ea   : > { %3145 = vmatprep.subr.bf16.mxu0 %v5370_v54 }
 0x6eb   : > { %5018 = vmatmul.mubr.msk.bf16.gmra.mrb[92].mxu1 %vm1446_vm3, %v2852_v31  ;;  %v1062_v31 = vld [vmem:[%s6318_s6 + $0x30] sm:$0xff] }
 0x6ed   : > { %3146 = vmatpush1.bf16.msra.mxu0 %v5368_v41 }
 0x6ee   : > { %3147 = vmatprep.subr.bf16.mxu0 %v5373_v42 }
 0x6f1   : > { %3148 = vmatpush1.bf16.msra.mxu0 %v5371_v43 }
 0x6f2   : > { %3149 = vmatprep.subr.bf16.mxu0 %v5376_v34 }
 0x6f5   : > { %3150 = vmatpush1.bf16.msra.mxu0 %v5374_v55 }
 0x6f6   : > { %3151 = vmatprep.subr.bf16.mxu0 %v5379_v44 }
 0x6f9   : > { %3152 = vmatpush1.bf16.msra.mxu0 %v5377_v45 }
 0x76e   : > { %v4963_v57 = vpop.f32.mrb[64].mxu1 }
 0x76f   : > { %v2583_v59 = vadd.f32 %v4963_v57, %v6306_v52  ;;  %v2574_v60 = vpop.f32.mrb[65].mxu1 }
 0x770   : > { %v2575_v62 = vadd.f32 %v6306_v52, %v2574_v60  ;;  %v4964_v63 = vpop.f32.mrb[66].mxu1 }
 0x771   : > { %5568 = vtanh.f32 %v2583_v59  ;;  %v2586_v1 = vadd.f32 %v4964_v63, %v6306_v52  ;;  %v2577_v2 = vpop.f32.mrb[67].mxu1 }
 0x772   : > { %5570 = vtanh.f32 %v2575_v62  ;;  %v2578_v3 = vadd.f32 %v6306_v52, %v2577_v2  ;;  %v1064_v62 = vld [vmem:[%s6318_s6 + $0x40] sm:$0xff] }
 0x773   : > { %5572 = vtanh.f32 %v2586_v1 }
 0x774   : > { %5574 = vtanh.f32 %v2578_v3  ;;  %v1065_v3 = vld [vmem:[%s6318_s6 + $0x48] sm:$0xff] }
 0x77b   : > { %v5569_v6 = vpop.eup %5568 }
 0x77c   : > { %v5571_v8 = vpop.eup %5570  ;;  %v3924_v9 = vsub.f32 %v1058_v4, %v5569_v6 }
 0x77d   : > { %v5573_v11 = vpop.eup %5572  ;;  %v3922_v12 = vsub.f32 %v1056_v5, %v5571_v8 }
 0x77e   : > { %v5575_v13 = vpop.eup %5574  ;;  %v3925_v14 = vsub.f32 %v1059_v7, %v5573_v11  ;;  %v4967_v15 = vpop.f32.mrb[68].mxu1  ;;  %v6325_v19 = vmul.f32 %v3924_v9, %v3924_v9 }
 0x77f   : > { %v3923_v16 = vsub.f32 %v1057_v10, %v5575_v13  ;;  %v2599_v17 = vadd.f32 %v4967_v15, %v6306_v52  ;;  %v2590_v18 = vpop.f32.mrb[69].mxu1  ;;  %v6330_v23 = vmul.f32 %v3922_v12, %v3922_v12 }
 0x780   : > { %v6327_v20 = vmul.f32 %v3925_v14, %v3925_v14  ;;  %v2591_v21 = vadd.f32 %v6306_v52, %v2590_v18  ;;  %v4968_v22 = vpop.f32.mrb[70].mxu1 }
 0x781   : > { %v6332_v24 = vmul.f32 %v3923_v16, %v3923_v16  ;;  %5576 = vtanh.f32 %v2599_v17  ;;  %v2602_v25 = vadd.f32 %v4968_v22, %v6306_v52  ;;  %v2593_v27 = vpop.f32.mrb[71].mxu1 }
 0x782   : > { %5578 = vtanh.f32 %v2591_v21  ;;  %v2594_v26 = vadd.f32 %v6306_v52, %v2593_v27  ;;  %v5152_v28 = vpack.c.bf16 %v6327_v20, %v6325_v19 }
 0x783   : > { %5580 = vtanh.f32 %v2602_v25  ;;  %v5148_v30 = vpack.c.bf16 %v6332_v24, %v6330_v23 }
 0x784   : > { %5582 = vtanh.f32 %v2594_v26  ;;  %v6381_v26 = vld [vmem:[%s6714_s5] ss:$0 sm:$0xff]  ;;  %s6718_s5 = sld [smem:[#allocation23_spill]] }
 0x78b   : > { %v5577_v29 = vpop.eup %5576 }
 0x78c   : > { %v5579_v33 = vpop.eup %5578  ;;  %v3928_v36 = vsub.f32 %v1062_v31, %v5577_v29 }
 0x78d   : > { %v5581_v38 = vpop.eup %5580  ;;  %v3926_v39 = vsub.f32 %v1060_v58, %v5579_v33 }
 0x78e   : > { %v5583_v40 = vpop.eup %5582  ;;  %v3929_v54 = vsub.f32 %v1063_v32, %v5581_v38  ;;  %v4971_v41 = vpop.f32.mrb[72].mxu1  ;;  %v6345_v55 = vmul.f32 %v3928_v36, %v3928_v36  ;;  %v1068_v38 = vld [vmem:[%s6318_s6 + $0x60] sm:$0xff] }
 0x78f   : > { %v3927_v42 = vsub.f32 %v1061_v37, %v5583_v40  ;;  %v2615_v43 = vadd.f32 %v4971_v41, %v6306_v52  ;;  %v2606_v34 = vpop.f32.mrb[73].mxu1  ;;  %v6350_v47 = vmul.f32 %v3926_v39, %v3926_v39 }
 0x790   : > { %v6347_v44 = vmul.f32 %v3929_v54, %v3929_v54  ;;  %v2607_v45 = vadd.f32 %v6306_v52, %v2606_v34  ;;  %v4972_v46 = vpop.f32.mrb[74].mxu1  ;;  %v1071_v54 = vld [vmem:[%s6318_s6 + $0x78] sm:$0xff] }
 0x791   : > { %v6352_v48 = vmul.f32 %v3927_v42, %v3927_v42  ;;  %5584 = vtanh.f32 %v2615_v43  ;;  %v2618_v49 = vadd.f32 %v4972_v46, %v6306_v52  ;;  %v2609_v56 = vpop.f32.mrb[75].mxu1 }
 0x792   : > { %5586 = vtanh.f32 %v2607_v45  ;;  %v2610_v57 = vadd.f32 %v6306_v52, %v2609_v56  ;;  %v5160_v59 = vpack.c.bf16 %v6347_v44, %v6345_v55  ;;  %v1069_v45 = vld [vmem:[%s6318_s6 + $0x68] sm:$0xff] }
 0x793   : > { %5588 = vtanh.f32 %v2618_v49  ;;  %v5156_v60 = vpack.c.bf16 %v6352_v48, %v6350_v47 }
 0x794   : > { %5590 = vtanh.f32 %v2610_v57 }
 0x79b   : > { %v5585_v63 = vpop.eup %5584 }
 0x79c   : > { %v5587_v1 = vpop.eup %5586  ;;  %v3932_v2 = vsub.f32 %v1066_v61, %v5585_v63 }
 0x79d   : > { %v5589_v4 = vpop.eup %5588  ;;  %v3930_v5 = vsub.f32 %v1064_v62, %v5587_v1 }
 0x79e   : > { %v5591_v6 = vpop.eup %5590  ;;  %v3933_v7 = vsub.f32 %v1067_v0, %v5589_v4  ;;  %v4975_v8 = vpop.f32.mrb[76].mxu1  ;;  %v6365_v12 = vmul.f32 %v3932_v2, %v3932_v2 }
 0x79f   : > { %v3931_v9 = vsub.f32 %v1065_v3, %v5591_v6  ;;  %v2631_v10 = vadd.f32 %v4975_v8, %v6306_v52  ;;  %v2622_v11 = vpop.f32.mrb[77].mxu1  ;;  %v6370_v16 = vmul.f32 %v3930_v5, %v3930_v5 }
 0x7a0   : > { %v6367_v13 = vmul.f32 %v3933_v7, %v3933_v7  ;;  %v2623_v14 = vadd.f32 %v6306_v52, %v2622_v11  ;;  %v4976_v15 = vpop.f32.mrb[78].mxu1 }
 0x7a1   : > { %v6372_v17 = vmul.f32 %v3931_v9, %v3931_v9  ;;  %5592 = vtanh.f32 %v2631_v10  ;;  %v2634_v18 = vadd.f32 %v4976_v15, %v6306_v52  ;;  %v2625_v21 = vpop.f32.mrb[79].mxu1 }
 0x7a2   : > { %5594 = vtanh.f32 %v2623_v14  ;;  %v2626_v22 = vadd.f32 %v6306_v52, %v2625_v21  ;;  %v5168_v25 = vpack.c.bf16 %v6367_v13, %v6365_v12  ;;  %v1070_v52 = vld [vmem:[%s6318_s6 + $0x70] sm:$0xff]  ;;  %s6715_s6 = sld [smem:[#allocation24_spill]] }
 0x7a3   : > { %5596 = vtanh.f32 %v2634_v18  ;;  %v5164_v27 = vpack.c.bf16 %v6372_v17, %v6370_v16 }
 0x7a4   : > { %5598 = vtanh.f32 %v2626_v22 }
 0x7a6   : > { %v5007_v31 = vpop.f32.mrb[80].mxu1 }
 0x7a7   : > { %v2951_v58 = vadd.f32 %v5007_v31, %v6381_v26  ;;  %v2942_v29 = vpop.f32.mrb[81].mxu1 }
 0x7a8   : > { %v2943_v32 = vadd.f32 %v6381_v26, %v2942_v29  ;;  %v5008_v33 = vpop.f32.mrb[82].mxu1 }
 0x7a9   : > { %v2954_v36 = vadd.f32 %v5008_v33, %v6381_v26  ;;  %v2945_v37 = vpop.f32.mrb[83].mxu1  ;;  %v3007_v41 = vmax.f32 %v2951_v58, 0.0 }
 0x7aa   : > { %v2946_v39 = vadd.f32 %v6381_v26, %v2945_v37  ;;  %v3005_v46 = vmax.f32 %v2943_v32, 0.0 }
 0x7ab   : > { %v5593_v40 = vpop.eup %5592  ;;  %v3008_v42 = vmax.f32 %v2954_v36, 0.0 }
 0x7ac   : > { %v5595_v43 = vpop.eup %5594  ;;  %v3936_v34 = vsub.f32 %v1070_v52, %v5593_v40  ;;  %v3006_v49 = vmax.f32 %v2946_v39, 0.0 }
 0x7ad   : > { %v5597_v56 = vpop.eup %5596  ;;  %v3934_v57 = vsub.f32 %v1068_v38, %v5595_v43  ;;  %v3038_v61 = vpack.c.bf16 %v3008_v42, %v3007_v41 }
 0x7ae   : > { %v5599_v62 = vpop.eup %5598  ;;  %v3937_v63 = vsub.f32 %v1071_v54, %v5597_v56  ;;  %v3037_v0 = vpack.c.bf16 %v3006_v49, %v3005_v46  ;;  %v5011_v1 = vpop.f32.mrb[84].mxu1  ;;  %v6392_v5 = vmul.f32 %v3936_v34, %v3936_v34 }
 0x7af   : > { %v3935_v2 = vsub.f32 %v1069_v45, %v5599_v62  ;;  %v2967_v3 = vadd.f32 %v5011_v1, %v6381_v26  ;;  %v2958_v4 = vpop.f32.mrb[85].mxu1  ;;  %v6397_v9 = vmul.f32 %v3934_v57, %v3934_v57 }
 0x7b0   : > { %v6394_v6 = vmul.f32 %v3937_v63, %v3937_v63  ;;  %v2959_v7 = vadd.f32 %v6381_v26, %v2958_v4  ;;  %v5012_v8 = vpop.f32.mrb[86].mxu1  ;;  %3170 = vmatmul.mubr.bf16.vlgmr.msra.gmra.mrb[96].mxu0 %v3037_v0 }
 0x7b1   : > { %v6399_v10 = vmul.f32 %v3935_v2, %v3935_v2  ;;  %v2970_v11 = vadd.f32 %v5012_v8, %v6381_v26  ;;  %v2961_v14 = vpop.f32.mrb[87].mxu1  ;;  %3179 = vmatprep.mubr.bf16.mxu0 %v5794_v35  ;;  %v3011_v21 = vmax.f32 %v2967_v3, 0.0 }
 0x7b2   : > { %v2962_v15 = vadd.f32 %v6381_v26, %v2961_v14  ;;  %v5176_v18 = vpack.c.bf16 %v6394_v6, %v6392_v5  ;;  %v3009_v58 = vmax.f32 %v2959_v7, 0.0 }
 0x7b3   : > { %v3012_v22 = vmax.f32 %v2970_v11, 0.0  ;;  %v5172_v31 = vpack.c.bf16 %v6399_v10, %v6397_v9 }
 0x7b4   : > { %v3010_v29 = vmax.f32 %v2962_v15, 0.0  ;;  %v5388_v15 = vld [vmem:[%s6710_s2 + $0x60] sm:$0xff]  }
 0x7b5   : > { %v3040_v32 = vpack.c.bf16 %v3012_v22, %v3011_v21  ;;  %v5389_v21 = vld [vmem:[%s6710_s2 + $0x20] sm:$0xff]   ;;  %v5390_v22 = vld [vmem:[%s6710_s2 + $0x68] sm:$0xff]  }
 0x7b6   : > { %v3039_v33 = vpack.c.bf16 %v3010_v29, %v3009_v58  ;;  %v5015_v52 = vpop.f32.mrb[88].mxu1  ;;  %v5391_v58 = vld [vmem:[%s6710_s2 + $0x28] sm:$0xff]   ;;  %v5392_v29 = vld [vmem:[%s6710_s2 + $0x70] sm:$0xff]  }
 0x7b7   : > { %v2983_v36 = vadd.f32 %v5015_v52, %v6381_v26  ;;  %v2974_v37 = vpop.f32.mrb[89].mxu1  ;;  %v5396_v52 = vld [vmem:[%s6715_s6] sm:$0xff]  }
 0x7b8   : > { %v2975_v38 = vadd.f32 %v6381_v26, %v2974_v37  ;;  %v5016_v39 = vpop.f32.mrb[90].mxu1  ;;  %3180 = vmatmul.mubr.bf16.gmra.mrb[100].mxu0 %v3038_v61  ;;  %5021 = vmatprep.subr.bf16.mxu0 %v5396_v52  ;;  %v5398_v37 = vld [vmem:[%s6715_s6 + $0x10] sm:$0xff]  }
 0x7b9   : > { %v2986_v40 = vadd.f32 %v5016_v39, %v6381_v26  ;;  %v2977_v54 = vpop.f32.mrb[91].mxu1  ;;  %3189 = vmatprep.mubr.bf16.mxu0 %v5794_v35  ;;  %v3015_v42 = vmax.f32 %v2983_v36, 0.0  ;;  %v5397_v36 = vld [vmem:[%s6715_s6 + $0x8] sm:$0xff]   ;;  %5022 = vmatpush3.bf16.msra.mxu0 %v5396_v52  ;;  %v5400_v39 = vld [vmem:[%s6715_s6 + $0x20] sm:$0xff]  }
 0x7ba   : > { %v2978_v41 = vadd.f32 %v6381_v26, %v2977_v54  ;;  %v3013_v34 = vmax.f32 %v2975_v38, 0.0  ;;  %5023 = vmatprep.subr.bf16.mxu0 %v5397_v36  ;;  %v5399_v38 = vld [vmem:[%s6715_s6 + $0x18] sm:$0xff]   ;;  %v3045_v54 = vld [vmem:[%s6716_s28] sm:$0x3]  ;;  %s6721_s28 = sld [smem:[#allocation25_spill]] }
 0x7bb   : > { %v3016_v43 = vmax.f32 %v2986_v40, 0.0  ;;  %v5401_v40 = vld [vmem:[%s6715_s6 + $0x28] sm:$0xff]  }
 0x7bc   : > { %v3014_v45 = vmax.f32 %v2978_v41, 0.0  ;;  %v6439_v41 = vrot.slane %v3045_v54, %v6152_v51 }
 0x7bd   : > { %v3042_v46 = vpack.c.bf16 %v3016_v43, %v3015_v42  ;;  %5024 = vmatpush3.bf16.msra.mxu0 %v5397_v36  ;;  %v6443_v42 = vrot.slane %v3045_v54, %v1616_v53 }
 0x7be   : > { %v3041_v49 = vpack.c.bf16 %v3014_v45, %v3013_v34  ;;  %v5019_v56 = vpop.f32.mrb[92].mxu1  ;;  %5025 = vmatprep.subr.bf16.mxu0 %v5398_v37 }
 0x7bf   : > { %v2999_v57 = vadd.f32 %v5019_v56, %v6381_v26  ;;  %v2990_v62 = vpop.f32.mrb[93].mxu1 }
 0x7c0   : > { %v2991_v63 = vadd.f32 %v6381_v26, %v2990_v62  ;;  %v5020_v61 = vpop.f32.mrb[94].mxu1  ;;  %3190 = vmatmul.mubr.bf16.gmra.mrb[104].mxu0 %v3039_v33  ;;  %v5395_v33 = vld [vmem:[%s6710_s2 + $0x38] sm:$0xff]   ;;  %v4498_v12 = vld [vmem:[%s6721_s28] ss:$0 sm:$0xff]  ;;  %s1024_s28 = sand.u32 1, %s5750_s10  }
 0x7c1   : > { %v3002_v0 = vadd.f32 %v5020_v61, %v6381_v26  ;;  %v2993_v1 = vpop.f32.mrb[95].mxu1  ;;  %3199 = vmatprep.mubr.bf16.mxu0 %v5794_v35  ;;  %v3019_v3 = vmax.f32 %v2999_v57, 0.0  ;;  %5026 = vmatpush3.bf16.msra.mxu0 %v5398_v37  ;;  %s4216_s9 = scalar_lea.sflag [#allocation4], %s1024_s28 }
 0x7c2   : > { %v2994_v2 = vadd.f32 %v6381_v26, %v2993_v1  ;;  %v3017_v7 = vmax.f32 %v2991_v63, 0.0  ;;  %v5387_v26 = vld [vmem:[%s6710_s2 + $0x18] sm:$0xff]   ;;  %5027 = vmatprep.subr.bf16.mxu0 %v5399_v38 }
 0x7c3   : > { %v3020_v4 = vmax.f32 %v3002_v0, 0.0  ;;  %4720 = vmatpush3.bf16.msra.mxu1 %v5387_v26 }
 0x7c4   : > { %v3018_v8 = vmax.f32 %v2994_v2, 0.0  ;;  %4721 = vmatprep.subr.bf16.mxu1 %v5388_v15 }
 0x7c5   : > { %v3044_v11 = vpack.c.bf16 %v3020_v4, %v3019_v3  ;;  %5028 = vmatpush3.bf16.msra.mxu0 %v5399_v38 }
 0x7c6   : > { %v3043_v14 = vpack.c.bf16 %v3018_v8, %v3017_v7  ;;  %5029 = vmatprep.subr.bf16.mxu0 %v5400_v39 }
 0x7c7   : > { %4722 = vmatpush3.bf16.msra.mxu1 %v5389_v21 }
 0x7c8   : > { %3200 = vmatmul.mubr.bf16.gmra.mrb[108].mxu0 %v3040_v32  ;;  %4723 = vmatprep.subr.bf16.mxu1 %v5390_v22  ;;  %v5393_v32 = vld [vmem:[%s6710_s2 + $0x30] sm:$0xff]  }
 0x7c9   : > { %3209 = vmatprep.mubr.bf16.mxu0 %v5794_v35  ;;  %5030 = vmatpush3.bf16.msra.mxu0 %v5400_v39 }
 0x7ca   : > { %5031 = vmatprep.subr.bf16.mxu0 %v5401_v40 }
 0x7cb   : > { %4724 = vmatpush3.bf16.msra.mxu1 %v5391_v58 }
 0x7cc   : > { %4725 = vmatprep.subr.bf16.mxu1 %v5392_v29 }
 0x7cd   : > { %5032 = vmatpush3.bf16.msra.mxu0 %v5401_v40 }
 0x7cf   : > { %4726 = vmatpush3.bf16.msra.mxu1 %v5393_v32 }
 0x7d0   : > { %3210 = vmatmul.mubr.bf16.gmra.mrb[112].mxu0 %v3041_v49 }
 0x7d1   : > { %3219 = vmatprep.mubr.bf16.mxu0 %v5794_v35 }
 0x7d8   : > { %3220 = vmatmul.mubr.bf16.gmra.mrb[116].mxu0 %v3042_v46 }
 0x7d9   : > { %3229 = vmatprep.mubr.bf16.mxu0 %v5794_v35 }
 0x7e0   : > { %3230 = vmatmul.mubr.bf16.gmra.mrb[120].mxu0 %v3043_v14 }
 0x7e1   : > { %3239 = vmatprep.mubr.bf16.mxu0 %v5794_v35  ;;  %v5394_v35 = vld [vmem:[%s6710_s2 + $0x78] sm:$0xff]   ;;  %s4555_s2 = sshll.u32 %s5993_s0, 5  ;;  %s5798_s0 = smov [#allocation3]  }
 0x7e2   : > { %4727 = vmatprep.subr.bf16.mxu1 %v5394_v35  ;;  %s6622_s8 = scalar_lea.hbm %s5970_s4, %s4555_s2 }
 0x7e3   : > { %4728 = vmatpush3.bf16.msra.mxu1 %v5395_v33 }
 0x7e8   : > { %3240 = vmatmul.mubr.bf16.gmra.mrb[124].mxu0 %v3044_v11 }
 0x883   : > { %v3171_v43 = vpop.f32.mrb[96].mxu0 }
 0x884   : > { %v3172_v34 = vadd.f32 %v3171_v43, %v6439_v41  ;;  %v3173_v45 = vpop.f32.mrb[97].mxu0 }
 0x885   : > { %v3174_v46 = vadd.f32 %v3173_v45, %v6443_v42  ;;  %v3175_v49 = vpop.f32.mrb[98].mxu0 }
 0x886   : > { %5600 = vtanh.f32 %v3172_v34  ;;  %v3176_v56 = vadd.f32 %v3175_v49, %v6439_v41  ;;  %v3177_v57 = vpop.f32.mrb[99].mxu0 }
 0x887   : > { %5602 = vtanh.f32 %v3174_v46  ;;  %v3178_v62 = vadd.f32 %v3177_v57, %v6443_v42 }
 0x888   : > { %5604 = vtanh.f32 %v3176_v56 }
 0x889   : > { %5606 = vtanh.f32 %v3178_v62 }
 0x88b   : > { %v3181_v63 = vpop.f32.mrb[100].mxu0 }
 0x88c   : > { %v3182_v50 = vadd.f32 %v3181_v63, %v6439_v41  ;;  %v3183_v53 = vpop.f32.mrb[101].mxu0 }
 0x88d   : > { %v3184_v61 = vadd.f32 %v3183_v53, %v6443_v42  ;;  %v3185_v0 = vpop.f32.mrb[102].mxu0 }
 0x88e   : > { %5608 = vtanh.f32 %v3182_v50  ;;  %v3186_v1 = vadd.f32 %v3185_v0, %v6439_v41  ;;  %v3187_v2 = vpop.f32.mrb[103].mxu0 }
 0x88f   : > { %5610 = vtanh.f32 %v3184_v61  ;;  %v3188_v3 = vadd.f32 %v3187_v2, %v6443_v42 }
 0x890   : > { %v5601_v4 = vpop.eup %5600  ;;  %5612 = vtanh.f32 %v3186_v1 }
 0x891   : > { %v5603_v7 = vpop.eup %5602  ;;  %5614 = vtanh.f32 %v3188_v3 }
 0x892   : > { %v5605_v8 = vpop.eup %5604 }
 0x893   : > { %v5607_v11 = vpop.eup %5606  ;;  %v3191_v14 = vpop.f32.mrb[104].mxu0  ;;  %v3314_v26 = vpack.c.bf16 %v5605_v8, %v5601_v4 }
 0x894   : > { %v3192_v15 = vadd.f32 %v3191_v14, %v6439_v41  ;;  %v3193_v21 = vpop.f32.mrb[105].mxu0  ;;  %v3315_v22 = vpack.c.bf16 %v5607_v11, %v5603_v7 }
 0x895   : > { %v3194_v58 = vadd.f32 %v3193_v21, %v6443_v42  ;;  %v3195_v29 = vpop.f32.mrb[106].mxu0 }
 0x896   : > { %5616 = vtanh.f32 %v3192_v15  ;;  %v3196_v32 = vadd.f32 %v3195_v29, %v6439_v41  ;;  %v3197_v35 = vpop.f32.mrb[107].mxu0  ;;  %3465 = vmatprep.mubr.bf16.mxu1 %v3315_v22 }
 0x897   : > { %5618 = vtanh.f32 %v3194_v58  ;;  %v3198_v33 = vadd.f32 %v3197_v35, %v6443_v42  ;;  %3466 = vmatmul.mubr.bf16.vlgmr.msra.gmra.mrb[96].mxu1 %v3314_v26 }
 0x898   : > { %v5609_v52 = vpop.eup %5608  ;;  %5620 = vtanh.f32 %v3196_v32 }
 0x899   : > { %v5611_v36 = vpop.eup %5610  ;;  %5622 = vtanh.f32 %v3198_v33 }
 0x89a   : > { %v5613_v37 = vpop.eup %5612 }
 0x89b   : > { %v5615_v38 = vpop.eup %5614  ;;  %v3201_v39 = vpop.f32.mrb[108].mxu0  ;;  %v3316_v40 = vpack.c.bf16 %v5613_v37, %v5609_v52 }
 0x89c   : > { %v3202_v54 = vadd.f32 %v3201_v39, %v6439_v41  ;;  %v3203_v43 = vpop.f32.mrb[109].mxu0  ;;  %v3317_v34 = vpack.c.bf16 %v5615_v38, %v5611_v36 }
 0x89d   : > { %v3204_v45 = vadd.f32 %v3203_v43, %v6443_v42  ;;  %v3205_v46 = vpop.f32.mrb[110].mxu0 }
 0x89e   : > { %5624 = vtanh.f32 %v3202_v54  ;;  %v3206_v49 = vadd.f32 %v3205_v46, %v6439_v41  ;;  %v3207_v56 = vpop.f32.mrb[111].mxu0  ;;  %3473 = vmatprep.mubr.bf16.mxu1 %v3317_v34 }
 0x89f   : > { %5626 = vtanh.f32 %v3204_v45  ;;  %v3208_v57 = vadd.f32 %v3207_v56, %v6443_v42  ;;  %3474 = vmatmul.mubr.bf16.gmra.mrb[100].mxu1 %v3316_v40 }
 0x8a0   : > { %v5617_v62 = vpop.eup %5616  ;;  %5628 = vtanh.f32 %v3206_v49 }
 0x8a1   : > { %v5619_v63 = vpop.eup %5618  ;;  %5630 = vtanh.f32 %v3208_v57 }
 0x8a2   : > { %v5621_v50 = vpop.eup %5620 }
 0x8a3   : > { %v5623_v53 = vpop.eup %5622  ;;  %v3211_v61 = vpop.f32.mrb[112].mxu0  ;;  %v3318_v0 = vpack.c.bf16 %v5621_v50, %v5617_v62 }
 0x8a4   : > { %v3212_v1 = vadd.f32 %v3211_v61, %v6439_v41  ;;  %v3213_v2 = vpop.f32.mrb[113].mxu0  ;;  %v3319_v3 = vpack.c.bf16 %v5623_v53, %v5619_v63 }
 0x8a5   : > { %v3214_v4 = vadd.f32 %v3213_v2, %v6443_v42  ;;  %v3215_v7 = vpop.f32.mrb[114].mxu0 }
 0x8a6   : > { %5632 = vtanh.f32 %v3212_v1  ;;  %v3216_v8 = vadd.f32 %v3215_v7, %v6439_v41  ;;  %v3217_v11 = vpop.f32.mrb[115].mxu0  ;;  %3481 = vmatprep.mubr.bf16.mxu1 %v3319_v3 }
 0x8a7   : > { %5634 = vtanh.f32 %v3214_v4  ;;  %v3218_v14 = vadd.f32 %v3217_v11, %v6443_v42  ;;  %3482 = vmatmul.mubr.bf16.gmra.mrb[104].mxu1 %v3318_v0 }
 0x8a8   : > { %v5625_v26 = vpop.eup %5624  ;;  %5636 = vtanh.f32 %v3216_v8 }
 0x8a9   : > { %v5627_v15 = vpop.eup %5626  ;;  %5638 = vtanh.f32 %v3218_v14 }
 0x8aa   : > { %v5629_v21 = vpop.eup %5628 }
 0x8ab   : > { %v5631_v22 = vpop.eup %5630  ;;  %v3221_v58 = vpop.f32.mrb[116].mxu0  ;;  %v3320_v29 = vpack.c.bf16 %v5629_v21, %v5625_v26 }
 0x8ac   : > { %v3222_v32 = vadd.f32 %v3221_v58, %v6439_v41  ;;  %v3223_v35 = vpop.f32.mrb[117].mxu0  ;;  %v3321_v33 = vpack.c.bf16 %v5631_v22, %v5627_v15 }
 0x8ad   : > { %v3224_v52 = vadd.f32 %v3223_v35, %v6443_v42  ;;  %v3225_v36 = vpop.f32.mrb[118].mxu0 }
 0x8ae   : > { %5640 = vtanh.f32 %v3222_v32  ;;  %v3226_v37 = vadd.f32 %v3225_v36, %v6439_v41  ;;  %v3227_v38 = vpop.f32.mrb[119].mxu0  ;;  %3489 = vmatprep.mubr.bf16.mxu1 %v3321_v33 }
 0x8af   : > { %5642 = vtanh.f32 %v3224_v52  ;;  %v3228_v39 = vadd.f32 %v3227_v38, %v6443_v42  ;;  %3490 = vmatmul.mubr.bf16.gmra.mrb[108].mxu1 %v3320_v29 }
 0x8b0   : > { %v5633_v40 = vpop.eup %5632  ;;  %5644 = vtanh.f32 %v3226_v37 }
 0x8b1   : > { %v5635_v54 = vpop.eup %5634  ;;  %5646 = vtanh.f32 %v3228_v39 }
 0x8b2   : > { %v5637_v43 = vpop.eup %5636 }
 0x8b3   : > { %v5639_v34 = vpop.eup %5638  ;;  %v3231_v45 = vpop.f32.mrb[120].mxu0  ;;  %v3322_v46 = vpack.c.bf16 %v5637_v43, %v5633_v40  ;;  %v5403_v43 = vld [vmem:[%s6715_s6 + $0x38] sm:$0xff]  }
 0x8b4   : > { %v3232_v49 = vadd.f32 %v3231_v45, %v6439_v41  ;;  %v3233_v56 = vpop.f32.mrb[121].mxu0  ;;  %v3323_v57 = vpack.c.bf16 %v5639_v34, %v5635_v54  ;;  %v5402_v54 = vld [vmem:[%s6715_s6 + $0x30] sm:$0xff]   ;;  %v5795_v34 = vmov 0.0|0.0   ;;  %v5404_v45 = vld [vmem:[%s6717_s3] sm:$0xff]  }
 0x8b5   : > { %v3234_v62 = vadd.f32 %v3233_v56, %v6443_v42  ;;  %v3235_v63 = vpop.f32.mrb[122].mxu0  ;;  %5033 = vmatprep.subr.bf16.mxu0 %v5402_v54  ;;  %5053 = vmatprep.subr.bf16.mxu1 %v5404_v45  ;;  %v5407_v56 = vld [vmem:[%s6717_s3 + $0x18] sm:$0xff]  }
 0x8b6   : > { %5648 = vtanh.f32 %v3232_v49  ;;  %v3236_v50 = vadd.f32 %v3235_v63, %v6439_v41  ;;  %v3237_v53 = vpop.f32.mrb[123].mxu0  ;;  %3497 = vmatprep.mubr.bf16.mxu1 %v3323_v57  ;;  %5034 = vmatpush3.bf16.msra.mxu0 %v5402_v54  ;;  %v5406_v49 = vld [vmem:[%s6717_s3 + $0x10] sm:$0xff]  }
 0x8b7   : > { %5650 = vtanh.f32 %v3234_v62  ;;  %v3238_v61 = vadd.f32 %v3237_v53, %v6443_v42  ;;  %3498 = vmatmul.mubr.bf16.gmra.mrb[112].mxu1 %v3322_v46  ;;  %5035 = vmatprep.subr.bf16.mxu0 %v5403_v43  ;;  %v5405_v46 = vld [vmem:[%s6717_s3 + $0x8] sm:$0xff]   ;;  %v6486_v62 = vld [vmem:[%s6718_s5] ss:$0 sm:$0xff]  ;;  %s6722_s5 = sld [smem:[#allocation8_spill]] }
 0x8b8   : > { %v5641_v0 = vpop.eup %5640  ;;  %5652 = vtanh.f32 %v3236_v50  ;;  %5054 = vmatpush3.bf16.msra.mxu1 %v5404_v45 }
 0x8b9   : > { %v5643_v1 = vpop.eup %5642  ;;  %5654 = vtanh.f32 %v3238_v61  ;;  %5055 = vmatprep.subr.bf16.mxu1 %v5405_v46 }
 0x8ba   : > { %v5645_v2 = vpop.eup %5644  ;;  %5036 = vmatpush3.bf16.msra.mxu0 %v5403_v43 }
 0x8bb   : > { %v5647_v3 = vpop.eup %5646  ;;  %v3241_v4 = vpop.f32.mrb[124].mxu0  ;;  %v3324_v7 = vpack.c.bf16 %v5645_v2, %v5641_v0  ;;  %5147 = vmatprep.subr.bf16.mxu0 %v5795_v34 }
 0x8bc   : > { %v3242_v8 = vadd.f32 %v3241_v4, %v6439_v41  ;;  %v3243_v11 = vpop.f32.mrb[125].mxu0  ;;  %v3325_v14 = vpack.c.bf16 %v5647_v3, %v5643_v1  ;;  %5056 = vmatpush3.bf16.msra.mxu1 %v5405_v46 }
 0x8bd   : > { %v3244_v26 = vadd.f32 %v3243_v11, %v6443_v42  ;;  %v3245_v15 = vpop.f32.mrb[126].mxu0  ;;  %5057 = vmatprep.subr.bf16.mxu1 %v5406_v49 }
 0x8be   : > { %5656 = vtanh.f32 %v3242_v8  ;;  %v3246_v21 = vadd.f32 %v3245_v15, %v6439_v41  ;;  %v3247_v22 = vpop.f32.mrb[127].mxu0  ;;  %3505 = vmatprep.mubr.bf16.mxu1 %v3325_v14 }
 0x8bf   : > { %5658 = vtanh.f32 %v3244_v26  ;;  %v3248_v58 = vadd.f32 %v3247_v22, %v6443_v42  ;;  %3506 = vmatmul.mubr.bf16.gmra.mrb[116].mxu1 %v3324_v7 }
 0x8c0   : > { %v5649_v29 = vpop.eup %5648  ;;  %5660 = vtanh.f32 %v3246_v21  ;;  %5058 = vmatpush3.bf16.msra.mxu1 %v5406_v49 }
 0x8c1   : > { %v5651_v32 = vpop.eup %5650  ;;  %5662 = vtanh.f32 %v3248_v58  ;;  %5059 = vmatprep.subr.bf16.mxu1 %v5407_v56 }
 0x8c2   : > { %v5653_v35 = vpop.eup %5652 }
 0x8c3   : > { %v5655_v33 = vpop.eup %5654  ;;  %v3326_v52 = vpack.c.bf16 %v5653_v35, %v5649_v29 }
 0x8c4   : > { %v3327_v36 = vpack.c.bf16 %v5655_v33, %v5651_v32  ;;  %5060 = vmatpush3.bf16.msra.mxu1 %v5407_v56 }
 0x8c5   : > { %5179 = vmatprep.subr.bf16.mxu1 %v5795_v34 }
 0x8c6   : > { %3513 = vmatprep.mubr.bf16.mxu1 %v3327_v36 }
 0x8c7   : > { %3514 = vmatmul.mubr.bf16.gmra.mrb[120].mxu1 %v3326_v52 }
 0x8c8   : > { %v5657_v37 = vpop.eup %5656 }
 0x8c9   : > { %v5659_v41 = vpop.eup %5658 }
 0x8ca   : > { %v5661_v38 = vpop.eup %5660 }
 0x8cb   : > { %v5663_v39 = vpop.eup %5662  ;;  %v3328_v42 = vpack.c.bf16 %v5661_v38, %v5657_v37 }
 0x8cc   : > { %v3329_v40 = vpack.c.bf16 %v5663_v39, %v5659_v41 }
 0x8ce   : > { %3521 = vmatprep.mubr.bf16.mxu1 %v3329_v40 }
 0x8cf   : > { %3522 = vmatmul.mubr.bf16.gmra.mrb[124].mxu1 %v3328_v42 }
 0x96a   : > { %v4729_v57 = vpop.f32.mrb[96].mxu1 }
 0x96b   : > { %v4730_v63 = vpop.f32.mrb[97].mxu1 }
 0x96c   : > { %v4731_v50 = vadd.f32 %v4730_v63, %v4729_v57  ;;  %v4732_v53 = vpop.f32.mrb[98].mxu1 }
 0x96d   : > { %v4733_v61 = vpop.f32.mrb[99].mxu1 }
 0x96e   : > { %v3468_v0 = vadd.f32 %v4731_v50, %v6486_v62  ;;  %v4734_v1 = vadd.f32 %v4733_v61, %v4732_v53 }
 0x970   : > { %v3471_v2 = vadd.f32 %v4734_v1, %v6486_v62  ;;  %v3530_v3 = vmax.f32 %v3468_v0, 0.0 }
 0x972   : > { %v3531_v4 = vmax.f32 %v3471_v2, 0.0  ;;  %v4735_v7 = vpop.f32.mrb[100].mxu1 }
 0x973   : > { %v4736_v8 = vpop.f32.mrb[101].mxu1 }
 0x974   : > { %v4737_v11 = vadd.f32 %v4736_v8, %v4735_v7  ;;  %v4738_v14 = vpop.f32.mrb[102].mxu1  ;;  %v3562_v26 = vpack.c.bf16 %v3531_v4, %v3530_v3 }
 0x975   : > { %v4739_v15 = vpop.f32.mrb[103].mxu1 }
 0x976   : > { %v3476_v21 = vadd.f32 %v4737_v11, %v6486_v62  ;;  %v4740_v22 = vadd.f32 %v4739_v15, %v4738_v14  ;;  %5037 = vmatprep.mubr.bf16.mxu0 %v3562_v26 }
 0x978   : > { %v3479_v58 = vadd.f32 %v4740_v22, %v6486_v62  ;;  %v3532_v29 = vmax.f32 %v3476_v21, 0.0 }
 0x97a   : > { %v3533_v32 = vmax.f32 %v3479_v58, 0.0  ;;  %v4741_v35 = vpop.f32.mrb[104].mxu1 }
 0x97b   : > { %v4742_v33 = vpop.f32.mrb[105].mxu1 }
 0x97c   : > { %v3563_v52 = vpack.c.bf16 %v3533_v32, %v3532_v29  ;;  %v4743_v36 = vadd.f32 %v4742_v33, %v4741_v35  ;;  %v4744_v37 = vpop.f32.mrb[106].mxu1 }
 0x97d   : > { %v4745_v38 = vpop.f32.mrb[107].mxu1 }
 0x97e   : > { %v3484_v39 = vadd.f32 %v4743_v36, %v6486_v62  ;;  %v4746_v42 = vadd.f32 %v4745_v38, %v4744_v37  ;;  %5038 = vmatmul.mubr.bf16.vlgmr.msra.gmra.mrb[128].mxu0 %v3563_v52 }
 0x97f   : > { %5150 = vmatpush3.bf16.xpose.msk.msra.mxu0 %vm6494_vm5, %v5148_v30 }
 0x980   : > { %v3487_v40 = vadd.f32 %v4746_v42, %v6486_v62  ;;  %5151 = vmatprep.subr.bf16.mxu0 %v5795_v34  ;;  %v3534_v54 = vmax.f32 %v3484_v39, 0.0 }
 0x982   : > { %v3535_v43 = vmax.f32 %v3487_v40, 0.0  ;;  %v4747_v45 = vpop.f32.mrb[108].mxu1 }
 0x983   : > { %v4748_v46 = vpop.f32.mrb[109].mxu1 }
 0x984   : > { %v4749_v49 = vadd.f32 %v4748_v46, %v4747_v45  ;;  %v4750_v56 = vpop.f32.mrb[110].mxu1  ;;  %v3564_v57 = vpack.c.bf16 %v3535_v43, %v3534_v54 }
 0x985   : > { %v4751_v63 = vpop.f32.mrb[111].mxu1 }
 0x986   : > { %v3492_v50 = vadd.f32 %v4749_v49, %v6486_v62  ;;  %v4752_v53 = vadd.f32 %v4751_v63, %v4750_v56  ;;  %5041 = vmatprep.mubr.bf16.mxu0 %v3564_v57 }
 0x987   : > { %5154 = vmatpush3.bf16.xpose.msk.msra.mxu0 %vm6494_vm5, %v5152_v28 }
 0x988   : > { %v3495_v23 = vadd.f32 %v4752_v53, %v6486_v62  ;;  %5155 = vmatprep.subr.bf16.mxu0 %v5795_v34  ;;  %v3536_v24 = vmax.f32 %v3492_v50, 0.0 }
 0x98a   : > { %v3537_v30 = vmax.f32 %v3495_v23, 0.0  ;;  %v4753_v61 = vpop.f32.mrb[112].mxu1 }
 0x98b   : > { %v4754_v0 = vpop.f32.mrb[113].mxu1 }
 0x98c   : > { %v4755_v1 = vadd.f32 %v4754_v0, %v4753_v61  ;;  %v4756_v2 = vpop.f32.mrb[114].mxu1  ;;  %v3565_v3 = vpack.c.bf16 %v3537_v30, %v3536_v24 }
 0x98d   : > { %v4757_v4 = vpop.f32.mrb[115].mxu1 }
 0x98e   : > { %v3500_v7 = vadd.f32 %v4755_v1, %v6486_v62  ;;  %v4758_v8 = vadd.f32 %v4757_v4, %v4756_v2  ;;  %5042 = vmatmul.mubr.bf16.gmra.mrb[132].mxu0 %v3565_v3 }
 0x98f   : > { %5158 = vmatpush3.bf16.xpose.msk.msra.mxu0 %vm6494_vm5, %v5156_v60 }
 0x990   : > { %v3503_v19 = vadd.f32 %v4758_v8, %v6486_v62  ;;  %5159 = vmatprep.subr.bf16.mxu0 %v5795_v34  ;;  %v3538_v20 = vmax.f32 %v3500_v7, 0.0 }
 0x992   : > { %v3539_v28 = vmax.f32 %v3503_v19, 0.0  ;;  %v4759_v11 = vpop.f32.mrb[116].mxu1 }
 0x993   : > { %v4760_v14 = vpop.f32.mrb[117].mxu1 }
 0x994   : > { %v4761_v26 = vadd.f32 %v4760_v14, %v4759_v11  ;;  %v4762_v15 = vpop.f32.mrb[118].mxu1  ;;  %v3566_v21 = vpack.c.bf16 %v3539_v28, %v3538_v20 }
 0x995   : > { %v4763_v22 = vpop.f32.mrb[119].mxu1 }
 0x996   : > { %v3508_v58 = vadd.f32 %v4761_v26, %v6486_v62  ;;  %v4764_v29 = vadd.f32 %v4763_v22, %v4762_v15  ;;  %5045 = vmatprep.mubr.bf16.mxu0 %v3566_v21 }
 0x997   : > { %5162 = vmatpush3.bf16.xpose.msk.msra.mxu0 %vm6494_vm5, %v5160_v59 }
 0x998   : > { %v3511_v47 = vadd.f32 %v4764_v29, %v6486_v62  ;;  %5163 = vmatprep.subr.bf16.mxu0 %v5795_v34  ;;  %v3540_v48 = vmax.f32 %v3508_v58, 0.0 }
 0x99a   : > { %v3541_v60 = vmax.f32 %v3511_v47, 0.0  ;;  %v4765_v32 = vpop.f32.mrb[120].mxu1 }
 0x99b   : > { %v4766_v35 = vpop.f32.mrb[121].mxu1 }
 0x99c   : > { %v4767_v33 = vadd.f32 %v4766_v35, %v4765_v32  ;;  %v4768_v52 = vpop.f32.mrb[122].mxu1  ;;  %v3567_v36 = vpack.c.bf16 %v3541_v60, %v3540_v48 }
 0x99d   : > { %v4769_v37 = vpop.f32.mrb[123].mxu1 }
 0x99e   : > { %v3516_v38 = vadd.f32 %v4767_v33, %v6486_v62  ;;  %v4770_v39 = vadd.f32 %v4769_v37, %v4768_v52  ;;  %5046 = vmatmul.mubr.bf16.gmra.mrb[136].mxu0 %v3567_v36 }
 0x99f   : > { %5166 = vmatpush3.bf16.xpose.msk.msra.mxu0 %vm6494_vm5, %v5164_v27 }
 0x9a0   : > { %v3519_v55 = vadd.f32 %v4770_v39, %v6486_v62  ;;  %5167 = vmatprep.subr.bf16.mxu0 %v5795_v34  ;;  %v3542_v44 = vmax.f32 %v3516_v38, 0.0 }
 0x9a2   : > { %v3543_v59 = vmax.f32 %v3519_v55, 0.0  ;;  %v4771_v42 = vpop.f32.mrb[124].mxu1 }
 0x9a3   : > { %v4772_v40 = vpop.f32.mrb[125].mxu1 }
 0x9a4   : > { %v4773_v54 = vadd.f32 %v4772_v40, %v4771_v42  ;;  %v4774_v43 = vpop.f32.mrb[126].mxu1  ;;  %v3568_v45 = vpack.c.bf16 %v3543_v59, %v3542_v44 }
 0x9a5   : > { %v4775_v46 = vpop.f32.mrb[127].mxu1 }
 0x9a6   : > { %v3524_v49 = vadd.f32 %v4773_v54, %v6486_v62  ;;  %v4776_v56 = vadd.f32 %v4775_v46, %v4774_v43  ;;  %5049 = vmatprep.mubr.bf16.mxu0 %v3568_v45 }
 0x9a7   : > { %5170 = vmatpush3.bf16.xpose.msk.msra.mxu0 %vm6494_vm5, %v5168_v25 }
 0x9a8   : > { %v3527_v16 = vadd.f32 %v4776_v56, %v6486_v62  ;;  %5171 = vmatprep.subr.bf16.mxu0 %v5795_v34  ;;  %v3544_v17 = vmax.f32 %v3524_v49, 0.0  ;;  %v5797_v56 = vmov 0.0  }
 0x9aa   : > { %v3545_v27 = vmax.f32 %v3527_v16, 0.0  ;;  %v3938_v16 = vld [vmem:[%s6722_s5] sm:$0x1]  ;;  %s4337_s5 = sshll.u32 %s1024_s28, 1 }
 0x9ab   : > { %s1026_s3 = scalar_lea.vmem [#allocation3], %s4337_s5  ;;  %s5700_s5 = sshll.u32 %s5798_s0, 4  ;;  %s5701_s5 = int_to_ptr.vmem [resolvable:$false] %s5700_s5 }
 0x9ac   : > { %v3569_v57 = vpack.c.bf16 %v3545_v27, %v3544_v17  ;;  %v4078_v17 = vld [vmem:[#allocation2] sm:$0x1]  ;;  %s4229_s6 = sshll.u32 %s1026_s3, 4  ;;  %s6624_s6 = int_to_ptr.vmem [resolvable:$true] %s4229_s6 }
 0x9ad   : > { %4081 = vperm.xlu0 %5289, %v4078_v17   ;;  %v6569_v27 = vld [vmem:[%s6723_s13] ss:$0 sm:$0xff]  ;;  %s5702_s13 = scalar_lea.vmem %s5701_s5, 64  ;;  %p5703_p0 = scmp.lt.s32.totalorder %s6624_s6, %s5701_s5 }
 0x9ae   : > { %5050 = vmatmul.mubr.bf16.gmra.mrb[140].mxu0 %v3569_v57 }
 0x9af   : > { %5174 = vmatpush3.bf16.xpose.msk.msra.mxu0 %vm6494_vm5, %v5172_v31  ;;  %5109 = vmatprep.mubr.msk.f32.mxu0 %vm5796_vm6, %v5797_v56 }
 0x9b0   : > { %5175 = vmatprep.subr.bf16.mxu0 %v5795_v34 }
 0x9b7   : > { %5178 = vmatpush3.bf16.xpose.msk.msra.mxu0 %vm6494_vm5, %v5176_v18 }
 0x9be   : > { %5110 = vmatmul.mubr.msk.f32.vlgmr.msra.gmra.mrb[144].mxu0 %vm3955_vm4, %v3938_v16 }
 0xa2c   : > { %v4082_v17 = vpop.permute.xlu0 %4081 }
 0xa51   : > { %v5039_v13 = vpop.f32.mrb[128].mxu0 }
 0xa52   : > { %v3668_v25 = vadd.f32 %v5039_v13, %v4498_v12  ;;  %v3659_v62 = vpop.f32.mrb[129].mxu0 }
 0xa53   : > { %v3660_v63 = vadd.f32 %v4498_v12, %v3659_v62  ;;  %v5040_v50 = vpop.f32.mrb[130].mxu0 }
 0xa54   : > { %v3671_v53 = vadd.f32 %v5040_v50, %v4498_v12  ;;  %v3662_v23 = vpop.f32.mrb[131].mxu0  ;;  %v3724_v10 = vmax.f32 %v3668_v25, 0.0 }
 0xa55   : > { %v3663_v9 = vadd.f32 %v4498_v12, %v3662_v23  ;;  %v3722_v31 = vmax.f32 %v3660_v63, 0.0 }
 0xa56   : > { %v3725_v24 = vmax.f32 %v3671_v53, 0.0 }
 0xa57   : > { %v3723_v30 = vmax.f32 %v3663_v9, 0.0 }
 0xa58   : > { %v3747_v61 = vpack.c.bf16 %v3725_v24, %v3724_v10 }
 0xa59   : > { %v3746_v0 = vpack.c.bf16 %v3723_v30, %v3722_v31 }
 0xa5b   : > { %5061 = vmatprep.mubr.msk.bf16.mxu1 %vm1446_vm3, %v3746_v0 }
 0xa5c   : > { %5062 = vmatmul.mubr.msk.bf16.vlgmr.msra.gmra.mrb[128].mxu1 %vm1446_vm3, %v3747_v61 }
 0xa61   : > { %v5043_v5 = vpop.f32.mrb[132].mxu0 }
 0xa62   : > { %v3684_v6 = vadd.f32 %v5043_v5, %v4498_v12  ;;  %v3675_v18 = vpop.f32.mrb[133].mxu0 }
 0xa63   : > { %v3676_v41 = vadd.f32 %v4498_v12, %v3675_v18  ;;  %v5044_v1 = vpop.f32.mrb[134].mxu0 }
 0xa64   : > { %v3687_v2 = vadd.f32 %v5044_v1, %v4498_v12  ;;  %v3678_v3 = vpop.f32.mrb[135].mxu0  ;;  %v3728_v7 = vmax.f32 %v3684_v6, 0.0 }
 0xa65   : > { %v3679_v4 = vadd.f32 %v4498_v12, %v3678_v3  ;;  %v3726_v19 = vmax.f32 %v3676_v41, 0.0 }
 0xa66   : > { %v3729_v8 = vmax.f32 %v3687_v2, 0.0 }
 0xa67   : > { %v3727_v20 = vmax.f32 %v3679_v4, 0.0 }
 0xa68   : > { %v3749_v28 = vpack.c.bf16 %v3729_v8, %v3728_v7 }
 0xa69   : > { %v3748_v11 = vpack.c.bf16 %v3727_v20, %v3726_v19 }
 0xa6b   : > { %5065 = vmatprep.mubr.msk.bf16.mxu1 %vm1446_vm3, %v3748_v11 }
 0xa6c   : > { %5066 = vmatmul.mubr.msk.bf16.gmra.mrb[132].mxu1 %vm1446_vm3, %v3749_v28 }
 0xa71   : > { %v5047_v14 = vpop.f32.mrb[136].mxu0 }
 0xa72   : > { %v3700_v26 = vadd.f32 %v5047_v14, %v4498_v12  ;;  %v3691_v15 = vpop.f32.mrb[137].mxu0 }
 0xa73   : > { %v3692_v21 = vadd.f32 %v4498_v12, %v3691_v15  ;;  %v5048_v22 = vpop.f32.mrb[138].mxu0 }
 0xa74   : > { %v3703_v58 = vadd.f32 %v5048_v22, %v4498_v12  ;;  %v3694_v29 = vpop.f32.mrb[139].mxu0  ;;  %v3732_v48 = vmax.f32 %v3700_v26, 0.0 }
 0xa75   : > { %v3695_v47 = vadd.f32 %v4498_v12, %v3694_v29  ;;  %v3730_v32 = vmax.f32 %v3692_v21, 0.0 }
 0xa76   : > { %v3733_v60 = vmax.f32 %v3703_v58, 0.0 }
 0xa77   : > { %v3731_v35 = vmax.f32 %v3695_v47, 0.0 }
 0xa78   : > { %v3751_v33 = vpack.c.bf16 %v3733_v60, %v3732_v48 }
 0xa79   : > { %v3750_v52 = vpack.c.bf16 %v3731_v35, %v3730_v32 }
 0xa7b   : > { %5069 = vmatprep.mubr.msk.bf16.mxu1 %vm1446_vm3, %v3750_v52 }
 0xa7c   : > { %5070 = vmatmul.mubr.msk.bf16.gmra.mrb[136].mxu1 %vm1446_vm3, %v3751_v33 }
 0xa81   : > { %v5051_v36 = vpop.f32.mrb[140].mxu0 }
 0xa82   : > { %v3716_v37 = vadd.f32 %v5051_v36, %v4498_v12  ;;  %v3707_v38 = vpop.f32.mrb[141].mxu0 }
 0xa83   : > { %v3708_v39 = vadd.f32 %v4498_v12, %v3707_v38  ;;  %v5052_v55 = vpop.f32.mrb[142].mxu0 }
 0xa84   : > { %v3719_v44 = vadd.f32 %v5052_v55, %v4498_v12  ;;  %v3710_v59 = vpop.f32.mrb[143].mxu0  ;;  %v3736_v40 = vmax.f32 %v3716_v37, 0.0 }
 0xa85   : > { %v3711_v42 = vadd.f32 %v4498_v12, %v3710_v59  ;;  %v3734_v43 = vmax.f32 %v3708_v39, 0.0 }
 0xa86   : > { %v3737_v54 = vmax.f32 %v3719_v44, 0.0 }
 0xa87   : > { %v3735_v45 = vmax.f32 %v3711_v42, 0.0 }
 0xa88   : > { %v3753_v46 = vpack.c.bf16 %v3737_v54, %v3736_v40 }
 0xa89   : > { %v3752_v49 = vpack.c.bf16 %v3735_v45, %v3734_v43 }
 0xa8b   : > { %5073 = vmatprep.mubr.msk.bf16.mxu1 %vm1446_vm3, %v3752_v49  ;;  %v4077_v49 = vld [vmem:[%s6726_s12] sm:$0x1]  ;;  %s5696_s12 = scalar_lea.vmem %s6624_s6, 32 }
 0xa8c   : > { %5074 = vmatmul.mubr.msk.bf16.gmra.mrb[140].mxu1 %vm1446_vm3, %v3753_v46  ;;  %p5697_p11 = scmp.ne.s32.totalorder %s6624_s6, %s5696_s12  ;;  %p5704_p1 = scmp.lt.s32.totalorder %s5702_s13, %s5696_s12 }
 0xa8d   : > { %5144 = vmatprep.mubr.msk.f32.mxu1 %vm5796_vm6, %v5797_v56 }
 0xa8e   : > { %p5698_p12 = pnand %p5697_p11, %p6010_p5  ;;  %p5705_p2 = por %p5704_p1, %p5703_p0 }
 0xa90   : > { %p5699_p13 = pneg %p5698_p12 }
 0xa91   : > { %v4073_v56 = vpop.f32.mrb[144].mxu0 }
 0xa92   : > { %v5111_v16 = vpop.f32.mrb[145].mxu0  ;;  %p5706_p3 = pnand %p5705_p2, %p5699_p13 }
 0xb2f   : > { %v5063_v57 = vpop.f32.mrb[128].mxu1 }
 0xb30   : > { %v3852_v12 = vadd.f32 %v5063_v57, %v6569_v27  ;;  %v3843_v13 = vpop.f32.mrb[129].mxu1 }
 0xb31   : > { %v3844_v25 = vadd.f32 %v6569_v27, %v3843_v13  ;;  %v5064_v62 = vpop.f32.mrb[130].mxu1 }
 0xb32   : > { %5664 = vtanh.f32 %v3852_v12  ;;  %v3855_v63 = vadd.f32 %v5064_v62, %v6569_v27  ;;  %v3846_v50 = vpop.f32.mrb[131].mxu1 }
 0xb33   : > { %5666 = vtanh.f32 %v3844_v25  ;;  %v3847_v53 = vadd.f32 %v6569_v27, %v3846_v50 }
 0xb34   : > { %5668 = vtanh.f32 %v3855_v63 }
 0xb35   : > { %5670 = vtanh.f32 %v3847_v53 }
 0xb3c   : > { %v5665_v23 = vpop.eup %5664 }
 0xb3d   : > { %v5667_v9 = vpop.eup %5666 }
 0xb3e   : > { %v5669_v10 = vpop.eup %5668 }
 0xb3f   : > { %v5671_v24 = vpop.eup %5670  ;;  %v5067_v31 = vpop.f32.mrb[132].mxu1  ;;  %v5184_v61 = vpack.c.bf16 %v5669_v10, %v5665_v23 }
 0xb40   : > { %v3868_v0 = vadd.f32 %v5067_v31, %v6569_v27  ;;  %v3859_v5 = vpop.f32.mrb[133].mxu1  ;;  %v5180_v6 = vpack.c.bf16 %v5671_v24, %v5667_v9 }
 0xb41   : > { %v3860_v18 = vadd.f32 %v6569_v27, %v3859_v5  ;;  %v5068_v41 = vpop.f32.mrb[134].mxu1 }
 0xb42   : > { %5672 = vtanh.f32 %v3868_v0  ;;  %v3871_v1 = vadd.f32 %v5068_v41, %v6569_v27  ;;  %v3862_v2 = vpop.f32.mrb[135].mxu1  ;;  %5182 = vmatpush3.bf16.xpose.msk.msra.mxu1 %vm6577_vm7, %v5180_v6 }
 0xb43   : > { %5674 = vtanh.f32 %v3860_v18  ;;  %v3863_v3 = vadd.f32 %v6569_v27, %v3862_v2  ;;  %5183 = vmatprep.subr.bf16.mxu1 %v5795_v34 }
 0xb44   : > { %5676 = vtanh.f32 %v3871_v1 }
 0xb45   : > { %5678 = vtanh.f32 %v3863_v3 }
 0xb4a   : > { %5186 = vmatpush3.bf16.xpose.msk.msra.mxu1 %vm6577_vm7, %v5184_v61 }
 0xb4b   : > { %5187 = vmatprep.subr.bf16.mxu1 %v5795_v34 }
 0xb4c   : > { %v5673_v4 = vpop.eup %5672 }
 0xb4d   : > { %v5675_v7 = vpop.eup %5674 }
 0xb4e   : > { %v5677_v8 = vpop.eup %5676 }
 0xb4f   : > { %v5679_v19 = vpop.eup %5678  ;;  %v5071_v20 = vpop.f32.mrb[136].mxu1  ;;  %v5192_v28 = vpack.c.bf16 %v5677_v8, %v5673_v4 }
 0xb50   : > { %v3884_v11 = vadd.f32 %v5071_v20, %v6569_v27  ;;  %v3875_v14 = vpop.f32.mrb[137].mxu1  ;;  %v5188_v26 = vpack.c.bf16 %v5679_v19, %v5675_v7 }
 0xb51   : > { %v3876_v15 = vadd.f32 %v6569_v27, %v3875_v14  ;;  %v5072_v21 = vpop.f32.mrb[138].mxu1 }
 0xb52   : > { %5680 = vtanh.f32 %v3884_v11  ;;  %v3887_v22 = vadd.f32 %v5072_v21, %v6569_v27  ;;  %v3878_v58 = vpop.f32.mrb[139].mxu1  ;;  %5190 = vmatpush3.bf16.xpose.msk.msra.mxu1 %vm6577_vm7, %v5188_v26 }
 0xb53   : > { %5682 = vtanh.f32 %v3876_v15  ;;  %v3879_v29 = vadd.f32 %v6569_v27, %v3878_v58  ;;  %5191 = vmatprep.subr.bf16.mxu1 %v5795_v34 }
 0xb54   : > { %5684 = vtanh.f32 %v3887_v22 }
 0xb55   : > { %5686 = vtanh.f32 %v3879_v29 }
 0xb5a   : > { %5194 = vmatpush3.bf16.xpose.msk.msra.mxu1 %vm6577_vm7, %v5192_v28 }
 0xb5b   : > { %5195 = vmatprep.subr.bf16.mxu1 %v5795_v34 }
 0xb5c   : > { %v5681_v47 = vpop.eup %5680 }
 0xb5d   : > { %v5683_v48 = vpop.eup %5682 }
 0xb5e   : > { %v5685_v60 = vpop.eup %5684 }
 0xb5f   : > { %v5687_v32 = vpop.eup %5686  ;;  %v5075_v35 = vpop.f32.mrb[140].mxu1  ;;  %v5200_v33 = vpack.c.bf16 %v5685_v60, %v5681_v47 }
 0xb60   : > { %v3900_v52 = vadd.f32 %v5075_v35, %v6569_v27  ;;  %v3891_v36 = vpop.f32.mrb[141].mxu1  ;;  %v5196_v37 = vpack.c.bf16 %v5687_v32, %v5683_v48 }
 0xb61   : > { %v3892_v38 = vadd.f32 %v6569_v27, %v3891_v36  ;;  %v5076_v39 = vpop.f32.mrb[142].mxu1 }
 0xb62   : > { %5688 = vtanh.f32 %v3900_v52  ;;  %v3903_v55 = vadd.f32 %v5076_v39, %v6569_v27  ;;  %v3894_v44 = vpop.f32.mrb[143].mxu1  ;;  %5198 = vmatpush3.bf16.xpose.msk.msra.mxu1 %vm6577_vm7, %v5196_v37 }
 0xb63   : > { %5690 = vtanh.f32 %v3892_v38  ;;  %v3895_v59 = vadd.f32 %v6569_v27, %v3894_v44  ;;  %5199 = vmatprep.subr.bf16.mxu1 %v5795_v34  ;;  %v4087_v27 = vrot.slane %v4082_v17, %v6152_v51 }
 0xb64   : > { %5692 = vtanh.f32 %v3903_v55 }
 0xb65   : > { %5694 = vtanh.f32 %v3895_v59 }
 0xb6a   : > { %5202 = vmatpush3.bf16.xpose.msk.msra.mxu1 %vm6577_vm7, %v5200_v33 }
 0xb6b   : > { %5203 = vmatprep.subr.bf16.mxu1 %v5795_v34 }
 0xb6c   : > { %v5689_v42 = vpop.eup %5688 }
 0xb6d   : > { %v5691_v40 = vpop.eup %5690 }
 0xb6e   : > { %v5693_v54 = vpop.eup %5692 }
 0xb6f   : > { %v5695_v43 = vpop.eup %5694  ;;  %v5208_v45 = vpack.c.bf16 %v5693_v54, %v5689_v42 }
 0xb70   : > { %v5204_v46 = vpack.c.bf16 %v5695_v43, %v5691_v40 }
 0xb72   : > { %5206 = vmatpush3.bf16.xpose.msk.msra.mxu1 %vm6577_vm7, %v5204_v46 }
 0xb73   : > { %5207 = vmatprep.subr.bf16.mxu1 %v5795_v34 }
 0xb7a   : > { %5210 = vmatpush3.bf16.xpose.msk.msra.mxu1 %vm6577_vm7, %v5208_v45 }
 0xb81   : > { %5145 = vmatmul.mubr.msk.f32.vlgmr.msra.gmra.mrb[144].mxu1 %vm1261_vm2, %v4077_v49 }
 0xc54   : > { %v4205_v57 = vpop.f32.mrb[144].mxu1 }
 0xc55   : > { %v4206_v12 = vadd.f32 %v4205_v57, %v4087_v27  ;;  %v5146_v13 = vpop.f32.mrb[145].mxu1 }
 0xc57   : > { %v4210_v34 = vrot.slane %v4206_v12, 7 }
 0xc59   : > { %v4213_v25 = vsel %vm4212_vm8, %v4073_v56, %v4210_v34 }
 0xc5a   : > { %4214 = vst [vmem:[%s1026_s3] sm:$0x3] %v4213_v25 }
 0xc5b   : > { %5709 = shalt.err (!%p5706_p3)
}
 0xc5c   : > { %s5710_s2 = scalar_lea.hbm %s6622_s8, 32  ;;  %s5714_s3 = scalar_lea.hbm %s5970_s4, 96 }
 0xc5d   : > { %p5711_p4 = scmp.ne.s32.totalorder %s6622_s8, %s5710_s2  ;;  %p5715_p9 = scmp.lt.u32.totalorder %s6622_s8, %s5970_s4 }
 0xc5e   : > { %p5716_p10 = scmp.lt.u32.totalorder %s5714_s3, %s5710_s2  ;;  %p5718_p12 = scmp.lt.u32.totalorder %s5710_s2, %s6622_s8 }
 0xc5f   : > { %p5712_p7 = pnand %p5711_p4, %p6010_p5 }
 0xc60   : > { %p5717_p11 = por %p5716_p10, %p5715_p9 }
 0xc61   : > { %p5713_p8 = pneg %p5712_p7 }
 0xc62   : > { %p5719_p0 = por %p5718_p12, %p5717_p11 }
 0xc64   : > { %p5720_p13 = pnand %p5719_p0, %p5713_p8 }
 0xc66   : > { %5723 = shalt.err (!%p5720_p13)
}
 0xc67   : > { %5212 = dma.vmem_to_hbm [thread:$0]  (%p6010_p5), %s6624_s6, 32, %s6622_s8, %s4216_s9  }
 0xc68 PF: > { %p5218_p1 = scmp.ge.s32.totalorder %s5758_s15, 2  ;;  %s4241_s13 = sand.u32 1, %s5746_s7  }
 0xc69   : > { %s4242_s12 = scalar_lea.sflag [#allocation4], %s4241_s13 }
 0xc6a   : > { %p5215_p2 = pnand %p5218_p1, %p6014_p6 }
 0xc6c   : > { %5741 = dma.done.wait (!%p5215_p2), %s4242_s12, 32  }
 0xc6d   : > { %5743 = vsyncadd (!%p5215_p2), %s4242_s12, 4294967264  ;;  %p79_p3 = scmp.ge.s32.totalorder %s5997_s16, 5   ;;  %s6727_s7 = smov %s5750_s10 }
 0xc6e   : > { %s6728_s10 = smov %s5754_s11  ;;  %s6729_s11 = smov %s6008_s23 }
 0xc6f   : > { %s6730_s15 = smov %s5997_s16  ;;  %81 = sbr.rel (!%p79_p3) target bundleno = 66 (0x42), region = 223 }
 0xc76   :  { %4247 = vsyncpa [#allocation4], 1 }
 0xc77   :  { %4249 = vsyncpa [#allocation4 + $0x1], 1 }

</bundles_post_ra>
